<compile_context>
chip_gen: v5e
topology: v5e:2x2
jax: 0.10.0
libtpu: 0.0.40
codegen_flags: <defaults>
</compile_context>

<pallas_src>
import functools

import jax
import jax.numpy as jnp
from jax.experimental import pallas as pl
from jax.experimental.pallas import tpu as pltpu

_LANES = 128
_EPS = 1e-5


# ----------------------------------------------------------------------------
# small helpers
# ----------------------------------------------------------------------------
def _round_up(a, b):
    return (a + b - 1) // b * b


def _pad_axis(a, axis, target):
    pad = target - a.shape[axis]
    if pad <= 0:
        return a
    widths = [(0, 0)] * a.ndim
    widths[axis] = (0, pad)
    return jnp.pad(a, widths)


@functools.lru_cache(maxsize=None)
def _vmem_limit():
    """Per-generation VMEM budget: 3/4 of physical, capped at 96 MiB."""
    cap = 64 * 1024 * 1024
    try:
        cap = int(pltpu.get_tpu_info().vmem_capacity_bytes)
    except Exception:
        pass
    return int(min(cap * 3 // 4, 96 * 1024 * 1024))


def _bn_scale_shift(s, q, count, gamma, beta, eps=_EPS):
    """Fold batch-norm (biased batch stats) into y*scale + shift.  O(C) JAX."""
    mean = s / count
    var = jnp.maximum(q / count - mean * mean, 0.0)
    scale = gamma * jax.lax.rsqrt(var + eps)
    shift = beta - mean * scale
    return scale, shift


def _fold_dw_pw(dw, pw, k, cin, cin_p, cout, cout_p):
    """Fold depthwise kxk into the 1x1: W[t, ci, co] = dw[t, ci] * pw[ci, co]."""
    dwt = jnp.transpose(dw.reshape(cin, k * k), (1, 0)).astype(jnp.float32)
    pwt = jnp.transpose(pw.reshape(cout, cin), (1, 0)).astype(jnp.float32)
    w = dwt[:, :, None] * pwt[None, :, :]                   # (k2, cin, cout)
    return _pad_axis(_pad_axis(w, 1, cin_p), 2, cout_p)


def _tap_plan(k, stride, pad, ho, wo, hin, win):
    """Static plan: for each tap -> (parity image index, row start, col start)
    inside an in-kernel zero-padded scratch; plus placement offset & scratch
    size.  Stride 2 uses 4 parity sub-images so all tap slices are unit-stride."""
    def axis_offsets():
        offs = []
        for kk in range(k):
            raw = kk - pad
            par = raw % stride
            offs.append((par, (raw - par) // stride))
        return offs

    def layout(offs, out_sz, in_sz):
        mn = min(o for _, o in offs)
        mx = max(o for _, o in offs)
        shift = -mn
        buf = max(out_sz + mx - mn, shift + in_sz)
        return shift, buf

    hoffs = axis_offsets()
    woffs = axis_offsets()
    sh, rh = layout(hoffs, ho, hin)
    sw, rw = layout(woffs, wo, win)
    taps = []
    for kh in range(k):
        ph, oh = hoffs[kh]
        for kw in range(k):
            pw_, ow = woffs[kw]
            taps.append((ph * stride + pw_, oh + sh, ow + sw))
    return stride * stride, (sh, sw), (rh, rw), tuple(taps)


# ----------------------------------------------------------------------------
# Pallas kernels
# ----------------------------------------------------------------------------
def _conv_stats_kernel(x_ref, w_ref, scale_ref, shift_ref, y_ref, stat_ref,
                       xpad_ref, *, taps, place, hin, win, ho, wo,
                       apply_affine):
    """[optional fused BN-apply] -> relu -> zero-pad into VMEM scratch ->
    folded depthwise+pointwise conv as k^2 MXU matmuls -> per-step BN partial
    sums (rows 0/1 of an (8, C) stats tile)."""
    sh, sw = place
    xb = x_ref[...]
    if apply_affine:                       # fused BN1-apply (stage 2)
        xb = xb * scale_ref[...] + shift_ref[...]
    xb = jnp.maximum(xb, 0.0)

    # zero scratch (keeps the conv border exactly 0, also masks the fused
    # affine shift out of the padding region), then place the image interior.
    xpad_ref[...] = jnp.zeros_like(xpad_ref)
    xpad_ref[:, sh:sh + hin, sw:sw + win, :] = xb

    cin = xpad_ref.shape[-1]
    cout = y_ref.shape[-1]
    m = ho * wo
    acc = jnp.zeros((m, cout), jnp.float32)
    for t, (q, oh, ow) in enumerate(taps):            # static unroll, k^2 dots
        v = xpad_ref[q, oh:oh + ho, ow:ow + wo, :]
        acc = acc + jnp.dot(v.reshape(m, cin), w_ref[t],
                            preferred_element_type=jnp.float32)
    y_ref[...] = acc

    stat_ref[...] = jnp.zeros_like(stat_ref)
    stat_ref[0:1, :] = jnp.sum(acc, axis=0, keepdims=True)
    stat_ref[1:2, :] = jnp.sum(acc * acc, axis=0, keepdims=True)


def _fr_stats_kernel(xe_ref, xo_ref, w1_ref, w2_ref, y_ref, stat_ref):
    """FactorizedReduce: two K=Cin matmuls on the even/even and odd/odd parity
    images, accumulated into one lane-dense tile, plus BN partial sums."""
    m, _ = y_ref.shape
    cin = xe_ref.shape[-1]
    ve = jnp.maximum(xe_ref[...], 0.0).reshape(m, cin)
    vo = jnp.maximum(xo_ref[...], 0.0).reshape(m, cin)
    y = (jnp.dot(ve, w1_ref[...], preferred_element_type=jnp.float32) +
         jnp.dot(vo, w2_ref[...], preferred_element_type=jnp.float32))
    y_ref[...] = y
    stat_ref[...] = jnp.zeros_like(stat_ref)
    stat_ref[0:1, :] = jnp.sum(y, axis=0, keepdims=True)
    stat_ref[1:2, :] = jnp.sum(y * y, axis=0, keepdims=True)


def _bn_add_bn_kernel(a_ref, b_ref, sa_ref, ta_ref, sb_ref, tb_ref, o_ref):
    """Fused epilogue: BN2(a) + BN_res(b)."""
    o_ref[...] = (a_ref[...] * sa_ref[...] + ta_ref[...] +
                  b_ref[...] * sb_ref[...] + tb_ref[...])


def _bn_add_kernel(a_ref, b_ref, sa_ref, ta_ref, o_ref):
    """Fused epilogue: BN2(a) + identity residual (no wasted scale/shift)."""
    o_ref[...] = a_ref[...] * sa_ref[...] + ta_ref[...] + b_ref[...]


# ----------------------------------------------------------------------------
# pallas_call wrappers
# ----------------------------------------------------------------------------
def _run_conv_stats(x_par, w, scale, shift, *, n_par, hin, win, ho, wo,
                    taps, place, buf, apply_affine, n_img):
    cin_p = x_par.shape[-1]
    cout_p = w.shape[-1]
    k2 = w.shape[0]
    m_blk = ho * wo
    kern = functools.partial(
        _conv_stats_kernel, taps=taps, place=place, hin=hin, win=win,
        ho=ho, wo=wo, apply_affine=apply_affine)
    flops = 2 * n_img * m_blk * k2 * cin_p * cout_p
    bytes_acc = 4 * (x_par.size + w.size + n_img * m_blk * cout_p)
    return pl.pallas_call(
        kern,
        grid=(n_img,),
        in_specs=[
            pl.BlockSpec((n_par, hin, win, cin_p), lambda n: (n, 0, 0, 0)),
            pl.BlockSpec((k2, cin_p, cout_p), lambda n: (0, 0, 0)),
            pl.BlockSpec((1, cin_p), lambda n: (0, 0)),
            pl.BlockSpec((1, cin_p), lambda n: (0, 0)),
        ],
        out_specs=[
            pl.BlockSpec((m_blk, cout_p), lambda n: (n, 0)),
            pl.BlockSpec((8, cout_p), lambda n: (n, 0)),
        ],
        out_shape=[
            jax.ShapeDtypeStruct((n_img * m_blk, cout_p), jnp.float32),
            jax.ShapeDtypeStruct((n_img * 8, cout_p), jnp.float32),
        ],
        scratch_shapes=[pltpu.VMEM((n_par, buf[0], buf[1], cin_p), jnp.float32)],
        compiler_params=pltpu.CompilerParams(
            dimension_semantics=("parallel",),
            vmem_limit_bytes=_vmem_limit()),
        cost_estimate=pl.CostEstimate(
            flops=flops, transcendentals=0, bytes_accessed=bytes_acc),
    )(x_par, w, scale, shift)


def _run_fr_stats(x_par, w1, w2, *, hr, wr, n_img):
    cin_p = x_par.shape[-1]
    cout_p = w1.shape[-1]
    m_blk = hr * wr
    return pl.pallas_call(
        _fr_stats_kernel,
        grid=(n_img,),
        in_specs=[
            pl.BlockSpec((1, hr, wr, cin_p), lambda n: (4 * n, 0, 0, 0)),
            pl.BlockSpec((1, hr, wr, cin_p), lambda n: (4 * n + 3, 0, 0, 0)),
            pl.BlockSpec((cin_p, cout_p), lambda n: (0, 0)),
            pl.BlockSpec((cin_p, cout_p), lambda n: (0, 0)),
        ],
        out_specs=[
            pl.BlockSpec((m_blk, cout_p), lambda n: (n, 0)),
            pl.BlockSpec((8, cout_p), lambda n: (n, 0)),
        ],
        out_shape=[
            jax.ShapeDtypeStruct((n_img * m_blk, cout_p), jnp.float32),
            jax.ShapeDtypeStruct((n_img * 8, cout_p), jnp.float32),
        ],
        compiler_params=pltpu.CompilerParams(
            dimension_semantics=("parallel",),
            vmem_limit_bytes=_vmem_limit()),
    )(x_par, x_par, w1, w2)


def _run_epilogue(kernel, args, *, m_blk, n_img, cout_p):
    row_spec = pl.BlockSpec((m_blk, cout_p), lambda n: (n, 0))
    vec_spec = pl.BlockSpec((1, cout_p), lambda n: (0, 0))
    in_specs = [row_spec if a.shape[0] != 1 else vec_spec for a in args]
    return pl.pallas_call(
        kernel,
        grid=(n_img,),
        in_specs=in_specs,
        out_specs=row_spec,
        out_shape=jax.ShapeDtypeStruct((n_img * m_blk, cout_p), jnp.float32),
        compiler_params=pltpu.CompilerParams(
            dimension_semantics=("parallel",),
            vmem_limit_bytes=_vmem_limit()),
    )(*args)


# ----------------------------------------------------------------------------
# ResSepConv forward
# ----------------------------------------------------------------------------
def _res_sep_conv_impl(x, params, *, kernel_size, stride, padding):
    """x: (N, C_in, H, W) NCHW float32.  params: PyTorch-layout weights."""
    N, C_in, H, W = x.shape
    k = kernel_size
    p = padding
    assert stride in (1, 2), "only stride 1 or 2 supported"
    C_out = params['pw2'].shape[0]
    cin_p = _round_up(C_in, _LANES)
    cout_p = _round_up(C_out, _LANES)

    x_nhwc = _pad_axis(jnp.transpose(x, (0, 2, 3, 1)).astype(jnp.float32),
                       3, cin_p)                          # (N, H, W, cin_p)

    # ----- stage 1: relu -> DW1(stride) -> PW1 (folded) + BN1 partial stats --
    ho1 = (H + 2 * p - k) // stride + 1
    wo1 = (W + 2 * p - k) // stride + 1
    m1 = N * ho1 * wo1

    if stride == 1:
        x_par = x_nhwc                                    # one "parity" image
        hin1, win1 = H, W
    else:
        assert H % 2 == 0 and W % 2 == 0, "even spatial dims required (stride 2)"
        subs = [x_nhwc[:, ph::2, pw::2, :] for ph in range(2) for pw in range(2)]
        x_par = jnp.stack(subs, axis=1).reshape(N * 4, H // 2, W // 2, cin_p)
        hin1, win1 = H // 2, W // 2

    n_par1, place1, buf1, taps1 = _tap_plan(k, stride, p, ho1, wo1, hin1, win1)
    w1 = _fold_dw_pw(params['dw1'], params['pw1'], k, C_in, cin_p, C_in, cin_p)
    ones_c = jnp.ones((1, cin_p), jnp.float32)
    zeros_c = jnp.zeros((1, cin_p), jnp.float32)
    y1, st1 = _run_conv_stats(x_par, w1, ones_c, zeros_c,
                              n_par=n_par1, hin=hin1, win=win1, ho=ho1, wo=wo1,
                              taps=taps1, place=place1, buf=buf1,
                              apply_affine=False, n_img=N)

    g1 = _pad_axis(params['bn1_g'].reshape(1, C_in).astype(jnp.float32), 1, cin_p)
    b1 = _pad_axis(params['bn1_b'].reshape(1, C_in).astype(jnp.float32), 1, cin_p)
    st1 = st1.reshape(N, 8, cin_p)
    scale1, shift1 = _bn_scale_shift(st1[:, 0, :].sum(0, keepdims=True),
                                     st1[:, 1, :].sum(0, keepdims=True),
                                     m1, g1, b1)

    # ----- stage 2: [fused BN1-apply] -> relu -> DW2 -> PW2 + BN2 stats ------
    ho2 = ho1 + 2 * p - k + 1
    wo2 = wo1 + 2 * p - k + 1
    m2 = N * ho2 * wo2
    y1_img = y1.reshape(N, ho1, wo1, cin_p)
    n_par2, place2, buf2, taps2 = _tap_plan(k, 1, p, ho2, wo2, ho1, wo1)
    w2 = _fold_dw_pw(params['dw2'], params['pw2'], k, C_in, cin_p, C_out, cout_p)
    y2, st2 = _run_conv_stats(y1_img, w2, scale1, shift1,
                              n_par=n_par2, hin=ho1, win=wo1, ho=ho2, wo=wo2,
                              taps=taps2, place=place2, buf=buf2,
                              apply_affine=True, n_img=N)

    g2 = _pad_axis(params['bn2_g'].reshape(1, C_out).astype(jnp.float32), 1, cout_p)
    b2 = _pad_axis(params['bn2_b'].reshape(1, C_out).astype(jnp.float32), 1, cout_p)
    st2 = st2.reshape(N, 8, cout_p)
    scale2, shift2 = _bn_scale_shift(st2[:, 0, :].sum(0, keepdims=True),
                                     st2[:, 1, :].sum(0, keepdims=True),
                                     m2, g2, b2)

    # ----- residual branch + fused epilogue ----------------------------------
    if stride == 1:
        assert (ho2, wo2) == (H, W) and C_out == C_in, "identity residual shape"
        res = x_nhwc.reshape(N * H * W, cin_p)            # x fed directly
        out = _run_epilogue(_bn_add_kernel, (y2, res, scale2, shift2),
                            m_blk=ho2 * wo2, n_img=N, cout_p=cout_p)
    else:
        hr, wr = H // 2, W // 2
        assert (ho2, wo2) == (hr, wr), "SepConv / FactorizedReduce mismatch"
        c_half = C_out // 2
        fw1 = jnp.transpose(params['fr_w1'].reshape(c_half, C_in), (1, 0))
        fw2 = jnp.transpose(params['fr_w2'].reshape(c_half, C_in), (1, 0))
        w_fr1 = jnp.zeros((cin_p, cout_p), jnp.float32).at[:C_in, :c_half].set(fw1)
        w_fr2 = jnp.zeros((cin_p, cout_p), jnp.float32).at[:C_in, c_half:C_out].set(fw2)
        yr, str_ = _run_fr_stats(x_par, w_fr1, w_fr2, hr=hr, wr=wr, n_img=N)

        gr = _pad_axis(params['fr_g'].reshape(1, C_out).astype(jnp.float32), 1, cout_p)
        br = _pad_axis(params['fr_b'].reshape(1, C_out).astype(jnp.float32), 1, cout_p)
        str_ = str_.reshape(N, 8, cout_p)
        scale_r, shift_r = _bn_scale_shift(str_[:, 0, :].sum(0, keepdims=True),
                                           str_[:, 1, :].sum(0, keepdims=True),
                                           m2, gr, br)
        out = _run_epilogue(_bn_add_bn_kernel,
                            (y2, yr, scale2, shift2, scale_r, shift_r),
                            m_blk=ho2 * wo2, n_img=N, cout_p=cout_p)

    out = out[:, :C_out].reshape(N, ho2, wo2, C_out)
    return jnp.transpose(out, (0, 3, 1, 2))               # back to NCHW


res_sep_conv = jax.jit(_res_sep_conv_impl,
                       static_argnames=("kernel_size", "stride", "padding"))


# ----------------------------------------------------------------------------
# pure-JAX reference (mirrors the PyTorch module)
# ----------------------------------------------------------------------------
def _conv_ref(x, w, stride, padding, groups=1):
    return jax.lax.conv_general_dilated(
        x, w, window_strides=(stride, stride),
        padding=[(padding, padding), (padding, padding)],
        dimension_numbers=("NCHW", "OIHW", "NCHW"),
        feature_group_count=groups,
        precision=jax.lax.Precision.HIGHEST)


def _bn_ref(y, gamma, beta, eps=_EPS):
    mean = jnp.mean(y, axis=(0, 2, 3), keepdims=True)
    var = jnp.mean(jnp.square(y - mean), axis=(0, 2, 3), keepdims=True)
    return ((y - mean) / jnp.sqrt(var + eps) * gamma.reshape(1, -1, 1, 1)
            + beta.reshape(1, -1, 1, 1))


def _res_sep_conv_ref(x, params, k, stride, padding):
    c_in = x.shape[1]
    xr = jnp.maximum(x, 0.0)
    d1 = _conv_ref(xr, params['dw1'], stride, padding, groups=c_in)
    p1 = _conv_ref(d1, params['pw1'], 1, 0)
    b1 = _bn_ref(p1, params['bn1_g'], params['bn1_b'])
    r2 = jnp.maximum(b1, 0.0)
    d2 = _conv_ref(r2, params['dw2'], 1, padding, groups=c_in)
    p2 = _conv_ref(d2, params['pw2'], 1, 0)
    b2 = _bn_ref(p2, params['bn2_g'], params['bn2_b'])
    if stride == 1:
        res = x
    else:
        y1 = _conv_ref(xr, params['fr_w1'], 2, 0)
        y2 = _conv_ref(xr[:, :, 1:, 1:], params['fr_w2'], 2, 0)
        res = _bn_ref(jnp.concatenate([y1, y2], axis=1),
                      params['fr_g'], params['fr_b'])
    return b2 + res


# ----------------------------------------------------------------------------
if __name__ == "__main__":
    key = jax.random.PRNGKey(0)
    ks = jax.random.split(key, 16)

    N, C_in, H, W = 2, 4, 16, 16
    C_out, k, stride, padding = 8, 3, 2, 1

    x = jax.random.normal(ks[0], (N, C_in, H, W), jnp.float32)
    params = {
        'dw1': jax.random.normal(ks[1], (C_in, 1, k, k), jnp.float32) * 0.4,
        'pw1': jax.random.normal(ks[2], (C_in, C_in, 1, 1), jnp.float32) * 0.4,
        'bn1_g': jax.random.normal(ks[3], (C_in,), jnp.float32),
        'bn1_b': jax.random.normal(ks[4], (C_in,), jnp.float32),
        'dw2': jax.random.normal(ks[5], (C_in, 1, k, k), jnp.float32) * 0.4,
        'pw2': jax.random.normal(ks[6], (C_out, C_in, 1, 1), jnp.float32) * 0.4,
        'bn2_g': jax.random.normal(ks[7], (C_out,), jnp.float32),
        'bn2_b': jax.random.normal(ks[8], (C_out,), jnp.float32),
        'fr_w1': jax.random.normal(ks[9], (C_out // 2, C_in, 1, 1), jnp.float32) * 0.4,
        'fr_w2': jax.random.normal(ks[10], (C_out // 2, C_in, 1, 1), jnp.float32) * 0.4,
        'fr_g': jax.random.normal(ks[11], (C_out,), jnp.float32),
        'fr_b': jax.random.normal(ks[12], (C_out,), jnp.float32),
    }

    # stride=2 path: SepConv + FactorizedReduce residual
    out = jax.block_until_ready(
        res_sep_conv(x, params, kernel_size=k, stride=stride, padding=padding))
    expected = _res_sep_conv_ref(x, params, k, stride, padding)
    assert out.shape == expected.shape, (out.shape, expected.shape)
    err = float(jnp.max(jnp.abs(out - expected)))
    assert jnp.allclose(out, expected, atol=1e-2, rtol=1e-2), err

    # stride=1 path: SepConv + Identity residual (requires C_out == C_in)
    params1 = {
        'dw1': params['dw1'], 'pw1': params['pw1'],
        'bn1_g': params['bn1_g'], 'bn1_b': params['bn1_b'],
        'dw2': params['dw2'],
        'pw2': jax.random.normal(ks[13], (C_in, C_in, 1, 1), jnp.float32) * 0.4,
        'bn2_g': jax.random.normal(ks[14], (C_in,), jnp.float32),
        'bn2_b': jax.random.normal(ks[15], (C_in,), jnp.float32),
    }
    out1 = jax.block_until_ready(
        res_sep_conv(x, params1, kernel_size=k, stride=1, padding=padding))
    expected1 = _res_sep_conv_ref(x, params1, k, 1, padding)
    assert out1.shape == expected1.shape, (out1.shape, expected1.shape)
    err1 = float(jnp.max(jnp.abs(out1 - expected1)))
    assert jnp.allclose(out1, expected1, atol=1e-2, rtol=1e-2), err1

    print("KERNEL_OK")
</pallas_src>

<mosaic_0001>
module attributes {stable_mosaic.version = 11 : i64} {
  func.func @_conv_stats_kernel(%arg0: i32, %arg1: memref<4x8x8x128xf32, #tpu.memory_space<vmem>>, %arg2: memref<9x128x128xf32, #tpu.memory_space<vmem>>, %arg3: memref<1x128xf32, #tpu.memory_space<vmem>>, %arg4: memref<1x128xf32, #tpu.memory_space<vmem>>, %arg5: memref<64x128xf32, #tpu.memory_space<vmem>>, %arg6: memref<8x128xf32, #tpu.memory_space<vmem>>, %arg7: memref<4x9x9x128xf32, #tpu.memory_space<vmem>>) attributes {dimension_semantics = [#tpu.dimension_semantics<parallel>], iteration_bounds = array<i64: 2>, scalar_prefetch = 0 : i64, scratch_operands = 1 : i64, tpu.core_type = #tpu.core_type<tc>, window_params = [{transform_indices = @transform_0, window_bounds = array<i64: 4, 8, 8, 128>}, {pipeline_mode = #tpu.pipeline_mode<synchronous>, transform_indices = @transform_1, window_bounds = array<i64: 9, 128, 128>}, {pipeline_mode = #tpu.pipeline_mode<synchronous>, transform_indices = @transform_2, window_bounds = array<i64: 1, 128>}, {pipeline_mode = #tpu.pipeline_mode<synchronous>, transform_indices = @transform_3, window_bounds = array<i64: 1, 128>}, {transform_indices = @transform_4, window_bounds = array<i64: 64, 128>}, {transform_indices = @transform_5, window_bounds = array<i64: 8, 128>}]} {
    %c0 = arith.constant 0 : index
    %c0_0 = arith.constant 0 : index
    %c0_1 = arith.constant 0 : index
    %c0_2 = arith.constant 0 : index
    %0 = vector.load %arg1[%c0, %c0_0, %c0_1, %c0_2] : memref<4x8x8x128xf32, #tpu.memory_space<vmem>>, vector<4x8x8x128xf32>
    %cst = arith.constant 0.000000e+00 : f32
    %1 = vector.broadcast %cst : f32 to vector<4x8x8x128xf32>
    %2 = arith.maximumf %0, %1 : vector<4x8x8x128xf32>
    %cst_3 = arith.constant 0.000000e+00 : f32
    %3 = vector.broadcast %cst_3 : f32 to vector<4x9x9x128xf32>
    %c0_4 = arith.constant 0 : index
    %c0_5 = arith.constant 0 : index
    %c0_6 = arith.constant 0 : index
    %c0_7 = arith.constant 0 : index
    %4 = vector.load %arg7[%c0_4, %c0_5, %c0_6, %c0_7] : memref<4x9x9x128xf32, #tpu.memory_space<vmem>>, vector<4x9x9x128xf32>
    tpu.vector_store %arg7[%c0_4, %c0_5, %c0_6, %c0_7], %3 {strides = array<i32>} : memref<4x9x9x128xf32, #tpu.memory_space<vmem>>, vector<4x9x9x128xf32>,
    %c0_8 = arith.constant 0 : index
    %c1 = arith.constant 1 : index
    %c1_9 = arith.constant 1 : index
    %c0_10 = arith.constant 0 : index
    %5 = vector.load %arg7[%c0_8, %c1, %c1_9, %c0_10] : memref<4x9x9x128xf32, #tpu.memory_space<vmem>>, vector<4x8x8x128xf32>
    tpu.vector_store %arg7[%c0_8, %c1, %c1_9, %c0_10], %2 {strides = array<i32>} : memref<4x9x9x128xf32, #tpu.memory_space<vmem>>, vector<4x8x8x128xf32>,
    %cst_11 = arith.constant 0.000000e+00 : f32
    %6 = vector.broadcast %cst_11 : f32 to vector<64x128xf32>
    %c3 = arith.constant 3 : index
    %c0_12 = arith.constant 0 : index
    %c0_13 = arith.constant 0 : index
    %c0_14 = arith.constant 0 : index
    %7 = vector.load %arg7[%c3, %c0_12, %c0_13, %c0_14] : memref<4x9x9x128xf32, #tpu.memory_space<vmem>>, vector<1x8x8x128xf32>
    %8 = vector.shape_cast %7 : vector<1x8x8x128xf32> to vector<8x8x128xf32>
    %9 = vector.shape_cast %8 : vector<8x8x128xf32> to vector<64x128xf32>
    %c0_15 = arith.constant 0 : index
    %c0_16 = arith.constant 0 : index
    %c0_17 = arith.constant 0 : index
    %10 = vector.load %arg2[%c0_15, %c0_16, %c0_17] : memref<9x128x128xf32, #tpu.memory_space<vmem>>, vector<1x128x128xf32>
    %11 = vector.shape_cast %10 : vector<1x128x128xf32> to vector<128x128xf32>
    %cst_18 = arith.constant dense<0.000000e+00> : vector<64x128xf32>
    %12 = tpu.matmul %9, %11, %cst_18 {dimension_numbers = #tpu.dot_dimension_numbers<[1], [0], [0], [1], [0, 0, 1, 1], [], []>} : vector<64x128xf32>, vector<128x128xf32>, vector<64x128xf32> -> vector<64x128xf32>
    %13 = arith.addf %6, %12 : vector<64x128xf32>
    %c2 = arith.constant 2 : index
    %c0_19 = arith.constant 0 : index
    %c1_20 = arith.constant 1 : index
    %c0_21 = arith.constant 0 : index
    %14 = vector.load %arg7[%c2, %c0_19, %c1_20, %c0_21] : memref<4x9x9x128xf32, #tpu.memory_space<vmem>>, vector<1x8x8x128xf32>
    %15 = vector.shape_cast %14 : vector<1x8x8x128xf32> to vector<8x8x128xf32>
    %16 = vector.shape_cast %15 : vector<8x8x128xf32> to vector<64x128xf32>
    %c1_22 = arith.constant 1 : index
    %c0_23 = arith.constant 0 : index
    %c0_24 = arith.constant 0 : index
    %17 = vector.load %arg2[%c1_22, %c0_23, %c0_24] : memref<9x128x128xf32, #tpu.memory_space<vmem>>, vector<1x128x128xf32>
    %18 = vector.shape_cast %17 : vector<1x128x128xf32> to vector<128x128xf32>
    %cst_25 = arith.constant dense<0.000000e+00> : vector<64x128xf32>
    %19 = tpu.matmul %16, %18, %cst_25 {dimension_numbers = #tpu.dot_dimension_numbers<[1], [0], [0], [1], [0, 0, 1, 1], [], []>} : vector<64x128xf32>, vector<128x128xf32>, vector<64x128xf32> -> vector<64x128xf32>
    %20 = arith.addf %13, %19 : vector<64x128xf32>
    %c3_26 = arith.constant 3 : index
    %c0_27 = arith.constant 0 : index
    %c1_28 = arith.constant 1 : index
    %c0_29 = arith.constant 0 : index
    %21 = vector.load %arg7[%c3_26, %c0_27, %c1_28, %c0_29] : memref<4x9x9x128xf32, #tpu.memory_space<vmem>>, vector<1x8x8x128xf32>
    %22 = vector.shape_cast %21 : vector<1x8x8x128xf32> to vector<8x8x128xf32>
    %23 = vector.shape_cast %22 : vector<8x8x128xf32> to vector<64x128xf32>
    %c2_30 = arith.constant 2 : index
    %c0_31 = arith.constant 0 : index
    %c0_32 = arith.constant 0 : index
    %24 = vector.load %arg2[%c2_30, %c0_31, %c0_32] : memref<9x128x128xf32, #tpu.memory_space<vmem>>, vector<1x128x128xf32>
    %25 = vector.shape_cast %24 : vector<1x128x128xf32> to vector<128x128xf32>
    %cst_33 = arith.constant dense<0.000000e+00> : vector<64x128xf32>
    %26 = tpu.matmul %23, %25, %cst_33 {dimension_numbers = #tpu.dot_dimension_numbers<[1], [0], [0], [1], [0, 0, 1, 1], [], []>} : vector<64x128xf32>, vector<128x128xf32>, vector<64x128xf32> -> vector<64x128xf32>
    %27 = arith.addf %20, %26 : vector<64x128xf32>
    %c1_34 = arith.constant 1 : index
    %c1_35 = arith.constant 1 : index
    %c0_36 = arith.constant 0 : index
    %c0_37 = arith.constant 0 : index
    %28 = vector.load %arg7[%c1_34, %c1_35, %c0_36, %c0_37] : memref<4x9x9x128xf32, #tpu.memory_space<vmem>>, vector<1x8x8x128xf32>
    %29 = vector.shape_cast %28 : vector<1x8x8x128xf32> to vector<8x8x128xf32>
    %30 = vector.shape_cast %29 : vector<8x8x128xf32> to vector<64x128xf32>
    %c3_38 = arith.constant 3 : index
    %c0_39 = arith.constant 0 : index
    %c0_40 = arith.constant 0 : index
    %31 = vector.load %arg2[%c3_38, %c0_39, %c0_40] : memref<9x128x128xf32, #tpu.memory_space<vmem>>, vector<1x128x128xf32>
    %32 = vector.shape_cast %31 : vector<1x128x128xf32> to vector<128x128xf32>
    %cst_41 = arith.constant dense<0.000000e+00> : vector<64x128xf32>
    %33 = tpu.matmul %30, %32, %cst_41 {dimension_numbers = #tpu.dot_dimension_numbers<[1], [0], [0], [1], [0, 0, 1, 1], [], []>} : vector<64x128xf32>, vector<128x128xf32>, vector<64x128xf32> -> vector<64x128xf32>
    %34 = arith.addf %27, %33 : vector<64x128xf32>
    %c0_42 = arith.constant 0 : index
    %c1_43 = arith.constant 1 : index
    %c1_44 = arith.constant 1 : index
    %c0_45 = arith.constant 0 : index
    %35 = vector.load %arg7[%c0_42, %c1_43, %c1_44, %c0_45] : memref<4x9x9x128xf32, #tpu.memory_space<vmem>>, vector<1x8x8x128xf32>
    %36 = vector.shape_cast %35 : vector<1x8x8x128xf32> to vector<8x8x128xf32>
    %37 = vector.shape_cast %36 : vector<8x8x128xf32> to vector<64x128xf32>
    %c4 = arith.constant 4 : index
    %c0_46 = arith.constant 0 : index
    %c0_47 = arith.constant 0 : index
    %38 = vector.load %arg2[%c4, %c0_46, %c0_47] : memref<9x128x128xf32, #tpu.memory_space<vmem>>, vector<1x128x128xf32>
    %39 = vector.shape_cast %38 : vector<1x128x128xf32> to vector<128x128xf32>
    %cst_48 = arith.constant dense<0.000000e+00> : vector<64x128xf32>
    %40 = tpu.matmul %37, %39, %cst_48 {dimension_numbers = #tpu.dot_dimension_numbers<[1], [0], [0], [1], [0, 0, 1, 1], [], []>} : vector<64x128xf32>, vector<128x128xf32>, vector<64x128xf32> -> vector<64x128xf32>
    %41 = arith.addf %34, %40 : vector<64x128xf32>
    %c1_49 = arith.constant 1 : index
    %c1_50 = arith.constant 1 : index
    %c1_51 = arith.constant 1 : index
    %c0_52 = arith.constant 0 : index
    %42 = vector.load %arg7[%c1_49, %c1_50, %c1_51, %c0_52] : memref<4x9x9x128xf32, #tpu.memory_space<vmem>>, vector<1x8x8x128xf32>
    %43 = vector.shape_cast %42 : vector<1x8x8x128xf32> to vector<8x8x128xf32>
    %44 = vector.shape_cast %43 : vector<8x8x128xf32> to vector<64x128xf32>
    %c5 = arith.constant 5 : index
    %c0_53 = arith.constant 0 : index
    %c0_54 = arith.constant 0 : index
    %45 = vector.load %arg2[%c5, %c0_53, %c0_54] : memref<9x128x128xf32, #tpu.memory_space<vmem>>, vector<1x128x128xf32>
    %46 = vector.shape_cast %45 : vector<1x128x128xf32> to vector<128x128xf32>
    %cst_55 = arith.constant dense<0.000000e+00> : vector<64x128xf32>
    %47 = tpu.matmul %44, %46, %cst_55 {dimension_numbers = #tpu.dot_dimension_numbers<[1], [0], [0], [1], [0, 0, 1, 1], [], []>} : vector<64x128xf32>, vector<128x128xf32>, vector<64x128xf32> -> vector<64x128xf32>
    %48 = arith.addf %41, %47 : vector<64x128xf32>
    %c3_56 = arith.constant 3 : index
    %c1_57 = arith.constant 1 : index
    %c0_58 = arith.constant 0 : index
    %c0_59 = arith.constant 0 : index
    %49 = vector.load %arg7[%c3_56, %c1_57, %c0_58, %c0_59] : memref<4x9x9x128xf32, #tpu.memory_space<vmem>>, vector<1x8x8x128xf32>
    %50 = vector.shape_cast %49 : vector<1x8x8x128xf32> to vector<8x8x128xf32>
    %51 = vector.shape_cast %50 : vector<8x8x128xf32> to vector<64x128xf32>
    %c6 = arith.constant 6 : index
    %c0_60 = arith.constant 0 : index
    %c0_61 = arith.constant 0 : index
    %52 = vector.load %arg2[%c6, %c0_60, %c0_61] : memref<9x128x128xf32, #tpu.memory_space<vmem>>, vector<1x128x128xf32>
    %53 = vector.shape_cast %52 : vector<1x128x128xf32> to vector<128x128xf32>
    %cst_62 = arith.constant dense<0.000000e+00> : vector<64x128xf32>
    %54 = tpu.matmul %51, %53, %cst_62 {dimension_numbers = #tpu.dot_dimension_numbers<[1], [0], [0], [1], [0, 0, 1, 1], [], []>} : vector<64x128xf32>, vector<128x128xf32>, vector<64x128xf32> -> vector<64x128xf32>
    %55 = arith.addf %48, %54 : vector<64x128xf32>
    %c2_63 = arith.constant 2 : index
    %c1_64 = arith.constant 1 : index
    %c1_65 = arith.constant 1 : index
    %c0_66 = arith.constant 0 : index
    %56 = vector.load %arg7[%c2_63, %c1_64, %c1_65, %c0_66] : memref<4x9x9x128xf32, #tpu.memory_space<vmem>>, vector<1x8x8x128xf32>
    %57 = vector.shape_cast %56 : vector<1x8x8x128xf32> to vector<8x8x128xf32>
    %58 = vector.shape_cast %57 : vector<8x8x128xf32> to vector<64x128xf32>
    %c7 = arith.constant 7 : index
    %c0_67 = arith.constant 0 : index
    %c0_68 = arith.constant 0 : index
    %59 = vector.load %arg2[%c7, %c0_67, %c0_68] : memref<9x128x128xf32, #tpu.memory_space<vmem>>, vector<1x128x128xf32>
    %60 = vector.shape_cast %59 : vector<1x128x128xf32> to vector<128x128xf32>
    %cst_69 = arith.constant dense<0.000000e+00> : vector<64x128xf32>
    %61 = tpu.matmul %58, %60, %cst_69 {dimension_numbers = #tpu.dot_dimension_numbers<[1], [0], [0], [1], [0, 0, 1, 1], [], []>} : vector<64x128xf32>, vector<128x128xf32>, vector<64x128xf32> -> vector<64x128xf32>
    %62 = arith.addf %55, %61 : vector<64x128xf32>
    %c3_70 = arith.constant 3 : index
    %c1_71 = arith.constant 1 : index
    %c1_72 = arith.constant 1 : index
    %c0_73 = arith.constant 0 : index
    %63 = vector.load %arg7[%c3_70, %c1_71, %c1_72, %c0_73] : memref<4x9x9x128xf32, #tpu.memory_space<vmem>>, vector<1x8x8x128xf32>
    %64 = vector.shape_cast %63 : vector<1x8x8x128xf32> to vector<8x8x128xf32>
    %65 = vector.shape_cast %64 : vector<8x8x128xf32> to vector<64x128xf32>
    %c8 = arith.constant 8 : index
    %c0_74 = arith.constant 0 : index
    %c0_75 = arith.constant 0 : index
    %66 = vector.load %arg2[%c8, %c0_74, %c0_75] : memref<9x128x128xf32, #tpu.memory_space<vmem>>, vector<1x128x128xf32>
    %67 = vector.shape_cast %66 : vector<1x128x128xf32> to vector<128x128xf32>
    %cst_76 = arith.constant dense<0.000000e+00> : vector<64x128xf32>
    %68 = tpu.matmul %65, %67, %cst_76 {dimension_numbers = #tpu.dot_dimension_numbers<[1], [0], [0], [1], [0, 0, 1, 1], [], []>} : vector<64x128xf32>, vector<128x128xf32>, vector<64x128xf32> -> vector<64x128xf32>
    %69 = arith.addf %62, %68 : vector<64x128xf32>
    %c0_77 = arith.constant 0 : index
    %c0_78 = arith.constant 0 : index
    %70 = vector.load %arg5[%c0_77, %c0_78] : memref<64x128xf32, #tpu.memory_space<vmem>>, vector<64x128xf32>
    tpu.vector_store %arg5[%c0_77, %c0_78], %69 {strides = array<i32>} : memref<64x128xf32, #tpu.memory_space<vmem>>, vector<64x128xf32>,
    %cst_79 = arith.constant 0.000000e+00 : f32
    %71 = vector.broadcast %cst_79 : f32 to vector<8x128xf32>
    %c0_80 = arith.constant 0 : index
    %c0_81 = arith.constant 0 : index
    %72 = vector.load %arg6[%c0_80, %c0_81] : memref<8x128xf32, #tpu.memory_space<vmem>>, vector<8x128xf32>
    tpu.vector_store %arg6[%c0_80, %c0_81], %71 {strides = array<i32>} : memref<8x128xf32, #tpu.memory_space<vmem>>, vector<8x128xf32>,
    %cst_82 = arith.constant dense<0.000000e+00> : vector<128xf32>
    %73 = vector.multi_reduction <add>, %69, %cst_82 [0] : vector<64x128xf32> to vector<128xf32>
    %74 = vector.shape_cast %73 : vector<128xf32> to vector<1x128xf32>
    %c0_83 = arith.constant 0 : index
    %c0_84 = arith.constant 0 : index
    %75 = vector.load %arg6[%c0_83, %c0_84] : memref<8x128xf32, #tpu.memory_space<vmem>>, vector<1x128xf32>
    tpu.vector_store %arg6[%c0_83, %c0_84], %74 {strides = array<i32>} : memref<8x128xf32, #tpu.memory_space<vmem>>, vector<1x128xf32>,
    %76 = arith.mulf %69, %69 : vector<64x128xf32>
    %cst_85 = arith.constant dense<0.000000e+00> : vector<128xf32>
    %77 = vector.multi_reduction <add>, %76, %cst_85 [0] : vector<64x128xf32> to vector<128xf32>
    %78 = vector.shape_cast %77 : vector<128xf32> to vector<1x128xf32>
    %c1_86 = arith.constant 1 : index
    %c0_87 = arith.constant 0 : index
    %79 = vector.load %arg6[%c1_86, %c0_87] : memref<8x128xf32, #tpu.memory_space<vmem>>, vector<1x128xf32>
    tpu.vector_store %arg6[%c1_86, %c0_87], %78 {strides = array<i32>} : memref<8x128xf32, #tpu.memory_space<vmem>>, vector<1x128xf32>,
    return
  }
  func.func @transform_0(%arg0: i32) -> (i32, i32, i32, i32) {
    %c0_i32 = arith.constant 0 : i32
    %c0_i32_0 = arith.constant 0 : i32
    %c0_i32_1 = arith.constant 0 : i32
    %c0_i32_2 = arith.constant 0 : i32
    return %arg0, %c0_i32, %c0_i32_0, %c0_i32_1 : i32, i32, i32, i32
  }
  func.func @transform_1(%arg0: i32) -> (i32, i32, i32) {
    %c0_i32 = arith.constant 0 : i32
    %c0_i32_0 = arith.constant 0 : i32
    %c0_i32_1 = arith.constant 0 : i32
    %c0_i32_2 = arith.constant 0 : i32
    return %c0_i32, %c0_i32_0, %c0_i32_1 : i32, i32, i32
  }
  func.func @transform_2(%arg0: i32) -> (i32, i32) {
    %c0_i32 = arith.constant 0 : i32
    %c0_i32_0 = arith.constant 0 : i32
    %c0_i32_1 = arith.constant 0 : i32
    return %c0_i32, %c0_i32_0 : i32, i32
  }
  func.func @transform_3(%arg0: i32) -> (i32, i32) {
    %c0_i32 = arith.constant 0 : i32
    %c0_i32_0 = arith.constant 0 : i32
    %c0_i32_1 = arith.constant 0 : i32
    return %c0_i32, %c0_i32_0 : i32, i32
  }
  func.func @transform_4(%arg0: i32) -> (i32, i32) {
    %c0_i32 = arith.constant 0 : i32
    %c0_i32_0 = arith.constant 0 : i32
    return %arg0, %c0_i32 : i32, i32
  }
  func.func @transform_5(%arg0: i32) -> (i32, i32) {
    %c0_i32 = arith.constant 0 : i32
    %c0_i32_0 = arith.constant 0 : i32
    return %arg0, %c0_i32 : i32, i32
  }
}

module attributes {stable_mosaic.version = 11 : i64} {
  func.func @_conv_stats_kernel(%arg0: i32, %arg1: memref<1x8x8x128xf32, #tpu.memory_space<vmem>>, %arg2: memref<9x128x128xf32, #tpu.memory_space<vmem>>, %arg3: memref<1x128xf32, #tpu.memory_space<vmem>>, %arg4: memref<1x128xf32, #tpu.memory_space<vmem>>, %arg5: memref<64x128xf32, #tpu.memory_space<vmem>>, %arg6: memref<8x128xf32, #tpu.memory_space<vmem>>, %arg7: memref<1x10x10x128xf32, #tpu.memory_space<vmem>>) attributes {dimension_semantics = [#tpu.dimension_semantics<parallel>], iteration_bounds = array<i64: 2>, scalar_prefetch = 0 : i64, scratch_operands = 1 : i64, tpu.core_type = #tpu.core_type<tc>, window_params = [{transform_indices = @transform_0, window_bounds = array<i64: 1, 8, 8, 128>}, {pipeline_mode = #tpu.pipeline_mode<synchronous>, transform_indices = @transform_1, window_bounds = array<i64: 9, 128, 128>}, {pipeline_mode = #tpu.pipeline_mode<synchronous>, transform_indices = @transform_2, window_bounds = array<i64: 1, 128>}, {pipeline_mode = #tpu.pipeline_mode<synchronous>, transform_indices = @transform_3, window_bounds = array<i64: 1, 128>}, {transform_indices = @transform_4, window_bounds = array<i64: 64, 128>}, {transform_indices = @transform_5, window_bounds = array<i64: 8, 128>}]} {
    %c0 = arith.constant 0 : index
    %c0_0 = arith.constant 0 : index
    %c0_1 = arith.constant 0 : index
    %c0_2 = arith.constant 0 : index
    %0 = vector.load %arg1[%c0, %c0_0, %c0_1, %c0_2] : memref<1x8x8x128xf32, #tpu.memory_space<vmem>>, vector<1x8x8x128xf32>
    %c0_3 = arith.constant 0 : index
    %c0_4 = arith.constant 0 : index
    %1 = vector.load %arg3[%c0_3, %c0_4] : memref<1x128xf32, #tpu.memory_space<vmem>>, vector<1x128xf32>
    %2 = vector.shape_cast %1 : vector<1x128xf32> to vector<1x1x1x128xf32>
    %3 = vector.broadcast %2 : vector<1x1x1x128xf32> to vector<1x8x8x128xf32>
    %4 = arith.mulf %0, %3 : vector<1x8x8x128xf32>
    %c0_5 = arith.constant 0 : index
    %c0_6 = arith.constant 0 : index
    %5 = vector.load %arg4[%c0_5, %c0_6] : memref<1x128xf32, #tpu.memory_space<vmem>>, vector<1x128xf32>
    %6 = vector.shape_cast %5 : vector<1x128xf32> to vector<1x1x1x128xf32>
    %7 = vector.broadcast %6 : vector<1x1x1x128xf32> to vector<1x8x8x128xf32>
    %8 = arith.addf %4, %7 : vector<1x8x8x128xf32>
    %cst = arith.constant 0.000000e+00 : f32
    %9 = vector.broadcast %cst : f32 to vector<1x8x8x128xf32>
    %10 = arith.maximumf %8, %9 : vector<1x8x8x128xf32>
    %cst_7 = arith.constant 0.000000e+00 : f32
    %11 = vector.broadcast %cst_7 : f32 to vector<1x10x10x128xf32>
    %c0_8 = arith.constant 0 : index
    %c0_9 = arith.constant 0 : index
    %c0_10 = arith.constant 0 : index
    %c0_11 = arith.constant 0 : index
    %12 = vector.load %arg7[%c0_8, %c0_9, %c0_10, %c0_11] : memref<1x10x10x128xf32, #tpu.memory_space<vmem>>, vector<1x10x10x128xf32>
    tpu.vector_store %arg7[%c0_8, %c0_9, %c0_10, %c0_11], %11 {strides = array<i32>} : memref<1x10x10x128xf32, #tpu.memory_space<vmem>>, vector<1x10x10x128xf32>,
    %c0_12 = arith.constant 0 : index
    %c1 = arith.constant 1 : index
    %c1_13 = arith.constant 1 : index
    %c0_14 = arith.constant 0 : index
    %13 = vector.load %arg7[%c0_12, %c1, %c1_13, %c0_14] : memref<1x10x10x128xf32, #tpu.memory_space<vmem>>, vector<1x8x8x128xf32>
    tpu.vector_store %arg7[%c0_12, %c1, %c1_13, %c0_14], %10 {strides = array<i32>} : memref<1x10x10x128xf32, #tpu.memory_space<vmem>>, vector<1x8x8x128xf32>,
    %cst_15 = arith.constant 0.000000e+00 : f32
    %14 = vector.broadcast %cst_15 : f32 to vector<64x128xf32>
    %c0_16 = arith.constant 0 : index
    %c0_17 = arith.constant 0 : index
    %c0_18 = arith.constant 0 : index
    %c0_19 = arith.constant 0 : index
    %15 = vector.load %arg7[%c0_16, %c0_17, %c0_18, %c0_19] : memref<1x10x10x128xf32, #tpu.memory_space<vmem>>, vector<1x8x8x128xf32>
    %16 = vector.shape_cast %15 : vector<1x8x8x128xf32> to vector<8x8x128xf32>
    %17 = vector.shape_cast %16 : vector<8x8x128xf32> to vector<64x128xf32>
    %c0_20 = arith.constant 0 : index
    %c0_21 = arith.constant 0 : index
    %c0_22 = arith.constant 0 : index
    %18 = vector.load %arg2[%c0_20, %c0_21, %c0_22] : memref<9x128x128xf32, #tpu.memory_space<vmem>>, vector<1x128x128xf32>
    %19 = vector.shape_cast %18 : vector<1x128x128xf32> to vector<128x128xf32>
    %cst_23 = arith.constant dense<0.000000e+00> : vector<64x128xf32>
    %20 = tpu.matmul %17, %19, %cst_23 {dimension_numbers = #tpu.dot_dimension_numbers<[1], [0], [0], [1], [0, 0, 1, 1], [], []>} : vector<64x128xf32>, vector<128x128xf32>, vector<64x128xf32> -> vector<64x128xf32>
    %21 = arith.addf %14, %20 : vector<64x128xf32>
    %c0_24 = arith.constant 0 : index
    %c0_25 = arith.constant 0 : index
    %c1_26 = arith.constant 1 : index
    %c0_27 = arith.constant 0 : index
    %22 = vector.load %arg7[%c0_24, %c0_25, %c1_26, %c0_27] : memref<1x10x10x128xf32, #tpu.memory_space<vmem>>, vector<1x8x8x128xf32>
    %23 = vector.shape_cast %22 : vector<1x8x8x128xf32> to vector<8x8x128xf32>
    %24 = vector.shape_cast %23 : vector<8x8x128xf32> to vector<64x128xf32>
    %c1_28 = arith.constant 1 : index
    %c0_29 = arith.constant 0 : index
    %c0_30 = arith.constant 0 : index
    %25 = vector.load %arg2[%c1_28, %c0_29, %c0_30] : memref<9x128x128xf32, #tpu.memory_space<vmem>>, vector<1x128x128xf32>
    %26 = vector.shape_cast %25 : vector<1x128x128xf32> to vector<128x128xf32>
    %cst_31 = arith.constant dense<0.000000e+00> : vector<64x128xf32>
    %27 = tpu.matmul %24, %26, %cst_31 {dimension_numbers = #tpu.dot_dimension_numbers<[1], [0], [0], [1], [0, 0, 1, 1], [], []>} : vector<64x128xf32>, vector<128x128xf32>, vector<64x128xf32> -> vector<64x128xf32>
    %28 = arith.addf %21, %27 : vector<64x128xf32>
    %c0_32 = arith.constant 0 : index
    %c0_33 = arith.constant 0 : index
    %c2 = arith.constant 2 : index
    %c0_34 = arith.constant 0 : index
    %29 = vector.load %arg7[%c0_32, %c0_33, %c2, %c0_34] : memref<1x10x10x128xf32, #tpu.memory_space<vmem>>, vector<1x8x8x128xf32>
    %30 = vector.shape_cast %29 : vector<1x8x8x128xf32> to vector<8x8x128xf32>
    %31 = vector.shape_cast %30 : vector<8x8x128xf32> to vector<64x128xf32>
    %c2_35 = arith.constant 2 : index
    %c0_36 = arith.constant 0 : index
    %c0_37 = arith.constant 0 : index
    %32 = vector.load %arg2[%c2_35, %c0_36, %c0_37] : memref<9x128x128xf32, #tpu.memory_space<vmem>>, vector<1x128x128xf32>
    %33 = vector.shape_cast %32 : vector<1x128x128xf32> to vector<128x128xf32>
    %cst_38 = arith.constant dense<0.000000e+00> : vector<64x128xf32>
    %34 = tpu.matmul %31, %33, %cst_38 {dimension_numbers = #tpu.dot_dimension_numbers<[1], [0], [0], [1], [0, 0, 1, 1], [], []>} : vector<64x128xf32>, vector<128x128xf32>, vector<64x128xf32> -> vector<64x128xf32>
    %35 = arith.addf %28, %34 : vector<64x128xf32>
    %c0_39 = arith.constant 0 : index
    %c1_40 = arith.constant 1 : index
    %c0_41 = arith.constant 0 : index
    %c0_42 = arith.constant 0 : index
    %36 = vector.load %arg7[%c0_39, %c1_40, %c0_41, %c0_42] : memref<1x10x10x128xf32, #tpu.memory_space<vmem>>, vector<1x8x8x128xf32>
    %37 = vector.shape_cast %36 : vector<1x8x8x128xf32> to vector<8x8x128xf32>
    %38 = vector.shape_cast %37 : vector<8x8x128xf32> to vector<64x128xf32>
    %c3 = arith.constant 3 : index
    %c0_43 = arith.constant 0 : index
    %c0_44 = arith.constant 0 : index
    %39 = vector.load %arg2[%c3, %c0_43, %c0_44] : memref<9x128x128xf32, #tpu.memory_space<vmem>>, vector<1x128x128xf32>
    %40 = vector.shape_cast %39 : vector<1x128x128xf32> to vector<128x128xf32>
    %cst_45 = arith.constant dense<0.000000e+00> : vector<64x128xf32>
    %41 = tpu.matmul %38, %40, %cst_45 {dimension_numbers = #tpu.dot_dimension_numbers<[1], [0], [0], [1], [0, 0, 1, 1], [], []>} : vector<64x128xf32>, vector<128x128xf32>, vector<64x128xf32> -> vector<64x128xf32>
    %42 = arith.addf %35, %41 : vector<64x128xf32>
    %c0_46 = arith.constant 0 : index
    %c1_47 = arith.constant 1 : index
    %c1_48 = arith.constant 1 : index
    %c0_49 = arith.constant 0 : index
    %43 = vector.load %arg7[%c0_46, %c1_47, %c1_48, %c0_49] : memref<1x10x10x128xf32, #tpu.memory_space<vmem>>, vector<1x8x8x128xf32>
    %44 = vector.shape_cast %43 : vector<1x8x8x128xf32> to vector<8x8x128xf32>
    %45 = vector.shape_cast %44 : vector<8x8x128xf32> to vector<64x128xf32>
    %c4 = arith.constant 4 : index
    %c0_50 = arith.constant 0 : index
    %c0_51 = arith.constant 0 : index
    %46 = vector.load %arg2[%c4, %c0_50, %c0_51] : memref<9x128x128xf32, #tpu.memory_space<vmem>>, vector<1x128x128xf32>
    %47 = vector.shape_cast %46 : vector<1x128x128xf32> to vector<128x128xf32>
    %cst_52 = arith.constant dense<0.000000e+00> : vector<64x128xf32>
    %48 = tpu.matmul %45, %47, %cst_52 {dimension_numbers = #tpu.dot_dimension_numbers<[1], [0], [0], [1], [0, 0, 1, 1], [], []>} : vector<64x128xf32>, vector<128x128xf32>, vector<64x128xf32> -> vector<64x128xf32>
    %49 = arith.addf %42, %48 : vector<64x128xf32>
    %c0_53 = arith.constant 0 : index
    %c1_54 = arith.constant 1 : index
    %c2_55 = arith.constant 2 : index
    %c0_56 = arith.constant 0 : index
    %50 = vector.load %arg7[%c0_53, %c1_54, %c2_55, %c0_56] : memref<1x10x10x128xf32, #tpu.memory_space<vmem>>, vector<1x8x8x128xf32>
    %51 = vector.shape_cast %50 : vector<1x8x8x128xf32> to vector<8x8x128xf32>
    %52 = vector.shape_cast %51 : vector<8x8x128xf32> to vector<64x128xf32>
    %c5 = arith.constant 5 : index
    %c0_57 = arith.constant 0 : index
    %c0_58 = arith.constant 0 : index
    %53 = vector.load %arg2[%c5, %c0_57, %c0_58] : memref<9x128x128xf32, #tpu.memory_space<vmem>>, vector<1x128x128xf32>
    %54 = vector.shape_cast %53 : vector<1x128x128xf32> to vector<128x128xf32>
    %cst_59 = arith.constant dense<0.000000e+00> : vector<64x128xf32>
    %55 = tpu.matmul %52, %54, %cst_59 {dimension_numbers = #tpu.dot_dimension_numbers<[1], [0], [0], [1], [0, 0, 1, 1], [], []>} : vector<64x128xf32>, vector<128x128xf32>, vector<64x128xf32> -> vector<64x128xf32>
    %56 = arith.addf %49, %55 : vector<64x128xf32>
    %c0_60 = arith.constant 0 : index
    %c2_61 = arith.constant 2 : index
    %c0_62 = arith.constant 0 : index
    %c0_63 = arith.constant 0 : index
    %57 = vector.load %arg7[%c0_60, %c2_61, %c0_62, %c0_63] : memref<1x10x10x128xf32, #tpu.memory_space<vmem>>, vector<1x8x8x128xf32>
    %58 = vector.shape_cast %57 : vector<1x8x8x128xf32> to vector<8x8x128xf32>
    %59 = vector.shape_cast %58 : vector<8x8x128xf32> to vector<64x128xf32>
    %c6 = arith.constant 6 : index
    %c0_64 = arith.constant 0 : index
    %c0_65 = arith.constant 0 : index
    %60 = vector.load %arg2[%c6, %c0_64, %c0_65] : memref<9x128x128xf32, #tpu.memory_space<vmem>>, vector<1x128x128xf32>
    %61 = vector.shape_cast %60 : vector<1x128x128xf32> to vector<128x128xf32>
    %cst_66 = arith.constant dense<0.000000e+00> : vector<64x128xf32>
    %62 = tpu.matmul %59, %61, %cst_66 {dimension_numbers = #tpu.dot_dimension_numbers<[1], [0], [0], [1], [0, 0, 1, 1], [], []>} : vector<64x128xf32>, vector<128x128xf32>, vector<64x128xf32> -> vector<64x128xf32>
    %63 = arith.addf %56, %62 : vector<64x128xf32>
    %c0_67 = arith.constant 0 : index
    %c2_68 = arith.constant 2 : index
    %c1_69 = arith.constant 1 : index
    %c0_70 = arith.constant 0 : index
    %64 = vector.load %arg7[%c0_67, %c2_68, %c1_69, %c0_70] : memref<1x10x10x128xf32, #tpu.memory_space<vmem>>, vector<1x8x8x128xf32>
    %65 = vector.shape_cast %64 : vector<1x8x8x128xf32> to vector<8x8x128xf32>
    %66 = vector.shape_cast %65 : vector<8x8x128xf32> to vector<64x128xf32>
    %c7 = arith.constant 7 : index
    %c0_71 = arith.constant 0 : index
    %c0_72 = arith.constant 0 : index
    %67 = vector.load %arg2[%c7, %c0_71, %c0_72] : memref<9x128x128xf32, #tpu.memory_space<vmem>>, vector<1x128x128xf32>
    %68 = vector.shape_cast %67 : vector<1x128x128xf32> to vector<128x128xf32>
    %cst_73 = arith.constant dense<0.000000e+00> : vector<64x128xf32>
    %69 = tpu.matmul %66, %68, %cst_73 {dimension_numbers = #tpu.dot_dimension_numbers<[1], [0], [0], [1], [0, 0, 1, 1], [], []>} : vector<64x128xf32>, vector<128x128xf32>, vector<64x128xf32> -> vector<64x128xf32>
    %70 = arith.addf %63, %69 : vector<64x128xf32>
    %c0_74 = arith.constant 0 : index
    %c2_75 = arith.constant 2 : index
    %c2_76 = arith.constant 2 : index
    %c0_77 = arith.constant 0 : index
    %71 = vector.load %arg7[%c0_74, %c2_75, %c2_76, %c0_77] : memref<1x10x10x128xf32, #tpu.memory_space<vmem>>, vector<1x8x8x128xf32>
    %72 = vector.shape_cast %71 : vector<1x8x8x128xf32> to vector<8x8x128xf32>
    %73 = vector.shape_cast %72 : vector<8x8x128xf32> to vector<64x128xf32>
    %c8 = arith.constant 8 : index
    %c0_78 = arith.constant 0 : index
    %c0_79 = arith.constant 0 : index
    %74 = vector.load %arg2[%c8, %c0_78, %c0_79] : memref<9x128x128xf32, #tpu.memory_space<vmem>>, vector<1x128x128xf32>
    %75 = vector.shape_cast %74 : vector<1x128x128xf32> to vector<128x128xf32>
    %cst_80 = arith.constant dense<0.000000e+00> : vector<64x128xf32>
    %76 = tpu.matmul %73, %75, %cst_80 {dimension_numbers = #tpu.dot_dimension_numbers<[1], [0], [0], [1], [0, 0, 1, 1], [], []>} : vector<64x128xf32>, vector<128x128xf32>, vector<64x128xf32> -> vector<64x128xf32>
    %77 = arith.addf %70, %76 : vector<64x128xf32>
    %c0_81 = arith.constant 0 : index
    %c0_82 = arith.constant 0 : index
    %78 = vector.load %arg5[%c0_81, %c0_82] : memref<64x128xf32, #tpu.memory_space<vmem>>, vector<64x128xf32>
    tpu.vector_store %arg5[%c0_81, %c0_82], %77 {strides = array<i32>} : memref<64x128xf32, #tpu.memory_space<vmem>>, vector<64x128xf32>,
    %cst_83 = arith.constant 0.000000e+00 : f32
    %79 = vector.broadcast %cst_83 : f32 to vector<8x128xf32>
    %c0_84 = arith.constant 0 : index
    %c0_85 = arith.constant 0 : index
    %80 = vector.load %arg6[%c0_84, %c0_85] : memref<8x128xf32, #tpu.memory_space<vmem>>, vector<8x128xf32>
    tpu.vector_store %arg6[%c0_84, %c0_85], %79 {strides = array<i32>} : memref<8x128xf32, #tpu.memory_space<vmem>>, vector<8x128xf32>,
    %cst_86 = arith.constant dense<0.000000e+00> : vector<128xf32>
    %81 = vector.multi_reduction <add>, %77, %cst_86 [0] : vector<64x128xf32> to vector<128xf32>
    %82 = vector.shape_cast %81 : vector<128xf32> to vector<1x128xf32>
    %c0_87 = arith.constant 0 : index
    %c0_88 = arith.constant 0 : index
    %83 = vector.load %arg6[%c0_87, %c0_88] : memref<8x128xf32, #tpu.memory_space<vmem>>, vector<1x128xf32>
    tpu.vector_store %arg6[%c0_87, %c0_88], %82 {strides = array<i32>} : memref<8x128xf32, #tpu.memory_space<vmem>>, vector<1x128xf32>,
    %84 = arith.mulf %77, %77 : vector<64x128xf32>
    %cst_89 = arith.constant dense<0.000000e+00> : vector<128xf32>
    %85 = vector.multi_reduction <add>, %84, %cst_89 [0] : vector<64x128xf32> to vector<128xf32>
    %86 = vector.shape_cast %85 : vector<128xf32> to vector<1x128xf32>
    %c1_90 = arith.constant 1 : index
    %c0_91 = arith.constant 0 : index
    %87 = vector.load %arg6[%c1_90, %c0_91] : memref<8x128xf32, #tpu.memory_space<vmem>>, vector<1x128xf32>
    tpu.vector_store %arg6[%c1_90, %c0_91], %86 {strides = array<i32>} : memref<8x128xf32, #tpu.memory_space<vmem>>, vector<1x128xf32>,
    return
  }
  func.func @transform_0(%arg0: i32) -> (i32, i32, i32, i32) {
    %c0_i32 = arith.constant 0 : i32
    %c0_i32_0 = arith.constant 0 : i32
    %c0_i32_1 = arith.constant 0 : i32
    %c0_i32_2 = arith.constant 0 : i32
    return %arg0, %c0_i32, %c0_i32_0, %c0_i32_1 : i32, i32, i32, i32
  }
  func.func @transform_1(%arg0: i32) -> (i32, i32, i32) {
    %c0_i32 = arith.constant 0 : i32
    %c0_i32_0 = arith.constant 0 : i32
    %c0_i32_1 = arith.constant 0 : i32
    %c0_i32_2 = arith.constant 0 : i32
    return %c0_i32, %c0_i32_0, %c0_i32_1 : i32, i32, i32
  }
  func.func @transform_2(%arg0: i32) -> (i32, i32) {
    %c0_i32 = arith.constant 0 : i32
    %c0_i32_0 = arith.constant 0 : i32
    %c0_i32_1 = arith.constant 0 : i32
    return %c0_i32, %c0_i32_0 : i32, i32
  }
  func.func @transform_3(%arg0: i32) -> (i32, i32) {
    %c0_i32 = arith.constant 0 : i32
    %c0_i32_0 = arith.constant 0 : i32
    %c0_i32_1 = arith.constant 0 : i32
    return %c0_i32, %c0_i32_0 : i32, i32
  }
  func.func @transform_4(%arg0: i32) -> (i32, i32) {
    %c0_i32 = arith.constant 0 : i32
    %c0_i32_0 = arith.constant 0 : i32
    return %arg0, %c0_i32 : i32, i32
  }
  func.func @transform_5(%arg0: i32) -> (i32, i32) {
    %c0_i32 = arith.constant 0 : i32
    %c0_i32_0 = arith.constant 0 : i32
    return %arg0, %c0_i32 : i32, i32
  }
}

module attributes {stable_mosaic.version = 11 : i64} {
  func.func @_fr_stats_kernel(%arg0: i32, %arg1: memref<1x8x8x128xf32, #tpu.memory_space<vmem>>, %arg2: memref<1x8x8x128xf32, #tpu.memory_space<vmem>>, %arg3: memref<128x128xf32, #tpu.memory_space<vmem>>, %arg4: memref<128x128xf32, #tpu.memory_space<vmem>>, %arg5: memref<64x128xf32, #tpu.memory_space<vmem>>, %arg6: memref<8x128xf32, #tpu.memory_space<vmem>>) attributes {dimension_semantics = [#tpu.dimension_semantics<parallel>], iteration_bounds = array<i64: 2>, scalar_prefetch = 0 : i64, scratch_operands = 0 : i64, tpu.core_type = #tpu.core_type<tc>, window_params = [{transform_indices = @transform_0, window_bounds = array<i64: 1, 8, 8, 128>}, {transform_indices = @transform_1, window_bounds = array<i64: 1, 8, 8, 128>}, {pipeline_mode = #tpu.pipeline_mode<synchronous>, transform_indices = @transform_2, window_bounds = array<i64: 128, 128>}, {pipeline_mode = #tpu.pipeline_mode<synchronous>, transform_indices = @transform_3, window_bounds = array<i64: 128, 128>}, {transform_indices = @transform_4, window_bounds = array<i64: 64, 128>}, {transform_indices = @transform_5, window_bounds = array<i64: 8, 128>}]} {
    %c0 = arith.constant 0 : index
    %c0_0 = arith.constant 0 : index
    %c0_1 = arith.constant 0 : index
    %c0_2 = arith.constant 0 : index
    %0 = vector.load %arg1[%c0, %c0_0, %c0_1, %c0_2] : memref<1x8x8x128xf32, #tpu.memory_space<vmem>>, vector<1x8x8x128xf32>
    %cst = arith.constant 0.000000e+00 : f32
    %1 = vector.broadcast %cst : f32 to vector<1x8x8x128xf32>
    %2 = arith.maximumf %0, %1 : vector<1x8x8x128xf32>
    %3 = vector.shape_cast %2 : vector<1x8x8x128xf32> to vector<64x128xf32>
    %c0_3 = arith.constant 0 : index
    %c0_4 = arith.constant 0 : index
    %c0_5 = arith.constant 0 : index
    %c0_6 = arith.constant 0 : index
    %4 = vector.load %arg2[%c0_3, %c0_4, %c0_5, %c0_6] : memref<1x8x8x128xf32, #tpu.memory_space<vmem>>, vector<1x8x8x128xf32>
    %cst_7 = arith.constant 0.000000e+00 : f32
    %5 = vector.broadcast %cst_7 : f32 to vector<1x8x8x128xf32>
    %6 = arith.maximumf %4, %5 : vector<1x8x8x128xf32>
    %7 = vector.shape_cast %6 : vector<1x8x8x128xf32> to vector<64x128xf32>
    %c0_8 = arith.constant 0 : index
    %c0_9 = arith.constant 0 : index
    %8 = vector.load %arg3[%c0_8, %c0_9] : memref<128x128xf32, #tpu.memory_space<vmem>>, vector<128x128xf32>
    %cst_10 = arith.constant dense<0.000000e+00> : vector<64x128xf32>
    %9 = tpu.matmul %3, %8, %cst_10 {dimension_numbers = #tpu.dot_dimension_numbers<[1], [0], [0], [1], [0, 0, 1, 1], [], []>} : vector<64x128xf32>, vector<128x128xf32>, vector<64x128xf32> -> vector<64x128xf32>
    %c0_11 = arith.constant 0 : index
    %c0_12 = arith.constant 0 : index
    %10 = vector.load %arg4[%c0_11, %c0_12] : memref<128x128xf32, #tpu.memory_space<vmem>>, vector<128x128xf32>
    %cst_13 = arith.constant dense<0.000000e+00> : vector<64x128xf32>
    %11 = tpu.matmul %7, %10, %cst_13 {dimension_numbers = #tpu.dot_dimension_numbers<[1], [0], [0], [1], [0, 0, 1, 1], [], []>} : vector<64x128xf32>, vector<128x128xf32>, vector<64x128xf32> -> vector<64x128xf32>
    %12 = arith.addf %9, %11 : vector<64x128xf32>
    %c0_14 = arith.constant 0 : index
    %c0_15 = arith.constant 0 : index
    %13 = vector.load %arg5[%c0_14, %c0_15] : memref<64x128xf32, #tpu.memory_space<vmem>>, vector<64x128xf32>
    tpu.vector_store %arg5[%c0_14, %c0_15], %12 {strides = array<i32>} : memref<64x128xf32, #tpu.memory_space<vmem>>, vector<64x128xf32>,
    %cst_16 = arith.constant 0.000000e+00 : f32
    %14 = vector.broadcast %cst_16 : f32 to vector<8x128xf32>
    %c0_17 = arith.constant 0 : index
    %c0_18 = arith.constant 0 : index
    %15 = vector.load %arg6[%c0_17, %c0_18] : memref<8x128xf32, #tpu.memory_space<vmem>>, vector<8x128xf32>
    tpu.vector_store %arg6[%c0_17, %c0_18], %14 {strides = array<i32>} : memref<8x128xf32, #tpu.memory_space<vmem>>, vector<8x128xf32>,
    %cst_19 = arith.constant dense<0.000000e+00> : vector<128xf32>
    %16 = vector.multi_reduction <add>, %12, %cst_19 [0] : vector<64x128xf32> to vector<128xf32>
    %17 = vector.shape_cast %16 : vector<128xf32> to vector<1x128xf32>
    %c0_20 = arith.constant 0 : index
    %c0_21 = arith.constant 0 : index
    %18 = vector.load %arg6[%c0_20, %c0_21] : memref<8x128xf32, #tpu.memory_space<vmem>>, vector<1x128xf32>
    tpu.vector_store %arg6[%c0_20, %c0_21], %17 {strides = array<i32>} : memref<8x128xf32, #tpu.memory_space<vmem>>, vector<1x128xf32>,
    %19 = arith.mulf %12, %12 : vector<64x128xf32>
    %cst_22 = arith.constant dense<0.000000e+00> : vector<128xf32>
    %20 = vector.multi_reduction <add>, %19, %cst_22 [0] : vector<64x128xf32> to vector<128xf32>
    %21 = vector.shape_cast %20 : vector<128xf32> to vector<1x128xf32>
    %c1 = arith.constant 1 : index
    %c0_23 = arith.constant 0 : index
    %22 = vector.load %arg6[%c1, %c0_23] : memref<8x128xf32, #tpu.memory_space<vmem>>, vector<1x128xf32>
    tpu.vector_store %arg6[%c1, %c0_23], %21 {strides = array<i32>} : memref<8x128xf32, #tpu.memory_space<vmem>>, vector<1x128xf32>,
    return
  }
  func.func @transform_0(%arg0: i32) -> (i32, i32, i32, i32) {
    %c4_i32 = arith.constant 4 : i32
    %0 = arith.muli %c4_i32, %arg0 : i32
    %c0_i32 = arith.constant 0 : i32
    %c0_i32_0 = arith.constant 0 : i32
    %c0_i32_1 = arith.constant 0 : i32
    %c0_i32_2 = arith.constant 0 : i32
    return %0, %c0_i32, %c0_i32_0, %c0_i32_1 : i32, i32, i32, i32
  }
  func.func @transform_1(%arg0: i32) -> (i32, i32, i32, i32) {
    %c4_i32 = arith.constant 4 : i32
    %0 = arith.muli %c4_i32, %arg0 : i32
    %c3_i32 = arith.constant 3 : i32
    %1 = arith.addi %0, %c3_i32 : i32
    %c0_i32 = arith.constant 0 : i32
    %c0_i32_0 = arith.constant 0 : i32
    %c0_i32_1 = arith.constant 0 : i32
    %c0_i32_2 = arith.constant 0 : i32
    return %1, %c0_i32, %c0_i32_0, %c0_i32_1 : i32, i32, i32, i32
  }
  func.func @transform_2(%arg0: i32) -> (i32, i32) {
    %c0_i32 = arith.constant 0 : i32
    %c0_i32_0 = arith.constant 0 : i32
    %c0_i32_1 = arith.constant 0 : i32
    return %c0_i32, %c0_i32_0 : i32, i32
  }
  func.func @transform_3(%arg0: i32) -> (i32, i32) {
    %c0_i32 = arith.constant 0 : i32
    %c0_i32_0 = arith.constant 0 : i32
    %c0_i32_1 = arith.constant 0 : i32
    return %c0_i32, %c0_i32_0 : i32, i32
  }
  func.func @transform_4(%arg0: i32) -> (i32, i32) {
    %c0_i32 = arith.constant 0 : i32
    %c0_i32_0 = arith.constant 0 : i32
    return %arg0, %c0_i32 : i32, i32
  }
  func.func @transform_5(%arg0: i32) -> (i32, i32) {
    %c0_i32 = arith.constant 0 : i32
    %c0_i32_0 = arith.constant 0 : i32
    return %arg0, %c0_i32 : i32, i32
  }
}

module attributes {stable_mosaic.version = 11 : i64} {
  func.func @_bn_add_bn_kernel(%arg0: i32, %arg1: memref<64x128xf32, #tpu.memory_space<vmem>>, %arg2: memref<64x128xf32, #tpu.memory_space<vmem>>, %arg3: memref<1x128xf32, #tpu.memory_space<vmem>>, %arg4: memref<1x128xf32, #tpu.memory_space<vmem>>, %arg5: memref<1x128xf32, #tpu.memory_space<vmem>>, %arg6: memref<1x128xf32, #tpu.memory_space<vmem>>, %arg7: memref<64x128xf32, #tpu.memory_space<vmem>>) attributes {dimension_semantics = [#tpu.dimension_semantics<parallel>], iteration_bounds = array<i64: 2>, scalar_prefetch = 0 : i64, scratch_operands = 0 : i64, tpu.core_type = #tpu.core_type<tc>, window_params = [{transform_indices = @transform_0, window_bounds = array<i64: 64, 128>}, {transform_indices = @transform_1, window_bounds = array<i64: 64, 128>}, {pipeline_mode = #tpu.pipeline_mode<synchronous>, transform_indices = @transform_2, window_bounds = array<i64: 1, 128>}, {pipeline_mode = #tpu.pipeline_mode<synchronous>, transform_indices = @transform_3, window_bounds = array<i64: 1, 128>}, {pipeline_mode = #tpu.pipeline_mode<synchronous>, transform_indices = @transform_4, window_bounds = array<i64: 1, 128>}, {pipeline_mode = #tpu.pipeline_mode<synchronous>, transform_indices = @transform_5, window_bounds = array<i64: 1, 128>}, {transform_indices = @transform_6, window_bounds = array<i64: 64, 128>}]} {
    %c0 = arith.constant 0 : index
    %c0_0 = arith.constant 0 : index
    %0 = vector.load %arg1[%c0, %c0_0] : memref<64x128xf32, #tpu.memory_space<vmem>>, vector<64x128xf32>
    %c0_1 = arith.constant 0 : index
    %c0_2 = arith.constant 0 : index
    %1 = vector.load %arg3[%c0_1, %c0_2] : memref<1x128xf32, #tpu.memory_space<vmem>>, vector<1x128xf32>
    %2 = vector.broadcast %1 : vector<1x128xf32> to vector<64x128xf32>
    %3 = arith.mulf %0, %2 : vector<64x128xf32>
    %c0_3 = arith.constant 0 : index
    %c0_4 = arith.constant 0 : index
    %4 = vector.load %arg4[%c0_3, %c0_4] : memref<1x128xf32, #tpu.memory_space<vmem>>, vector<1x128xf32>
    %5 = vector.broadcast %4 : vector<1x128xf32> to vector<64x128xf32>
    %6 = arith.addf %3, %5 : vector<64x128xf32>
    %c0_5 = arith.constant 0 : index
    %c0_6 = arith.constant 0 : index
    %7 = vector.load %arg2[%c0_5, %c0_6] : memref<64x128xf32, #tpu.memory_space<vmem>>, vector<64x128xf32>
    %c0_7 = arith.constant 0 : index
    %c0_8 = arith.constant 0 : index
    %8 = vector.load %arg5[%c0_7, %c0_8] : memref<1x128xf32, #tpu.memory_space<vmem>>, vector<1x128xf32>
    %9 = vector.broadcast %8 : vector<1x128xf32> to vector<64x128xf32>
    %10 = arith.mulf %7, %9 : vector<64x128xf32>
    %11 = arith.addf %6, %10 : vector<64x128xf32>
    %c0_9 = arith.constant 0 : index
    %c0_10 = arith.constant 0 : index
    %12 = vector.load %arg6[%c0_9, %c0_10] : memref<1x128xf32, #tpu.memory_space<vmem>>, vector<1x128xf32>
    %13 = vector.broadcast %12 : vector<1x128xf32> to vector<64x128xf32>
    %14 = arith.addf %11, %13 : vector<64x128xf32>
    %c0_11 = arith.constant 0 : index
    %c0_12 = arith.constant 0 : index
    %15 = vector.load %arg7[%c0_11, %c0_12] : memref<64x128xf32, #tpu.memory_space<vmem>>, vector<64x128xf32>
    tpu.vector_store %arg7[%c0_11, %c0_12], %14 {strides = array<i32>} : memref<64x128xf32, #tpu.memory_space<vmem>>, vector<64x128xf32>,
    return
  }
  func.func @transform_0(%arg0: i32) -> (i32, i32) {
    %c0_i32 = arith.constant 0 : i32
    %c0_i32_0 = arith.constant 0 : i32
    return %arg0, %c0_i32 : i32, i32
  }
  func.func @transform_1(%arg0: i32) -> (i32, i32) {
    %c0_i32 = arith.constant 0 : i32
    %c0_i32_0 = arith.constant 0 : i32
    return %arg0, %c0_i32 : i32, i32
  }
  func.func @transform_2(%arg0: i32) -> (i32, i32) {
    %c0_i32 = arith.constant 0 : i32
    %c0_i32_0 = arith.constant 0 : i32
    %c0_i32_1 = arith.constant 0 : i32
    return %c0_i32, %c0_i32_0 : i32, i32
  }
  func.func @transform_3(%arg0: i32) -> (i32, i32) {
    %c0_i32 = arith.constant 0 : i32
    %c0_i32_0 = arith.constant 0 : i32
    %c0_i32_1 = arith.constant 0 : i32
    return %c0_i32, %c0_i32_0 : i32, i32
  }
  func.func @transform_4(%arg0: i32) -> (i32, i32) {
    %c0_i32 = arith.constant 0 : i32
    %c0_i32_0 = arith.constant 0 : i32
    %c0_i32_1 = arith.constant 0 : i32
    return %c0_i32, %c0_i32_0 : i32, i32
  }
  func.func @transform_5(%arg0: i32) -> (i32, i32) {
    %c0_i32 = arith.constant 0 : i32
    %c0_i32_0 = arith.constant 0 : i32
    %c0_i32_1 = arith.constant 0 : i32
    return %c0_i32, %c0_i32_0 : i32, i32
  }
  func.func @transform_6(%arg0: i32) -> (i32, i32) {
    %c0_i32 = arith.constant 0 : i32
    %c0_i32_0 = arith.constant 0 : i32
    return %arg0, %c0_i32 : i32, i32
  }
}

</mosaic_0001>

<bundles_post_ra>
// kernel: _res_sep_conv_impl.6
= control target key start
LH: loop header
LB: loop body
LE: loop exit
PB: predicated region body
PF: predicated region fallthrough
CT: control target
= control target key end

     0   :  { %s674_s18 = smov 0   ;;  %s850_s0 = inlined_call_operand.vmem [shape: f32[8,8,8,128], index: 0, kind: input, shape index: {}, may-alias: {0,1}]   ;;  %s851_s1 = inlined_call_operand.vmem [shape: f32[8,8,8,128], index: 1, kind: input, shape index: {}, may-alias: {0,1}]   ;;  %s852_s2 = inlined_call_operand.vmem [shape: f32[128,128], index: 2, kind: input, shape index: {}]   ;;  %s853_s3 = inlined_call_operand.vmem [shape: f32[128,128], index: 3, kind: input, shape index: {}]   ;;  %s854_s4 = inlined_call_operand.vmem [shape: f32[128,128], index: 4, kind: output, shape index: {0}]   ;;  %s855_s5 = inlined_call_operand.vmem [shape: f32[16,128], index: 5, kind: output, shape index: {1}]  }
   0x1 LB: > { %s680_s19 = sadd.s32 4294967295, %s641_s18   ;;  %p576_p0 = scmp.ge.s32.totalorder %s641_s18, 1  ;;  %s641_s18 = sphi %s674_s18, %s16_s18  }
   0x2   : > { %p212_p1 = scmp.lt.s32.totalorder %s641_s18, 3 }
   0x4   : > { %p213_p2 = pnand %p576_p0, %p212_p1 }
   0x5   : > { %s709_s11 = sshll.u32 (!%p213_p2), %s680_s19, 2  ;;  %s583_s28 = sshll.u32 (!%p213_p2), %s680_s19, 3 }
   0x6   : > { %216 = sbr.rel (%p213_p2) target bundleno = 221 (0xdd), region = 36  ;;  %s260_s22 = sadd.s32 (!%p213_p2), 3, %s709_s11 }
   0x7   : > { %p253_p3 = scmp.lt.s32.totalorder (!%p213_p2), %s709_s11, 7  ;;  %p731_p4 = scmp.lt.s32.totalorder (!%p213_p2), %s260_s22, 7 }
   0x8   : > { %p269_p5 = scmp.lt.s32.totalorder (!%p213_p2), %s583_s28, 15  ;;  %p274_p6 = scmp.lt.s32.totalorder (!%p213_p2), %s680_s19, 1 }
   0xb   : > { %v341_v0 = vld [vmem:[%s853_s3 + $0x78] sm:$0xff]  ;;  %v340_v2 = vld [vmem:[%s853_s3 + $0x70] sm:$0xff]  ;;  %v339_v4 = vld [vmem:[%s853_s3 + $0x68] sm:$0xff]  ;;  %s858_s11 = smov (!%p253_p3, %s709_s11), 7  ;;  %s860_s22 = smov (!%p731_p4, %s260_s22), 7 }
   0xc   : > { %v325_v1 = vld [vmem:[%s852_s2 + $0x78] sm:$0xff]  ;;  %342 = vmatpush.msra.mxu0 %v341_v0  ;;  %v324_v3 = vld [vmem:[%s852_s2 + $0x70] sm:$0xff]  ;;  %594 = vmatpush.msra.mxu2 %v341_v0  ;;  %v323_v5 = vld [vmem:[%s852_s2 + $0x68] sm:$0xff]  ;;  %s593_s23 = sshll.u32 %s860_s22, 6  ;;  %s592_s24 = sshll.u32 %s858_s11, 6 }
   0xd   : > { %383 = vmatpush.msra.mxu1 %v325_v1  ;;  %610 = vmatpush.msra.mxu3 %v325_v1  ;;  %v338_v6 = vld [vmem:[%s853_s3 + $0x60] sm:$0xff]  ;;  %v337_v8 = vld [vmem:[%s853_s3 + $0x58] sm:$0xff]  ;;  %v336_v10 = vld [vmem:[%s853_s3 + $0x50] sm:$0xff]  ;;  %s782_s8 = scalar_lea.vmem %s851_s1, %s593_s23  ;;  %s787_s12 = scalar_lea.vmem %s850_s0, %s592_s24 }
   0xe   : > { %343 = vmatpush.msra.mxu0 %v340_v2  ;;  %595 = vmatpush.msra.mxu2 %v340_v2  ;;  %v322_v7 = vld [vmem:[%s852_s2 + $0x60] sm:$0xff]  ;;  %v321_v9 = vld [vmem:[%s852_s2 + $0x58] sm:$0xff]  ;;  %v320_v11 = vld [vmem:[%s852_s2 + $0x50] sm:$0xff]  ;;  %s862_s28 = smov (!%p269_p5, %s583_s28), 15  ;;  %s864_s19 = smov (!%p274_p6, %s680_s19), 1 }
   0xf   : > { %384 = vmatpush.msra.mxu1 %v324_v3  ;;  %611 = vmatpush.msra.mxu3 %v324_v3  ;;  %v335_v12 = vld [vmem:[%s853_s3 + $0x48] sm:$0xff]  ;;  %v334_v14 = vld [vmem:[%s853_s3 + $0x40] sm:$0xff]  ;;  %v333_v16 = vld [vmem:[%s853_s3 + $0x38] sm:$0xff]  ;;  %s584_s29 = sshll.u32 %s862_s28, 3  ;;  %s585_s30 = sshll.u32 %s864_s19, 3  ;;  %v643_v3 = vmov 0.0  }
  0x10   : > { %344 = vmatpush.msra.mxu0 %v339_v4  ;;  %596 = vmatpush.msra.mxu2 %v339_v4  ;;  %v319_v13 = vld [vmem:[%s852_s2 + $0x48] sm:$0xff]  ;;  %v318_v15 = vld [vmem:[%s852_s2 + $0x40] sm:$0xff]  ;;  %v317_v17 = vld [vmem:[%s852_s2 + $0x38] sm:$0xff]  ;;  %s829_s6 = scalar_lea.vmem %s854_s4, %s584_s29  ;;  %s834_s9 = scalar_lea.vmem %s855_s5, %s585_s30 }
  0x11   : > { %385 = vmatpush.msra.mxu1 %v323_v5  ;;  %612 = vmatpush.msra.mxu3 %v323_v5  ;;  %v332_v18 = vld [vmem:[%s853_s3 + $0x30] sm:$0xff]  ;;  %v331_v20 = vld [vmem:[%s853_s3 + $0x28] sm:$0xff]  ;;  %v330_v22 = vld [vmem:[%s853_s3 + $0x20] sm:$0xff]  ;;  %432 = vst [vmem:[%s834_s9] sm:$0xff] %v643_v3 }
  0x12   : > { %345 = vmatpush.msra.mxu0 %v338_v6  ;;  %597 = vmatpush.msra.mxu2 %v338_v6  ;;  %v316_v19 = vld [vmem:[%s852_s2 + $0x30] sm:$0xff]  ;;  %v315_v21 = vld [vmem:[%s852_s2 + $0x28] sm:$0xff]  ;;  %v314_v23 = vld [vmem:[%s852_s2 + $0x20] sm:$0xff] }
  0x13   : > { %386 = vmatpush.msra.mxu1 %v322_v7  ;;  %613 = vmatpush.msra.mxu3 %v322_v7  ;;  %v329_v24 = vld [vmem:[%s853_s3 + $0x18] sm:$0xff]  ;;  %v328_v26 = vld [vmem:[%s853_s3 + $0x10] sm:$0xff]  ;;  %v294_v28 = vld [vmem:[%s782_s8] sm:$0xff] }
  0x14   : > { %346 = vmatpush.msra.mxu0 %v337_v8  ;;  %598 = vmatpush.msra.mxu2 %v337_v8  ;;  %v313_v25 = vld [vmem:[%s852_s2 + $0x18] sm:$0xff]  ;;  %v312_v27 = vld [vmem:[%s852_s2 + $0x10] sm:$0xff]  ;;  %v278_v29 = vld [vmem:[%s787_s12] sm:$0xff]  ;;  %v302_v36 = vmax.f32 %v294_v28, 0.0 }
  0x15   : > { %387 = vmatpush.msra.mxu1 %v321_v9  ;;  %614 = vmatpush.msra.mxu3 %v321_v9  ;;  %v327_v30 = vld [vmem:[%s853_s3 + $0x8] sm:$0xff]  ;;  %v298_v32 = vld [vmem:[%s782_s8 + $0x20] sm:$0xff]  ;;  %v286_v37 = vmax.f32 %v278_v29, 0.0  ;;  %v296_v48 = vld [vmem:[%s782_s8 + $0x10] sm:$0xff] }
  0x16   : > { %347 = vmatpush.msra.mxu0 %v336_v10  ;;  %599 = vmatpush.msra.mxu2 %v336_v10  ;;  %v311_v31 = vld [vmem:[%s852_s2 + $0x8] sm:$0xff]  ;;  %v282_v33 = vld [vmem:[%s787_s12 + $0x20] sm:$0xff]  ;;  %v306_v38 = vmax.f32 %v298_v32, 0.0  ;;  %v280_v49 = vld [vmem:[%s787_s12 + $0x10] sm:$0xff]  ;;  %v304_v52 = vmax.f32 %v296_v48, 0.0 }
  0x17   : > { %388 = vmatpush.msra.mxu1 %v320_v11  ;;  %615 = vmatpush.msra.mxu3 %v320_v11  ;;  %v326_v34 = vld [vmem:[%s853_s3] sm:$0xff]  ;;  %v290_v39 = vmax.f32 %v282_v33, 0.0  ;;  %v295_v40 = vld [vmem:[%s782_s8 + $0x8] sm:$0xff]  ;;  %v300_v50 = vld [vmem:[%s782_s8 + $0x30] sm:$0xff]  ;;  %v288_v53 = vmax.f32 %v280_v49, 0.0 }
  0x18   : > { %348 = vmatpush.msra.mxu0 %v335_v12  ;;  %600 = vmatpush.msra.mxu2 %v335_v12  ;;  %v310_v35 = vld [vmem:[%s852_s2] sm:$0xff]  ;;  %v279_v41 = vld [vmem:[%s787_s12 + $0x8] sm:$0xff]  ;;  %v303_v44 = vmax.f32 %v295_v40, 0.0  ;;  %v284_v51 = vld [vmem:[%s787_s12 + $0x30] sm:$0xff]  ;;  %v308_v54 = vmax.f32 %v300_v50, 0.0 }
  0x19   : > { %389 = vmatpush.msra.mxu1 %v319_v13  ;;  %616 = vmatpush.msra.mxu3 %v319_v13  ;;  %v299_v42 = vld [vmem:[%s782_s8 + $0x28] sm:$0xff]  ;;  %v287_v45 = vmax.f32 %v279_v41, 0.0  ;;  %v292_v55 = vmax.f32 %v284_v51, 0.0  ;;  %v297_v56 = vld [vmem:[%s782_s8 + $0x18] sm:$0xff] }
  0x1a   : > { %349 = vmatpush.msra.mxu0 %v334_v14  ;;  %601 = vmatpush.msra.mxu2 %v334_v14  ;;  %v283_v43 = vld [vmem:[%s787_s12 + $0x28] sm:$0xff]  ;;  %v307_v46 = vmax.f32 %v299_v42, 0.0  ;;  %v281_v57 = vld [vmem:[%s787_s12 + $0x18] sm:$0xff]  ;;  %v305_v60 = vmax.f32 %v297_v56, 0.0 }
  0x1b   : > { %390 = vmatpush.msra.mxu1 %v318_v15  ;;  %617 = vmatpush.msra.mxu3 %v318_v15  ;;  %v291_v47 = vmax.f32 %v283_v43, 0.0  ;;  %v301_v58 = vld [vmem:[%s782_s8 + $0x38] sm:$0xff]  ;;  %v289_v61 = vmax.f32 %v281_v57, 0.0 }
  0x1c   : > { %350 = vmatpush.msra.mxu0 %v333_v16  ;;  %602 = vmatpush.msra.mxu2 %v333_v16  ;;  %v285_v59 = vld [vmem:[%s787_s12 + $0x38] sm:$0xff]  ;;  %v309_v62 = vmax.f32 %v301_v58, 0.0 }
  0x1d   : > { %391 = vmatpush.msra.mxu1 %v317_v17  ;;  %618 = vmatpush.msra.mxu3 %v317_v17  ;;  %v293_v63 = vmax.f32 %v285_v59, 0.0 }
  0x1e   : > { %351 = vmatpush.msra.mxu0 %v332_v18  ;;  %603 = vmatpush.msra.mxu2 %v332_v18 }
  0x1f   : > { %392 = vmatpush.msra.mxu1 %v316_v19  ;;  %619 = vmatpush.msra.mxu3 %v316_v19 }
  0x20   : > { %352 = vmatpush.msra.mxu0 %v331_v20  ;;  %604 = vmatpush.msra.mxu2 %v331_v20 }
  0x21   : > { %393 = vmatpush.msra.mxu1 %v315_v21  ;;  %620 = vmatpush.msra.mxu3 %v315_v21 }
  0x22   : > { %353 = vmatpush.msra.mxu0 %v330_v22  ;;  %605 = vmatpush.msra.mxu2 %v330_v22 }
  0x23   : > { %394 = vmatpush.msra.mxu1 %v314_v23  ;;  %621 = vmatpush.msra.mxu3 %v314_v23 }
  0x24   : > { %354 = vmatpush.msra.mxu0 %v329_v24  ;;  %606 = vmatpush.msra.mxu2 %v329_v24 }
  0x25   : > { %395 = vmatpush.msra.mxu1 %v313_v25  ;;  %622 = vmatpush.msra.mxu3 %v313_v25 }
  0x26   : > { %355 = vmatpush.msra.mxu0 %v328_v26  ;;  %607 = vmatpush.msra.mxu2 %v328_v26 }
  0x27   : > { %396 = vmatpush.msra.mxu1 %v312_v27  ;;  %623 = vmatpush.msra.mxu3 %v312_v27 }
  0x28   : > { %356 = vmatpush.msra.mxu0 %v327_v30  ;;  %608 = vmatpush.msra.mxu2 %v327_v30 }
  0x29   : > { %397 = vmatpush.msra.mxu1 %v311_v31  ;;  %624 = vmatpush.msra.mxu3 %v311_v31 }
  0x2a   : > { %357 = vmatpush.msra.mxu0 %v326_v34  ;;  %609 = vmatpush.msra.mxu2 %v326_v34 }
  0x2b   : > { %398 = vmatpush.msra.mxu1 %v310_v35  ;;  %358 = vmatmul.f32.vlgmr.msra.gmra.mxu0 %v302_v36 }
  0x2c   : > { %399 = vmatmul.f32.vlgmr.msra.gmra.mxu1 %v286_v37  ;;  %625 = vmatpush.msra.mxu3 %v310_v35 }
  0x2d   : > { %370 = vmatmul.f32.vlgmr.msra.gmra.mxu2 %v306_v38  ;;  %411 = vmatmul.f32.vlgmr.msra.gmra.mxu3 %v290_v39 }
  0x33   : > { %361 = vmatmul.f32.gmra.mxu0 %v303_v44 }
  0x34   : > { %402 = vmatmul.f32.gmra.mxu1 %v287_v45 }
  0x35   : > { %373 = vmatmul.f32.gmra.mxu2 %v307_v46  ;;  %414 = vmatmul.f32.gmra.mxu3 %v291_v47 }
  0x3b   : > { %364 = vmatmul.f32.gmra.mxu0 %v304_v52 }
  0x3c   : > { %405 = vmatmul.f32.gmra.mxu1 %v288_v53 }
  0x3d   : > { %376 = vmatmul.f32.gmra.mxu2 %v308_v54  ;;  %417 = vmatmul.f32.gmra.mxu3 %v292_v55 }
  0x43   : > { %367 = vmatmul.f32.gmra.mxu0 %v305_v60 }
  0x44   : > { %408 = vmatmul.f32.gmra.mxu1 %v289_v61 }
  0x45   : > { %379 = vmatmul.f32.gmra.mxu2 %v309_v62  ;;  %420 = vmatmul.f32.gmra.mxu3 %v293_v63 }
  0xa8   : > { %v359_v0 = vpop.f32.mrf.mxu0 }
  0xa9   : > { %v400_v1 = vpop.f32.mrf.mxu1 }
  0xaa   : > { %v401_v2 = vadd.f32 %v400_v1, %v359_v0 }
  0xac   : > { %424 = vst [vmem:[%s829_s6] sm:$0xff] %v401_v2  ;;  %v447_v17 = vmul.f32 %v401_v2, %v401_v2 }
  0xb0   : > { %v362_v4 = vpop.f32.mrf.mxu0  ;;  %v371_v5 = vpop.f32.mrf.mxu2 }
  0xb1   : > { %v403_v6 = vpop.f32.mrf.mxu1  ;;  %v412_v7 = vpop.f32.mrf.mxu3 }
  0xb2   : > { %v404_v8 = vadd.f32 %v403_v6, %v362_v4  ;;  %v413_v9 = vadd.f32 %v412_v7, %v371_v5 }
  0xb4   : > { %425 = vst [vmem:[%s829_s6 + $0x8] sm:$0xff] %v404_v8  ;;  %v448_v16 = vmul.f32 %v404_v8, %v404_v8  ;;  %v433_v18 = vadd.f32 %v404_v8, %v401_v2  ;;  %v451_v31 = vmul.f32 %v413_v9, %v413_v9 }
  0xb5   : > { %428 = vst [vmem:[%s829_s6 + $0x20] sm:$0xff] %v413_v9 }
  0xb6   : > { %v455_v24 = vadd.f32 %v448_v16, %v447_v17 }
  0xb8   : > { %v365_v10 = vpop.f32.mrf.mxu0  ;;  %v374_v11 = vpop.f32.mrf.mxu2 }
  0xb9   : > { %v406_v12 = vpop.f32.mrf.mxu1  ;;  %v415_v13 = vpop.f32.mrf.mxu3 }
  0xba   : > { %v407_v14 = vadd.f32 %v406_v12, %v365_v10  ;;  %v416_v15 = vadd.f32 %v415_v13, %v374_v11 }
  0xbc   : > { %426 = vst [vmem:[%s829_s6 + $0x10] sm:$0xff] %v407_v14  ;;  %v449_v19 = vmul.f32 %v407_v14, %v407_v14  ;;  %v434_v25 = vadd.f32 %v433_v18, %v407_v14  ;;  %v452_v34 = vmul.f32 %v416_v15, %v416_v15 }
  0xbd   : > { %429 = vst [vmem:[%s829_s6 + $0x28] sm:$0xff] %v416_v15 }
  0xbe   : > { %v456_v28 = vadd.f32 %v455_v24, %v449_v19 }
  0xc0   : > { %v368_v20 = vpop.f32.mrf.mxu0  ;;  %v377_v21 = vpop.f32.mrf.mxu2 }
  0xc1   : > { %v409_v22 = vpop.f32.mrf.mxu1  ;;  %v418_v23 = vpop.f32.mrf.mxu3 }
  0xc2   : > { %v410_v26 = vadd.f32 %v409_v22, %v368_v20  ;;  %v419_v27 = vadd.f32 %v418_v23, %v377_v21 }
  0xc4   : > { %427 = vst [vmem:[%s829_s6 + $0x18] sm:$0xff] %v410_v26  ;;  %v435_v29 = vadd.f32 %v434_v25, %v410_v26  ;;  %v450_v30 = vmul.f32 %v410_v26, %v410_v26  ;;  %v453_v40 = vmul.f32 %v419_v27, %v419_v27 }
  0xc5   : > { %430 = vst [vmem:[%s829_s6 + $0x30] sm:$0xff] %v419_v27 }
  0xc6   : > { %v436_v32 = vadd.f32 %v435_v29, %v413_v9  ;;  %v457_v33 = vadd.f32 %v456_v28, %v450_v30 }
  0xc8   : > { %v458_v35 = vadd.f32 %v457_v33, %v451_v31  ;;  %v437_v36 = vadd.f32 %v436_v32, %v416_v15  ;;  %v380_v37 = vpop.f32.mrf.mxu2 }
  0xc9   : > { %v421_v38 = vpop.f32.mrf.mxu3 }
  0xca   : > { %v438_v39 = vadd.f32 %v437_v36, %v419_v27  ;;  %v459_v41 = vadd.f32 %v458_v35, %v452_v34  ;;  %v422_v42 = vadd.f32 %v421_v38, %v380_v37 }
  0xcc   : > { %v460_v43 = vadd.f32 %v459_v41, %v453_v40  ;;  %431 = vst [vmem:[%s829_s6 + $0x38] sm:$0xff] %v422_v42  ;;  %v439_v44 = vadd.f32 %v438_v39, %v422_v42  ;;  %v454_v45 = vmul.f32 %v422_v42, %v422_v42 }
  0xce   : > { %v440_v46 = vrot.slane %v439_v44, 4  ;;  %v461_v47 = vadd.f32 %v460_v43, %v454_v45 }
  0xd0   : > { %v441_v48 = vadd.f32 %v440_v46, %v439_v44  ;;  %v462_v49 = vrot.slane %v461_v47, 4 }
  0xd2   : > { %v442_v50 = vrot.slane %v441_v48, 2  ;;  %v463_v51 = vadd.f32 %v462_v49, %v461_v47 }
  0xd4   : > { %v443_v52 = vadd.f32 %v442_v50, %v441_v48  ;;  %v464_v53 = vrot.slane %v463_v51, 2 }
  0xd6   : > { %v444_v54 = vrot.slane %v443_v52, 1  ;;  %v465_v55 = vadd.f32 %v464_v53, %v463_v51 }
  0xd8   : > { %v445_v56 = vadd.f32 %v444_v54, %v443_v52  ;;  %v466_v57 = vrot.slane %v465_v55, 1 }
  0xda   : > { %446 = vst [vmem:[%s834_s9] sm:$0x1] %v445_v56  ;;  %v467_v58 = vadd.f32 %v466_v57, %v465_v55 }
  0xdc   : > { %468 = vst [vmem:[%s834_s9 + $0x1] sm:$0x1] %v467_v58 }
  0xdd PF: > { %s16_s18 = sadd.s32 1, %s641_s18  }
  0xde   : > { %p13_p7 = scmp.ge.s32.totalorder %s16_s18, 4  }
  0xe0   :  { %15 = sbr.rel (!%p13_p7) target bundleno = 1 (0x1), region = 81 }

// kernel: _res_sep_conv_impl.5
= control target key start
LH: loop header
LB: loop body
LE: loop exit
PB: predicated region body
PF: predicated region fallthrough
CT: control target
= control target key end

     0   :  { %s1311_s18 = smov 0   ;;  %s2029_s0 = inlined_call_operand.vmem [shape: f32[2,8,8,128], index: 0, kind: input, shape index: {}]   ;;  %s2030_s1 = inlined_call_operand.vmem [shape: f32[9,128,128], index: 1, kind: input, shape index: {}]   ;;  %s2031_s2 = inlined_call_operand.vmem [shape: f32[1,128], index: 2, kind: input, shape index: {}]   ;;  %s2032_s3 = inlined_call_operand.vmem [shape: f32[1,128], index: 3, kind: input, shape index: {}]   ;;  %s2033_s4 = inlined_call_operand.vmem [shape: f32[128,128], index: 4, kind: output, shape index: {0}]   ;;  %s2034_s5 = inlined_call_operand.vmem [shape: f32[16,128], index: 5, kind: output, shape index: {1}]  }
   0x1 LB: > { %s1317_s19 = sadd.s32 4294967295, %s1278_s18   ;;  %p1092_p0 = scmp.ge.s32.totalorder %s1278_s18, 1  ;;  %s1278_s18 = sphi %s1311_s18, %s16_s18  }
   0x2   : > { %p190_p1 = scmp.lt.s32.totalorder %s1278_s18, 3 }
   0x4   : > { %p191_p2 = pnand %p1092_p0, %p190_p1 }
   0x5   : > { %p222_p3 = scmp.lt.s32.totalorder (!%p191_p2), %s1317_s19, 1 }
   0x6   : > { %194 = sbr.rel (%p191_p2) target bundleno = 346 (0x15a), region = 36 }
   0xb   : > { %v1113_v0 = vld [vmem:[%s2030_s1 + $0xf8] sm:$0xff]  ;;  %v1112_v1 = vld [vmem:[%s2030_s1 + $0xf0] sm:$0xff]  ;;  %v1280_v2 = vmov 0.0   ;;  %v1111_v3 = vld [vmem:[%s2030_s1 + $0xe8] sm:$0xff]  ;;  %s1333_s26 = scalar_select %p222_p3, %s1317_s19, 1 }
   0xc   : > { %1229 = vmatpush.msra.mxu1 %v1113_v0  ;;  %355 = vmatpush.msra.mxu0 %v1113_v0  ;;  %285 = vst [vmem:[#allocation2 + $0x40] sm:$0xff] %v1280_v2  ;;  %v1129_v4 = vld [vmem:[%s2030_s1 + $0x178] sm:$0xff]  ;;  %v1128_v5 = vld [vmem:[%s2030_s1 + $0x170] sm:$0xff]  ;;  %v1110_v6 = vld [vmem:[%s2030_s1 + $0xe0] sm:$0xff] }
   0xd   : > { %286 = vst [vmem:[#allocation2 + $0x48] sm:$0x3] %v1280_v2  ;;  %462 = vmatpush.msra.mxu2 %v1129_v4  ;;  %s1228_s8 = sshll.u32 %s1333_s26, 6  ;;  %v1127_v7 = vld [vmem:[%s2030_s1 + $0x168] sm:$0xff]  ;;  %v1109_v8 = vld [vmem:[%s2030_s1 + $0xd8] sm:$0xff]  ;;  %v1108_v9 = vld [vmem:[%s2030_s1 + $0xd0] sm:$0xff] }
   0xe   : > { %1230 = vmatpush.msra.mxu1 %v1112_v1  ;;  %356 = vmatpush.msra.mxu0 %v1112_v1  ;;  %277 = vst [vmem:[#allocation2] sm:$0xff] %v1280_v2  ;;  %s1354_s13 = scalar_lea.vmem %s2029_s0, %s1228_s8  ;;  %v1126_v10 = vld [vmem:[%s2030_s1 + $0x160] sm:$0xff]  ;;  %v1125_v11 = vld [vmem:[%s2030_s1 + $0x158] sm:$0xff]  ;;  %v1107_v16 = vld [vmem:[%s2030_s1 + $0xc8] sm:$0xff]  ;;  %s1097_s15 = sshll.u32 %s1333_s26, 3 }
   0xf   : > { %278 = vst [vmem:[#allocation2 + $0x8] sm:$0x3] %v1280_v2  ;;  %463 = vmatpush.msra.mxu2 %v1128_v5  ;;  %v1145_v12 = vld [vmem:[%s2030_s1 + $0x1f8] sm:$0xff]  ;;  %v1379_v14 = vld [vmem:[%s2031_s2] ss:$0 sm:$0xff]  ;;  %v1144_v17 = vld [vmem:[%s2030_s1 + $0x1f0] sm:$0xff]  ;;  %s1961_s20 = scalar_lea.vmem %s2034_s5, %s1097_s15 }
  0x10   : > { %1231 = vmatpush.msra.mxu1 %v1111_v3  ;;  %357 = vmatpush.msra.mxu0 %v1111_v3  ;;  %279 = vst [vmem:[#allocation2 + $0x10] sm:$0xff] %v1280_v2  ;;  %v240_v13 = vld [vmem:[%s1354_s13 + $0x18] sm:$0xff]  ;;  %v1384_v15 = vld [vmem:[%s2032_s3] ss:$0 sm:$0xff]  ;;  %v1124_v18 = vld [vmem:[%s2030_s1 + $0x150] sm:$0xff]  ;;  %s1095_s26 = sshll.u32 %s1317_s19, 3 }
  0x11   : > { %280 = vst [vmem:[#allocation2 + $0x18] sm:$0x3] %v1280_v2  ;;  %464 = vmatpush.msra.mxu2 %v1127_v7  ;;  %536 = vmatpush.msra.mxu3 %v1145_v12  ;;  %v252_v19 = vmul.f32 %v1379_v14, %v240_v13  ;;  %v1143_v20 = vld [vmem:[%s2030_s1 + $0x1e8] sm:$0xff]  ;;  %v1106_v21 = vld [vmem:[%s2030_s1 + $0xc0] sm:$0xff]  ;;  %v1105_v25 = vld [vmem:[%s2030_s1 + $0xb8] sm:$0xff]  ;;  %p228_p4 = scmp.lt.s32.totalorder %s1095_s26, 15 }
  0x12   : > { %1232 = vmatpush.msra.mxu1 %v1110_v6  ;;  %358 = vmatpush.msra.mxu0 %v1110_v6  ;;  %281 = vst [vmem:[#allocation2 + $0x20] sm:$0xff] %v1280_v2  ;;  %v1123_v22 = vld [vmem:[%s2030_s1 + $0x148] sm:$0xff]  ;;  %v1142_v24 = vld [vmem:[%s2030_s1 + $0x1e0] sm:$0xff]  ;;  %v1141_v29 = vld [vmem:[%s2030_s1 + $0x1d8] sm:$0xff] }
  0x13   : > { %282 = vst [vmem:[#allocation2 + $0x28] sm:$0x3] %v1280_v2  ;;  %465 = vmatpush.msra.mxu2 %v1126_v10  ;;  %537 = vmatpush.msra.mxu3 %v1144_v17  ;;  %v264_v23 = vadd.f32 %v1384_v15, %v252_v19  ;;  %v241_v26 = vld [vmem:[%s1354_s13 + $0x20] sm:$0xff]  ;;  %v1104_v31 = vld [vmem:[%s2030_s1 + $0xb0] sm:$0xff]  ;;  %v1121_v32 = vld [vmem:[%s2030_s1 + $0x138] sm:$0xff]  ;;  %s2036_s26 = smov (!%p228_p4, %s1095_s26), 15 }
  0x14   : > { %1233 = vmatpush.msra.mxu1 %v1109_v8  ;;  %359 = vmatpush.msra.mxu0 %v1109_v8  ;;  %283 = vst [vmem:[#allocation2 + $0x30] sm:$0xff] %v1280_v2  ;;  %v1122_v27 = vld [vmem:[%s2030_s1 + $0x140] sm:$0xff]  ;;  %v253_v30 = vmul.f32 %v1379_v14, %v241_v26  ;;  %v1140_v34 = vld [vmem:[%s2030_s1 + $0x1d0] sm:$0xff]  ;;  %v1103_v35 = vld [vmem:[%s2030_s1 + $0xa8] sm:$0xff]  ;;  %s1096_s21 = sshll.u32 %s2036_s26, 3 }
  0x15   : > { %284 = vst [vmem:[#allocation2 + $0x38] sm:$0x3] %v1280_v2  ;;  %466 = vmatpush.msra.mxu2 %v1125_v11  ;;  %538 = vmatpush.msra.mxu3 %v1143_v20  ;;  %v1421_v28 = vmax.f32 %v264_v23, 0.0  ;;  %v1120_v36 = vld [vmem:[%s2030_s1 + $0x130] sm:$0xff]  ;;  %v1139_v37 = vld [vmem:[%s2030_s1 + $0x1c8] sm:$0xff]  ;;  %v237_v38 = vld [vmem:[%s1354_s13] sm:$0xff]  ;;  %s1999_s19 = scalar_lea.vmem %s2033_s4, %s1096_s21 }
  0x16   : > { %1234 = vmatpush.msra.mxu1 %v1108_v9  ;;  %360 = vmatpush.msra.mxu0 %v1108_v9  ;;  %287 = vst [vmem:[#allocation2 + $0x50] sm:$0xff] %v1280_v2  ;;  %v265_v33 = vadd.f32 %v1384_v15, %v253_v30  ;;  %v1102_v39 = vld [vmem:[%s2030_s1 + $0xa0] sm:$0xff]  ;;  %v249_v40 = vmul.f32 %v1379_v14, %v237_v38  ;;  %v242_v41 = vld [vmem:[%s1354_s13 + $0x28] sm:$0xff]  ;;  %v1101_v46 = vld [vmem:[%s2030_s1 + $0x98] sm:$0xff] }
  0x17   : > { %288 = vst [vmem:[#allocation2 + $0x58] sm:$0x3] %v1280_v2  ;;  %467 = vmatpush.msra.mxu2 %v1124_v18  ;;  %539 = vmatpush.msra.mxu3 %v1142_v24  ;;  %v1119_v42 = vld [vmem:[%s2030_s1 + $0x128] sm:$0xff]  ;;  %v1138_v44 = vld [vmem:[%s2030_s1 + $0x1c0] sm:$0xff]  ;;  %v254_v45 = vmul.f32 %v1379_v14, %v242_v41  ;;  %v1137_v49 = vld [vmem:[%s2030_s1 + $0x1b8] sm:$0xff] }
  0x18   : > { %1235 = vmatpush.msra.mxu1 %v1107_v16  ;;  %361 = vmatpush.msra.mxu0 %v1107_v16  ;;  %289 = vst [vmem:[#allocation2 + $0x60] sm:$0xff] %v1280_v2  ;;  %v1462_v43 = vmax.f32 %v265_v33, 0.0  ;;  %v261_v47 = vadd.f32 %v1384_v15, %v249_v40  ;;  %v1118_v48 = vld [vmem:[%s2030_s1 + $0x120] sm:$0xff]  ;;  %v1100_v51 = vld [vmem:[%s2030_s1 + $0x90] sm:$0xff]  ;;  %v1117_v53 = vld [vmem:[%s2030_s1 + $0x118] sm:$0xff] }
  0x19   : > { %290 = vst [vmem:[#allocation2 + $0x68] sm:$0x3] %v1280_v2  ;;  %468 = vmatpush.msra.mxu2 %v1123_v22  ;;  %540 = vmatpush.msra.mxu3 %v1141_v29  ;;  %v266_v50 = vadd.f32 %v1384_v15, %v254_v45  ;;  %v1136_v55 = vld [vmem:[%s2030_s1 + $0x1b0] sm:$0xff]  ;;  %v238_v56 = vld [vmem:[%s1354_s13 + $0x8] sm:$0xff]  ;;  %v1098_v63 = vld [vmem:[%s2030_s1 + $0x80] sm:$0xff] }
  0x1a   : > { %1236 = vmatpush.msra.mxu1 %v1106_v21  ;;  %362 = vmatpush.msra.mxu0 %v1106_v21  ;;  %291 = vst [vmem:[#allocation2 + $0x70] sm:$0xff] %v1280_v2  ;;  %v1484_v52 = vmax.f32 %v261_v47, 0.0  ;;  %v1099_v57 = vld [vmem:[%s2030_s1 + $0x88] sm:$0xff]  ;;  %v250_v58 = vmul.f32 %v1379_v14, %v238_v56  ;;  %v243_v59 = vld [vmem:[%s1354_s13 + $0x30] sm:$0xff]  ;;  %v329_v4 = vld [vmem:[%s2030_s1 + $0x78] sm:$0xff] }
  0x1b   : > { %301 = vst [vmem:[#allocation2 + $0x41] sm:$0xff] %v1421_v28  ;;  %469 = vmatpush.msra.mxu2 %v1122_v27  ;;  %541 = vmatpush.msra.mxu3 %v1140_v34  ;;  %v1489_v54 = vmax.f32 %v266_v50, 0.0  ;;  %v1116_v60 = vld [vmem:[%s2030_s1 + $0x110] sm:$0xff]  ;;  %v1135_v61 = vld [vmem:[%s2030_s1 + $0x1a8] sm:$0xff]  ;;  %v255_v62 = vmul.f32 %v1379_v14, %v243_v59  ;;  %v1161_v5 = vld [vmem:[%s2030_s1 + $0x278] sm:$0xff] }
  0x1c   : > { %1237 = vmatpush.msra.mxu1 %v1105_v25  ;;  %363 = vmatpush.msra.mxu0 %v1105_v25  ;;  %292 = vst [vmem:[#allocation2 + $0x78] sm:$0x3] %v1280_v2  ;;  %v262_v0 = vadd.f32 %v1384_v15, %v250_v58  ;;  %v330_v1 = vld [vmem:[#allocation2 + $0x1] sm:$0xff]  ;;  %v239_v7 = vld [vmem:[%s1354_s13 + $0x10] sm:$0xff]  ;;  %v1133_v17 = vld [vmem:[%s2030_s1 + $0x198] sm:$0xff] }
  0x1d   : > { %293 = vst [vmem:[#allocation2 + $0x80] sm:$0xff] %v1280_v2  ;;  %470 = vmatpush.msra.mxu2 %v1121_v32  ;;  %542 = vmatpush.msra.mxu3 %v1139_v37  ;;  %v267_v3 = vadd.f32 %v1384_v15, %v255_v62  ;;  %v1115_v8 = vld [vmem:[%s2030_s1 + $0x108] sm:$0xff]  ;;  %v1134_v9 = vld [vmem:[%s2030_s1 + $0x1a0] sm:$0xff]  ;;  %v251_v11 = vmul.f32 %v1379_v14, %v239_v7  ;;  %v328_v12 = vld [vmem:[%s2030_s1 + $0x70] sm:$0xff] }
  0x1e   : > { %1238 = vmatpush.msra.mxu1 %v1104_v31  ;;  %364 = vmatpush.msra.mxu0 %v1104_v31  ;;  %294 = vst [vmem:[#allocation2 + $0x88] sm:$0x3] %v1280_v2  ;;  %v1520_v6 = vmax.f32 %v262_v0, 0.0  ;;  %v1160_v13 = vld [vmem:[%s2030_s1 + $0x270] sm:$0xff]  ;;  %v1114_v16 = vld [vmem:[%s2030_s1 + $0x100] sm:$0xff]  ;;  %v327_v19 = vld [vmem:[%s2030_s1 + $0x68] sm:$0xff] }
  0x1f   : > { %295 = vst [vmem:[#allocation2 + $0x90] sm:$0xff] %v1280_v2  ;;  %471 = vmatpush.msra.mxu2 %v1120_v36  ;;  %543 = vmatpush.msra.mxu3 %v1138_v44  ;;  %v1529_v10 = vmax.f32 %v267_v3, 0.0  ;;  %v263_v18 = vadd.f32 %v1384_v15, %v251_v11  ;;  %v1159_v20 = vld [vmem:[%s2030_s1 + $0x268] sm:$0xff]  ;;  %v1132_v22 = vld [vmem:[%s2030_s1 + $0x190] sm:$0xff]  ;;  %v326_v24 = vld [vmem:[%s2030_s1 + $0x60] sm:$0xff] }
  0x20   : > { %1239 = vmatpush.msra.mxu1 %v1103_v35  ;;  %365 = vmatpush.msra.mxu0 %v1103_v35  ;;  %296 = vst [vmem:[#allocation2 + $0x98] sm:$0x3] %v1280_v2  ;;  %v437_v21 = vld [vmem:[#allocation2 + $0x2] sm:$0xff]  ;;  %v325_v26 = vld [vmem:[%s2030_s1 + $0x58] sm:$0xff]  ;;  %v324_v31 = vld [vmem:[%s2030_s1 + $0x50] sm:$0xff] }
  0x21   : > { %302 = vst [vmem:[#allocation2 + $0x51] sm:$0xff] %v1462_v43  ;;  %472 = vmatpush.msra.mxu2 %v1119_v42  ;;  %544 = vmatpush.msra.mxu3 %v1137_v49  ;;  %v1557_v23 = vmax.f32 %v263_v18, 0.0  ;;  %v1158_v25 = vld [vmem:[%s2030_s1 + $0x260] sm:$0xff]  ;;  %v1157_v27 = vld [vmem:[%s2030_s1 + $0x258] sm:$0xff]  ;;  %v1131_v30 = vld [vmem:[%s2030_s1 + $0x188] sm:$0xff] }
  0x22   : > { %1240 = vmatpush.msra.mxu1 %v1102_v39  ;;  %366 = vmatpush.msra.mxu0 %v1102_v39  ;;  %298 = vst [vmem:[#allocation2 + $0x11] sm:$0xff] %v1484_v52  ;;  %v1193_v29 = vld [vmem:[%s2030_s1 + $0x378] sm:$0xff]  ;;  %v1156_v32 = vld [vmem:[%s2030_s1 + $0x250] sm:$0xff]  ;;  %v1130_v34 = vld [vmem:[%s2030_s1 + $0x180] sm:$0xff] }
  0x23   : > { %473 = vmatpush.msra.mxu2 %v1118_v48  ;;  %303 = vst [vmem:[#allocation2 + $0x61] sm:$0xff] %v1489_v54  ;;  %545 = vmatpush.msra.mxu3 %v1136_v55  ;;  %v1192_v33 = vld [vmem:[%s2030_s1 + $0x370] sm:$0xff]  ;;  %v323_v35 = vld [vmem:[%s2030_s1 + $0x48] sm:$0xff]  ;;  %v322_v39 = vld [vmem:[%s2030_s1 + $0x40] sm:$0xff] }
  0x24   : > { %1241 = vmatpush.msra.mxu1 %v1101_v46  ;;  %367 = vmatpush.msra.mxu0 %v1101_v46  ;;  %299 = vst [vmem:[#allocation2 + $0x21] sm:$0xff] %v1520_v6  ;;  %v1155_v36 = vld [vmem:[%s2030_s1 + $0x248] sm:$0xff]  ;;  %v1154_v40 = vld [vmem:[%s2030_s1 + $0x240] sm:$0xff]  ;;  %v321_v41 = vld [vmem:[%s2030_s1 + $0x38] sm:$0xff] }
  0x25   : > { %474 = vmatpush.msra.mxu2 %v1117_v53  ;;  %546 = vmatpush.msra.mxu3 %v1135_v61  ;;  %304 = vst [vmem:[#allocation2 + $0x71] sm:$0xff] %v1529_v10  ;;  %v1153_v42 = vld [vmem:[%s2030_s1 + $0x238] sm:$0xff]  ;;  %v1191_v44 = vld [vmem:[%s2030_s1 + $0x368] sm:$0xff]  ;;  %v320_v46 = vld [vmem:[%s2030_s1 + $0x30] sm:$0xff] }
  0x26   : > { %1242 = vmatpush.msra.mxu1 %v1100_v51  ;;  %368 = vmatpush.msra.mxu0 %v1100_v51  ;;  %300 = vst [vmem:[#allocation2 + $0x31] sm:$0xff] %v1557_v23  ;;  %v1209_v45 = vld [vmem:[%s2030_s1 + $0x3f8] sm:$0xff]  ;;  %v1152_v47 = vld [vmem:[%s2030_s1 + $0x230] sm:$0xff]  ;;  %v1190_v48 = vld [vmem:[%s2030_s1 + $0x360] sm:$0xff] }
  0x27   : > { %475 = vmatpush.msra.mxu2 %v1116_v60  ;;  %547 = vmatpush.msra.mxu3 %v1134_v9  ;;  %v1208_v49 = vld [vmem:[%s2030_s1 + $0x3f0] sm:$0xff]  ;;  %v319_v50 = vld [vmem:[%s2030_s1 + $0x28] sm:$0xff]  ;;  %v318_v56 = vld [vmem:[%s2030_s1 + $0x20] sm:$0xff]  ;;  %964 = vst [vmem:[%s1961_s20] sm:$0xff] %v1280_v2 }
  0x28   : > { %1243 = vmatpush.msra.mxu1 %v1099_v57  ;;  %369 = vmatpush.msra.mxu0 %v1099_v57  ;;  %v1151_v51 = vld [vmem:[%s2030_s1 + $0x228] sm:$0xff]  ;;  %v1150_v57 = vld [vmem:[%s2030_s1 + $0x220] sm:$0xff]  ;;  %v317_v58 = vld [vmem:[%s2030_s1 + $0x18] sm:$0xff] }
  0x29   : > { %476 = vmatpush.msra.mxu2 %v1115_v8  ;;  %548 = vmatpush.msra.mxu3 %v1133_v17  ;;  %v1598_v37 = vld [vmem:[#allocation2 + $0x12] sm:$0xff]  ;;  %v1207_v61 = vld [vmem:[%s2030_s1 + $0x3e8] sm:$0xff]  ;;  %v314_v8 = vld [vmem:[%s2030_s1] sm:$0xff] }
  0x2a   : > { %1244 = vmatpush.msra.mxu1 %v1098_v63  ;;  %370 = vmatpush.msra.mxu0 %v1098_v63  ;;  %v1600_v38 = vld [vmem:[#allocation2 + $0x10] sm:$0xff]  ;;  %v1149_v59 = vld [vmem:[%s2030_s1 + $0x218] sm:$0xff]  ;;  %v315_v3 = vld [vmem:[%s2030_s1 + $0x8] sm:$0xff] }
  0x2b   : > { %383 = vmatmul.f32.vlgmr.msra.gmra.mxu1 %v1421_v28  ;;  %371 = vmatmul.f32.vlgmr.msra.gmra.mxu0 %v330_v1  ;;  %v1642_v53 = vld [vmem:[#allocation2 + $0x22] sm:$0xff]  ;;  %v1189_v60 = vld [vmem:[%s2030_s1 + $0x358] sm:$0xff]  ;;  %v316_v62 = vld [vmem:[%s2030_s1 + $0x10] sm:$0xff] }
  0x2c   : > { %396 = vmatpush.msrb.mxu1 %v329_v4  ;;  %610 = vmatpush.msrb.mxu0 %v1161_v5  ;;  %v1644_v55 = vld [vmem:[#allocation2 + $0x20] sm:$0xff]  ;;  %v1148_v63 = vld [vmem:[%s2030_s1 + $0x210] sm:$0xff]  ;;  %v1147_v4 = vld [vmem:[%s2030_s1 + $0x208] sm:$0xff] }
  0x2d   : > { %477 = vmatpush.msra.mxu2 %v1114_v16  ;;  %549 = vmatpush.msra.mxu3 %v1132_v22  ;;  %v1188_v0 = vld [vmem:[%s2030_s1 + $0x350] sm:$0xff]  ;;  %v1206_v1 = vld [vmem:[%s2030_s1 + $0x3e0] sm:$0xff]  ;;  %v1177_v11 = vld [vmem:[%s2030_s1 + $0x2f8] sm:$0xff] }
  0x2e   : > { %397 = vmatpush.msrb.mxu1 %v328_v12  ;;  %611 = vmatpush.msrb.mxu0 %v1160_v13  ;;  %v1686_v5 = vld [vmem:[#allocation2 + $0x32] sm:$0xff]  ;;  %v1146_v9 = vld [vmem:[%s2030_s1 + $0x200] sm:$0xff]  ;;  %v1187_v12 = vld [vmem:[%s2030_s1 + $0x348] sm:$0xff] }
  0x2f   : > { %478 = vmatmul.f32.vlgmr.msra.gmra.mxu2 %v437_v21  ;;  %550 = vmatpush.msra.mxu3 %v1131_v30  ;;  %v1688_v7 = vld [vmem:[#allocation2 + $0x30] sm:$0xff]  ;;  %v1205_v13 = vld [vmem:[%s2030_s1 + $0x3d8] sm:$0xff]  ;;  %v1186_v18 = vld [vmem:[%s2030_s1 + $0x340] sm:$0xff] }
  0x30   : > { %398 = vmatpush.msrb.mxu1 %v327_v19  ;;  %612 = vmatpush.msrb.mxu0 %v1159_v20  ;;  %v1710_v16 = vld [vmem:[%s2030_s1 + $0x478] sm:$0xff]  ;;  %v1176_v17 = vld [vmem:[%s2030_s1 + $0x2f0] sm:$0xff]  ;;  %v1175_v21 = vld [vmem:[%s2030_s1 + $0x2e8] sm:$0xff] }
  0x31   : > { %759 = vmatpush.msrb.mxu2 %v1193_v29  ;;  %551 = vmatpush.msra.mxu3 %v1130_v34  ;;  %v1204_v19 = vld [vmem:[%s2030_s1 + $0x3d0] sm:$0xff]  ;;  %v1735_v22 = vld [vmem:[#allocation2 + $0x42] sm:$0xff] }
  0x32   : > { %399 = vmatpush.msrb.mxu1 %v326_v24  ;;  %613 = vmatpush.msrb.mxu0 %v1158_v25  ;;  %v1726_v20 = vld [vmem:[%s2030_s1 + $0x470] sm:$0xff]  ;;  %v1737_v24 = vld [vmem:[#allocation2 + $0x40] sm:$0xff]  ;;  %v1203_v29 = vld [vmem:[%s2030_s1 + $0x3c8] sm:$0xff] }
  0x33   : > { %386 = vmatmul.f32.gmra.mxu1 %v1462_v43  ;;  %374 = vmatmul.f32.gmra.mxu0 %v1484_v52  ;;  %v1174_v25 = vld [vmem:[%s2030_s1 + $0x2e0] sm:$0xff]  ;;  %v1183_v30 = vld [vmem:[%s2030_s1 + $0x328] sm:$0xff] }
  0x34   : > { %400 = vmatpush.msrb.mxu1 %v325_v26  ;;  %614 = vmatpush.msrb.mxu0 %v1157_v27  ;;  %v1184_v26 = vld [vmem:[%s2030_s1 + $0x330] sm:$0xff]  ;;  %v1173_v27 = vld [vmem:[%s2030_s1 + $0x2d8] sm:$0xff]  ;;  %v1202_v34 = vld [vmem:[%s2030_s1 + $0x3c0] sm:$0xff] }
  0x35   : > { %760 = vmatpush.msrb.mxu2 %v1192_v33  ;;  %552 = vmatmul.f32.vlgmr.msra.gmra.mxu3 %v1600_v38  ;;  %v1172_v33 = vld [vmem:[%s2030_s1 + $0x2d0] sm:$0xff] }
  0x36   : > { %401 = vmatpush.msrb.mxu1 %v324_v31  ;;  %615 = vmatpush.msrb.mxu0 %v1156_v32  ;;  %v1760_v31 = vld [vmem:[%s2030_s1 + $0x468] sm:$0xff]  ;;  %v244_v32 = vld [vmem:[%s1354_s13 + $0x38] sm:$0xff] }
  0x37   : > { %481 = vmatmul.f32.gmra.mxu2 %v1598_v37  ;;  %833 = vmatpush.msrb.mxu3 %v1209_v45  ;;  %v1181_v45 = vld [vmem:[%s2030_s1 + $0x318] sm:$0xff] }
  0x38   : > { %402 = vmatpush.msrb.mxu1 %v323_v35  ;;  %616 = vmatpush.msrb.mxu0 %v1155_v36  ;;  %v256_v35 = vmul.f32 %v1379_v14, %v244_v32  ;;  %v1182_v36 = vld [vmem:[%s2030_s1 + $0x320] sm:$0xff]  ;;  %v1201_v14 = vld [vmem:[%s2030_s1 + $0x3b8] sm:$0xff] }
  0x39   : > { %761 = vmatpush.msrb.mxu2 %v1191_v44  ;;  %834 = vmatpush.msrb.mxu3 %v1208_v49  ;;  %v1170_v44 = vld [vmem:[%s2030_s1 + $0x2c0] sm:$0xff]  ;;  %v1180_v49 = vld [vmem:[%s2030_s1 + $0x310] sm:$0xff] }
  0x3a   : > { %403 = vmatpush.msrb.mxu1 %v322_v39  ;;  %617 = vmatpush.msrb.mxu0 %v1154_v40  ;;  %v1171_v39 = vld [vmem:[%s2030_s1 + $0x2c8] sm:$0xff]  ;;  %v268_v40 = vadd.f32 %v1384_v15, %v256_v35  ;;  %v1169_v15 = vld [vmem:[%s2030_s1 + $0x2b8] sm:$0xff] }
  0x3b   : > { %389 = vmatmul.f32.gmra.mxu1 %v1489_v54  ;;  %377 = vmatmul.f32.gmra.mxu0 %v1520_v6 }
  0x3c   : > { %404 = vmatpush.msrb.mxu1 %v321_v41  ;;  %618 = vmatpush.msrb.mxu0 %v1153_v42  ;;  %v1788_v41 = vld [vmem:[#allocation2 + $0x52] sm:$0xff] }
  0x3d   : > { %762 = vmatpush.msrb.mxu2 %v1190_v48  ;;  %555 = vmatmul.f32.gmra.mxu3 %v1644_v55  ;;  %v1790_v42 = vld [vmem:[#allocation2 + $0x50] sm:$0xff]  ;;  %v1813_v48 = vld [vmem:[%s2030_s1 + $0x458] sm:$0xff] }
  0x3e   : > { %405 = vmatpush.msrb.mxu1 %v320_v46  ;;  %619 = vmatpush.msrb.mxu0 %v1152_v47  ;;  %v1799_v46 = vmax.f32 %v268_v40, 0.0  ;;  %v1200_v47 = vld [vmem:[%s2030_s1 + $0x3b0] sm:$0xff] }
  0x3f   : > { %484 = vmatmul.f32.gmra.mxu2 %v1642_v53  ;;  %835 = vmatpush.msrb.mxu3 %v1207_v61  ;;  %v1843_v61 = vld [vmem:[#allocation2 + $0x60] sm:$0xff] }
  0x40   : > { %406 = vmatpush.msrb.mxu1 %v319_v50  ;;  %620 = vmatpush.msrb.mxu0 %v1151_v51  ;;  %305 = vst [vmem:[#allocation2 + $0x81] sm:$0xff] %v1799_v46  ;;  %v1168_v50 = vld [vmem:[%s2030_s1 + $0x2b0] sm:$0xff]  ;;  %v1199_v51 = vld [vmem:[%s2030_s1 + $0x3a8] sm:$0xff] }
  0x41   : > { %763 = vmatpush.msrb.mxu2 %v1189_v60  ;;  %836 = vmatpush.msrb.mxu3 %v1206_v1  ;;  %v1841_v60 = vld [vmem:[#allocation2 + $0x62] sm:$0xff]  ;;  %v1197_v1 = vld [vmem:[%s2030_s1 + $0x398] sm:$0xff] }
  0x42   : > { %407 = vmatpush.msrb.mxu1 %v318_v56  ;;  %621 = vmatpush.msrb.mxu0 %v1150_v57  ;;  %v1829_v56 = vld [vmem:[%s2030_s1 + $0x450] sm:$0xff]  ;;  %v1179_v57 = vld [vmem:[%s2030_s1 + $0x308] sm:$0xff] }
  0x43   : > { %392 = vmatmul.f32.gmra.mxu1 %v1529_v10  ;;  %380 = vmatmul.f32.gmra.mxu0 %v1557_v23 }
  0x44   : > { %408 = vmatpush.msrb.mxu1 %v317_v58  ;;  %622 = vmatpush.msrb.mxu0 %v1149_v59  ;;  %v1167_v58 = vld [vmem:[%s2030_s1 + $0x2a8] sm:$0xff]  ;;  %v1198_v59 = vld [vmem:[%s2030_s1 + $0x3a0] sm:$0xff] }
  0x45   : > { %764 = vmatpush.msrb.mxu2 %v1188_v0  ;;  %558 = vmatmul.f32.gmra.mxu3 %v1688_v7  ;;  %v1178_v0 = vld [vmem:[%s2030_s1 + $0x300] sm:$0xff] }
  0x46   : > { %409 = vmatpush.msrb.mxu1 %v316_v62  ;;  %623 = vmatpush.msrb.mxu0 %v1148_v63  ;;  %v1219_v62 = vld [vmem:[%s2030_s1 + $0x448] sm:$0xff]  ;;  %v1166_v63 = vld [vmem:[%s2030_s1 + $0x2a0] sm:$0xff] }
  0x47   : > { %487 = vmatmul.f32.gmra.mxu2 %v1686_v5  ;;  %837 = vmatpush.msrb.mxu3 %v1205_v13  ;;  %v1880_v13 = vld [vmem:[#allocation2 + $0x72] sm:$0xff] }
  0x48   : > { %410 = vmatpush.msrb.mxu1 %v315_v3  ;;  %624 = vmatpush.msrb.mxu0 %v1147_v4  ;;  %v1218_v3 = vld [vmem:[%s2030_s1 + $0x440] sm:$0xff]  ;;  %v1165_v4 = vld [vmem:[%s2030_s1 + $0x298] sm:$0xff] }
  0x49   : > { %765 = vmatpush.msrb.mxu2 %v1187_v12  ;;  %838 = vmatpush.msrb.mxu3 %v1204_v19  ;;  %v1195_v12 = vld [vmem:[%s2030_s1 + $0x388] sm:$0xff] }
  0x4a   : > { %411 = vmatpush.msrb.mxu1 %v314_v8  ;;  %625 = vmatpush.msrb.mxu0 %v1146_v9  ;;  %v1196_v8 = vld [vmem:[%s2030_s1 + $0x390] sm:$0xff]  ;;  %v1217_v9 = vld [vmem:[%s2030_s1 + $0x438] sm:$0xff]  ;;  %v1163_v19 = vld [vmem:[%s2030_s1 + $0x288] sm:$0xff] }
  0x4b   : > { %412 = vmatmul.f32.vlgmr.msrb.gmra.mxu1 %v1280_v2  ;;  %626 = vmatmul.f32.vlgmr.msrb.gmra.mxu0 %v1484_v52  ;;  %v1185_v52 = vld [vmem:[%s2030_s1 + $0x338] sm:$0xff] }
  0x4c   : > { %684 = vmatpush.msra.mxu1 %v1177_v11  ;;  %907 = vmatpush.msra.mxu0 %v1710_v16  ;;  %v1164_v11 = vld [vmem:[%s2030_s1 + $0x290] sm:$0xff] }
  0x4d   : > { %766 = vmatpush.msrb.mxu2 %v1186_v18  ;;  %561 = vmatmul.f32.gmra.mxu3 %v1737_v24  ;;  %v1216_v18 = vld [vmem:[%s2030_s1 + $0x430] sm:$0xff] }
  0x4e   : > { %685 = vmatpush.msra.mxu1 %v1176_v17  ;;  %908 = vmatpush.msra.mxu0 %v1726_v20  ;;  %v1882_v17 = vld [vmem:[#allocation2 + $0x70] sm:$0xff] }
  0x4f   : > { %767 = vmatpush.msrb.mxu2 %v1185_v52  ;;  %839 = vmatpush.msrb.mxu3 %v1203_v29  ;;  %v1162_v52 = vld [vmem:[%s2030_s1 + $0x280] sm:$0xff]  ;;  %v1211_v29 = vld [vmem:[%s2030_s1 + $0x408] sm:$0xff] }
  0x50   : > { %686 = vmatpush.msra.mxu1 %v1175_v21  ;;  %490 = vmatmul.f32.gmra.mxu2 %v1735_v22  ;;  %v1215_v21 = vld [vmem:[%s2030_s1 + $0x428] sm:$0xff] }
  0x51   : > { %768 = vmatpush.msrb.mxu2 %v1184_v26  ;;  %909 = vmatpush.msra.mxu0 %v1760_v31  ;;  %v1213_v26 = vld [vmem:[%s2030_s1 + $0x418] sm:$0xff] }
  0x52   : > { %687 = vmatpush.msra.mxu1 %v1174_v25  ;;  %840 = vmatpush.msrb.mxu3 %v1202_v34  ;;  %v518_v25 = vld [vmem:[#allocation2 + $0x80] sm:$0xff] }
  0x53   : > { %415 = vmatmul.f32.gmra.mxu1 %v1600_v38  ;;  %629 = vmatmul.f32.gmra.mxu0 %v1520_v6  ;;  %v1778_v38 = vld [vmem:[%s2030_s1 + $0x460] sm:$0xff] }
  0x54   : > { %688 = vmatpush.msra.mxu1 %v1173_v27  ;;  %769 = vmatpush.msrb.mxu2 %v1183_v30  ;;  %v1212_v27 = vld [vmem:[%s2030_s1 + $0x410] sm:$0xff] }
  0x55   : > { %910 = vmatpush.msra.mxu0 %v1778_v38  ;;  %841 = vmatpush.msrb.mxu3 %v1201_v14 }
  0x56   : > { %689 = vmatpush.msra.mxu1 %v1172_v33  ;;  %770 = vmatpush.msrb.mxu2 %v1182_v36 }
  0x57   : > { %564 = vmatmul.f32.gmra.mxu3 %v1790_v42  ;;  %911 = vmatpush.msra.mxu0 %v1813_v48 }
  0x58   : > { %690 = vmatpush.msra.mxu1 %v1171_v39  ;;  %493 = vmatmul.f32.gmra.mxu2 %v1788_v41 }
  0x59   : > { %771 = vmatpush.msrb.mxu2 %v1181_v45  ;;  %842 = vmatpush.msrb.mxu3 %v1200_v47 }
  0x5a   : > { %691 = vmatpush.msra.mxu1 %v1170_v44  ;;  %912 = vmatpush.msra.mxu0 %v1829_v56 }
  0x5b   : > { %418 = vmatmul.f32.gmra.mxu1 %v1644_v55  ;;  %632 = vmatmul.f32.gmra.mxu0 %v1557_v23 }
  0x5c   : > { %692 = vmatpush.msra.mxu1 %v1169_v15  ;;  %772 = vmatpush.msrb.mxu2 %v1180_v49 }
  0x5d   : > { %843 = vmatpush.msrb.mxu3 %v1199_v51  ;;  %913 = vmatpush.msra.mxu0 %v1219_v62 }
  0x5e   : > { %693 = vmatpush.msra.mxu1 %v1168_v50  ;;  %773 = vmatpush.msrb.mxu2 %v1179_v57 }
  0x5f   : > { %844 = vmatpush.msrb.mxu3 %v1198_v59  ;;  %914 = vmatpush.msra.mxu0 %v1218_v3 }
  0x60   : > { %694 = vmatpush.msra.mxu1 %v1167_v58  ;;  %496 = vmatmul.f32.gmra.mxu2 %v1841_v60 }
  0x61   : > { %567 = vmatmul.f32.gmra.mxu3 %v1843_v61  ;;  %774 = vmatpush.msrb.mxu2 %v1178_v0 }
  0x62   : > { %695 = vmatpush.msra.mxu1 %v1166_v63  ;;  %845 = vmatpush.msrb.mxu3 %v1197_v1 }
  0x63   : > { %421 = vmatmul.f32.gmra.mxu1 %v1688_v7  ;;  %635 = vmatmul.f32.gmra.mxu0 %v1421_v28 }
  0x64   : > { %696 = vmatpush.msra.mxu1 %v1165_v4  ;;  %1245 = vmatpush.msra.mxu2 %v1710_v16  ;;  %v1194_v16 = vld [vmem:[%s2030_s1 + $0x380] sm:$0xff] }
  0x65   : > { %846 = vmatpush.msrb.mxu3 %v1196_v8  ;;  %915 = vmatpush.msra.mxu0 %v1217_v9 }
  0x66   : > { %697 = vmatpush.msra.mxu1 %v1164_v11  ;;  %1246 = vmatpush.msra.mxu2 %v1726_v20  ;;  %v1214_v20 = vld [vmem:[%s2030_s1 + $0x420] sm:$0xff] }
  0x67   : > { %847 = vmatpush.msrb.mxu3 %v1195_v12  ;;  %916 = vmatpush.msra.mxu0 %v1216_v18 }
  0x68   : > { %499 = vmatmul.f32.gmra.mxu2 %v1880_v13  ;;  %698 = vmatpush.msra.mxu1 %v1163_v19 }
  0x69   : > { %570 = vmatmul.f32.gmra.mxu3 %v1882_v17  ;;  %1247 = vmatpush.msra.mxu2 %v1760_v31 }
  0x6a   : > { %848 = vmatpush.msrb.mxu3 %v1194_v16  ;;  %917 = vmatpush.msra.mxu0 %v1215_v21 }
  0x6b   : > { %424 = vmatmul.f32.gmra.mxu1 %v1737_v24  ;;  %638 = vmatmul.f32.gmra.mxu0 %v1462_v43 }
  0x6c   : > { %699 = vmatpush.msra.mxu1 %v1162_v52  ;;  %1248 = vmatpush.msra.mxu2 %v1778_v38 }
  0x6d   : > { %918 = vmatpush.msra.mxu0 %v1214_v20 }
  0x6e   : > { %1249 = vmatpush.msra.mxu2 %v1813_v48 }
  0x6f   : > { %919 = vmatpush.msra.mxu0 %v1213_v26 }
  0x70   : > { %775 = vmatmul.f32.vlgmr.msrb.gmra.mxu2 %v1644_v55  ;;  %v1210_v55 = vld [vmem:[%s2030_s1 + $0x400] sm:$0xff] }
  0x71   : > { %573 = vmatmul.f32.gmra.mxu3 %v518_v25  ;;  %1250 = vmatpush.msra.mxu2 %v1829_v56 }
  0x72   : > { %920 = vmatpush.msra.mxu0 %v1212_v27 }
  0x73   : > { %427 = vmatmul.f32.gmra.mxu1 %v1790_v42  ;;  %641 = vmatmul.f32.gmra.mxu0 %v1489_v54 }
  0x74   : > { %1251 = vmatpush.msra.mxu2 %v1219_v62  ;;  %921 = vmatpush.msra.mxu0 %v1211_v29 }
  0x76   : > { %1252 = vmatpush.msra.mxu2 %v1218_v3  ;;  %922 = vmatpush.msra.mxu0 %v1210_v55 }
  0x78   : > { %1253 = vmatpush.msra.mxu2 %v1217_v9 }
  0x79   : > { %778 = vmatmul.f32.gmra.mxu2 %v1688_v7  ;;  %849 = vmatmul.f32.vlgmr.msrb.gmra.mxu3 %v1520_v6  ;;  %v815_v6 = vld [vmem:[#allocation2 + $0x91] sm:$0xff] }
  0x7a   : > { %1254 = vmatpush.msra.mxu2 %v1216_v18 }
  0x7b   : > { %430 = vmatmul.f32.gmra.mxu1 %v1843_v61  ;;  %644 = vmatmul.f32.gmra.mxu0 %v1529_v10 }
  0x7c   : > { %1255 = vmatpush.msra.mxu2 %v1215_v21 }
  0x7e   : > { %1256 = vmatpush.msra.mxu2 %v1214_v20 }
  0x80   : > { %1257 = vmatpush.msra.mxu2 %v1213_v26 }
  0x81   : > { %781 = vmatmul.f32.gmra.mxu2 %v1737_v24  ;;  %852 = vmatmul.f32.gmra.mxu3 %v1557_v23 }
  0x82   : > { %1258 = vmatpush.msra.mxu2 %v1212_v27 }
  0x83   : > { %433 = vmatmul.f32.gmra.mxu1 %v1882_v17  ;;  %647 = vmatmul.f32.gmra.mxu0 %v1799_v46 }
  0x84   : > { %1259 = vmatpush.msra.mxu2 %v1211_v29 }
  0x86   : > { %1260 = vmatpush.msra.mxu2 %v1210_v55 }
  0x89   : > { %784 = vmatmul.f32.gmra.mxu2 %v1790_v42  ;;  %855 = vmatmul.f32.gmra.mxu3 %v1421_v28 }
  0x8b   : > { %700 = vmatmul.f32.vlgmr.msra.gmra.mxu1 %v1598_v37  ;;  %923 = vmatmul.f32.vlgmr.msra.gmra.mxu0 %v1642_v53 }
  0x91   : > { %787 = vmatmul.f32.gmra.mxu2 %v1843_v61  ;;  %858 = vmatmul.f32.gmra.mxu3 %v1462_v43 }
  0x93   : > { %703 = vmatmul.f32.gmra.mxu1 %v1642_v53  ;;  %926 = vmatmul.f32.gmra.mxu0 %v1686_v5  ;;  %v889_v53 = vld [vmem:[#allocation2 + $0x92] sm:$0xff] }
  0x99   : > { %790 = vmatmul.f32.gmra.mxu2 %v1882_v17  ;;  %861 = vmatmul.f32.gmra.mxu3 %v1489_v54  ;;  %v888_v54 = vld [vmem:[#allocation2 + $0x82] sm:$0xff] }
  0x9b   : > { %706 = vmatmul.f32.gmra.mxu1 %v1686_v5  ;;  %929 = vmatmul.f32.gmra.mxu0 %v1735_v22 }
  0xa1   : > { %793 = vmatmul.f32.gmra.mxu2 %v518_v25  ;;  %864 = vmatmul.f32.gmra.mxu3 %v1529_v10 }
  0xa3   : > { %709 = vmatmul.f32.gmra.mxu1 %v1735_v22  ;;  %932 = vmatmul.f32.gmra.mxu0 %v1788_v41 }
  0xa8   : > { %v384_v28 = vpop.f32.mrf.mxu1  ;;  %v372_v43 = vpop.f32.mrf.mxu0 }
  0xa9   : > { %796 = vmatmul.f32.gmra.mxu2 %v1280_v2  ;;  %867 = vmatmul.f32.gmra.mxu3 %v1799_v46 }
  0xab   : > { %712 = vmatmul.f32.gmra.mxu1 %v1788_v41  ;;  %935 = vmatmul.f32.gmra.mxu0 %v1841_v60 }
  0xb0   : > { %v387_v23 = vpop.f32.mrf.mxu1  ;;  %v375_v37 = vpop.f32.mrf.mxu0 }
  0xb1   : > { %941 = vmatmul.f32.vlgmr.msra.gmra.mxu2 %v888_v54  ;;  %870 = vmatmul.f32.gmra.mxu3 %v815_v6 }
  0xb2   : > { %v479_v10 = vpop.f32.mrf.mxu2 }
  0xb3   : > { %715 = vmatmul.f32.gmra.mxu1 %v1841_v60  ;;  %938 = vmatmul.f32.gmra.mxu0 %v1880_v13 }
  0xb8   : > { %v390_v5 = vpop.f32.mrf.mxu1  ;;  %v378_v7 = vpop.f32.mrf.mxu0 }
  0xb9   : > { %944 = vmatmul.f32.gmra.mxu2 %v889_v53  ;;  %v553_v24 = vpop.f32.mrf.mxu3 }
  0xba   : > { %v482_v22 = vpop.f32.mrf.mxu2 }
  0xbb   : > { %718 = vmatmul.f32.gmra.mxu1 %v1880_v13 }
  0xc0   : > { %v393_v30 = vpop.f32.mrf.mxu1  ;;  %v381_v31 = vpop.f32.mrf.mxu0 }
  0xc1   : > { %v556_v33 = vpop.f32.mrf.mxu3 }
  0xc2   : > { %v485_v32 = vpop.f32.mrf.mxu2 }
  0xc3   : > { %721 = vmatmul.f32.gmra.mxu1 %v888_v54 }
  0xc8   : > { %v413_v34 = vpop.f32.mrf.mxu1  ;;  %v627_v35 = vpop.f32.mrf.mxu0 }
  0xc9   : > { %v414_v36 = vadd.f32 %v413_v34, %v372_v43  ;;  %v1965_v14 = vpop.f32.mrf.mxu3 }
  0xca   : > { %v488_v39 = vpop.f32.mrf.mxu2 }
  0xcb   : > { %v503_v38 = vadd.f32 %v479_v10, %v414_v36 }
  0xcd   : > { %v577_v27 = vadd.f32 %v553_v24, %v503_v38 }
  0xcf   : > { %v651_v43 = vadd.f32 %v627_v35, %v577_v27 }
  0xd0   : > { %v416_v40 = vpop.f32.mrf.mxu1  ;;  %v630_v41 = vpop.f32.mrf.mxu0 }
  0xd1   : > { %v417_v42 = vadd.f32 %v416_v40, %v375_v37  ;;  %v1967_v46 = vpop.f32.mrf.mxu3 }
  0xd3   : > { %v504_v44 = vadd.f32 %v482_v22, %v417_v42  ;;  %v491_v45 = vpop.f32.mrf.mxu2 }
  0xd5   : > { %v578_v37 = vadd.f32 %v556_v33, %v504_v44 }
  0xd8   : > { %v419_v15 = vpop.f32.mrf.mxu1  ;;  %v633_v47 = vpop.f32.mrf.mxu0 }
  0xd9   : > { %v420_v48 = vadd.f32 %v419_v15, %v378_v7  ;;  %v652_v7 = vadd.f32 %v630_v41, %v578_v37 }
  0xda   : > { %v1969_v2 = vpop.f32.mrf.mxu3 }
  0xdb   : > { %v505_v49 = vadd.f32 %v485_v32, %v420_v48  ;;  %v494_v50 = vpop.f32.mrf.mxu2 }
  0xdd   : > { %v579_v33 = vadd.f32 %v1965_v14, %v505_v49 }
  0xdf   : > { %v653_v38 = vadd.f32 %v633_v47, %v579_v33 }
  0xe0   : > { %v422_v51 = vpop.f32.mrf.mxu1  ;;  %v1971_v56 = vpop.f32.mrf.mxu0 }
  0xe1   : > { %v423_v57 = vadd.f32 %v422_v51, %v381_v31 }
  0xe3   : > { %v506_v58 = vadd.f32 %v488_v39, %v423_v57  ;;  %v497_v59 = vpop.f32.mrf.mxu2 }
  0xe4   : > { %v1973_v60 = vpop.f32.mrf.mxu3 }
  0xe8   : > { %v425_v61 = vpop.f32.mrf.mxu1  ;;  %v1975_v62 = vpop.f32.mrf.mxu0 }
  0xe9   : > { %v426_v63 = vadd.f32 %v425_v61, %v384_v28 }
  0xeb   : > { %v1977_v0 = vadd.f32 %v491_v45, %v426_v63  ;;  %v500_v1 = vpop.f32.mrf.mxu2 }
  0xec   : > { %v1979_v3 = vpop.f32.mrf.mxu3 }
  0xf0   : > { %v428_v4 = vpop.f32.mrf.mxu1  ;;  %v1981_v8 = vpop.f32.mrf.mxu0 }
  0xf1   : > { %v429_v9 = vadd.f32 %v428_v4, %v387_v23 }
  0xf3   : > { %v1983_v11 = vadd.f32 %v494_v50, %v429_v9  ;;  %v776_v12 = vpop.f32.mrf.mxu2  ;;  %v580_v50 = vadd.f32 %v1967_v46, %v506_v58 }
  0xf4   : > { %v1985_v13 = vpop.f32.mrf.mxu3 }
  0xf5   : > { %v654_v49 = vadd.f32 %v1971_v56, %v580_v50 }
  0xf8   : > { %v431_v17 = vpop.f32.mrf.mxu1  ;;  %v1987_v18 = vpop.f32.mrf.mxu0 }
  0xf9   : > { %v432_v19 = vadd.f32 %v431_v17, %v390_v5 }
  0xfb   : > { %v1989_v16 = vadd.f32 %v497_v59, %v432_v19 }
  0xfc   : > { %v779_v21 = vpop.f32.mrf.mxu2  ;;  %v850_v52 = vpop.f32.mrf.mxu3 }
 0x100   : > { %v434_v20 = vpop.f32.mrf.mxu1  ;;  %v1991_v25 = vpop.f32.mrf.mxu0 }
 0x101   : > { %v435_v26 = vadd.f32 %v434_v20, %v393_v30 }
 0x103   : > { %v1994_v29 = vadd.f32 %v500_v1, %v435_v26 }
 0x104   : > { %v782_v55 = vpop.f32.mrf.mxu2  ;;  %v853_v28 = vpop.f32.mrf.mxu3 }
 0x108   : > { %v701_v54 = vpop.f32.mrf.mxu1  ;;  %v924_v6 = vpop.f32.mrf.mxu0 }
 0x109   : > { %v725_v23 = vadd.f32 %v701_v54, %v651_v43  ;;  %v582_v43 = vadd.f32 %v1973_v60, %v1983_v11 }
 0x10b   : > { %v800_v10 = vadd.f32 %v776_v12, %v725_v23  ;;  %v581_v12 = vadd.f32 %v1969_v2, %v1977_v0  ;;  %v656_v23 = vadd.f32 %v1981_v8, %v582_v43 }
 0x10c   : > { %v785_v53 = vpop.f32.mrf.mxu2  ;;  %v856_v24 = vpop.f32.mrf.mxu3 }
 0x10d   : > { %v874_v5 = vadd.f32 %v850_v52, %v800_v10  ;;  %v655_v52 = vadd.f32 %v1975_v62, %v581_v12 }
 0x10f   : > { %v948_v22 = vadd.f32 %v924_v6, %v874_v5 }
 0x110   : > { %v704_v30 = vpop.f32.mrf.mxu1  ;;  %v927_v31 = vpop.f32.mrf.mxu0 }
 0x111   : > { %956 = vst [vmem:[%s1999_s19] sm:$0xff] %v948_v22  ;;  %v726_v32 = vadd.f32 %v704_v30, %v652_v7  ;;  %v979_v44 = vmul.f32 %v948_v22, %v948_v22 }
 0x113   : > { %v801_v34 = vadd.f32 %v779_v21, %v726_v32 }
 0x114   : > { %v788_v35 = vpop.f32.mrf.mxu2  ;;  %v859_v48 = vpop.f32.mrf.mxu3 }
 0x115   : > { %v875_v36 = vadd.f32 %v853_v28, %v801_v34 }
 0x117   : > { %v949_v39 = vadd.f32 %v927_v31, %v875_v36 }
 0x118   : > { %v707_v40 = vpop.f32.mrf.mxu1  ;;  %v930_v42 = vpop.f32.mrf.mxu0 }
 0x119   : > { %957 = vst [vmem:[%s1999_s19 + $0x8] sm:$0xff] %v949_v39  ;;  %v965_v41 = vadd.f32 %v949_v39, %v948_v22  ;;  %v980_v45 = vmul.f32 %v949_v39, %v949_v39  ;;  %v727_v15 = vadd.f32 %v707_v40, %v653_v38  ;;  %v583_v22 = vadd.f32 %v1979_v3, %v1989_v16 }
 0x11a   : > { %v584_v39 = vadd.f32 %v1985_v13, %v1994_v29 }
 0x11b   : > { %v987_v51 = vadd.f32 %v980_v45, %v979_v44  ;;  %v802_v57 = vadd.f32 %v782_v55, %v727_v15  ;;  %v657_v31 = vadd.f32 %v1987_v18, %v583_v22 }
 0x11c   : > { %v791_v59 = vpop.f32.mrf.mxu2  ;;  %v862_v46 = vpop.f32.mrf.mxu3 }
 0x11d   : > { %v876_v14 = vadd.f32 %v856_v24, %v802_v57 }
 0x11f   : > { %v950_v61 = vadd.f32 %v930_v42, %v876_v14  ;;  %v658_v42 = vadd.f32 %v1991_v25, %v584_v39 }
 0x120   : > { %v710_v47 = vpop.f32.mrf.mxu1  ;;  %v933_v63 = vpop.f32.mrf.mxu0 }
 0x121   : > { %958 = vst [vmem:[%s1999_s19 + $0x10] sm:$0xff] %v950_v61  ;;  %v966_v1 = vadd.f32 %v965_v41, %v950_v61  ;;  %v981_v4 = vmul.f32 %v950_v61, %v950_v61  ;;  %v728_v9 = vadd.f32 %v710_v47, %v654_v49 }
 0x123   : > { %v988_v17 = vadd.f32 %v987_v51, %v981_v4  ;;  %v803_v19 = vadd.f32 %v785_v53, %v728_v9 }
 0x124   : > { %v794_v21 = vpop.f32.mrf.mxu2  ;;  %v865_v6 = vpop.f32.mrf.mxu3 }
 0x125   : > { %v877_v58 = vadd.f32 %v859_v48, %v803_v19 }
 0x127   : > { %v951_v20 = vadd.f32 %v933_v63, %v877_v58 }
 0x128   : > { %v713_v56 = vpop.f32.mrf.mxu1  ;;  %v936_v28 = vpop.f32.mrf.mxu0 }
 0x129   : > { %959 = vst [vmem:[%s1999_s19 + $0x18] sm:$0xff] %v951_v20  ;;  %v967_v26 = vadd.f32 %v966_v1, %v951_v20  ;;  %v982_v27 = vmul.f32 %v951_v20, %v951_v20  ;;  %v729_v55 = vadd.f32 %v713_v56, %v655_v52 }
 0x12b   : > { %v989_v54 = vadd.f32 %v988_v17, %v982_v27  ;;  %v804_v2 = vadd.f32 %v788_v35, %v729_v55 }
 0x12c   : > { %v797_v10 = vpop.f32.mrf.mxu2  ;;  %v868_v33 = vpop.f32.mrf.mxu3 }
 0x12d   : > { %v878_v0 = vadd.f32 %v862_v46, %v804_v2 }
 0x12f   : > { %v952_v37 = vadd.f32 %v936_v28, %v878_v0 }
 0x130   : > { %v716_v62 = vpop.f32.mrf.mxu1  ;;  %v939_v60 = vpop.f32.mrf.mxu0 }
 0x131   : > { %960 = vst [vmem:[%s1999_s19 + $0x20] sm:$0xff] %v952_v37  ;;  %v968_v53 = vadd.f32 %v967_v26, %v952_v37  ;;  %v983_v5 = vmul.f32 %v952_v37, %v952_v37  ;;  %v730_v7 = vadd.f32 %v716_v62, %v656_v23 }
 0x133   : > { %v990_v24 = vadd.f32 %v989_v54, %v983_v5  ;;  %v805_v30 = vadd.f32 %v791_v59, %v730_v7 }
 0x134   : > { %v942_v38 = vpop.f32.mrf.mxu2  ;;  %v871_v48 = vpop.f32.mrf.mxu3 }
 0x135   : > { %v879_v11 = vadd.f32 %v865_v6, %v805_v30 }
 0x137   : > { %v953_v32 = vadd.f32 %v939_v60, %v879_v11 }
 0x138   : > { %v719_v8 = vpop.f32.mrf.mxu1 }
 0x139   : > { %961 = vst [vmem:[%s1999_s19 + $0x28] sm:$0xff] %v953_v32  ;;  %v969_v34 = vadd.f32 %v968_v53, %v953_v32  ;;  %v984_v35 = vmul.f32 %v953_v32, %v953_v32  ;;  %v731_v36 = vadd.f32 %v719_v8, %v657_v31 }
 0x13b   : > { %v991_v40 = vadd.f32 %v990_v24, %v984_v35  ;;  %v806_v3 = vadd.f32 %v794_v21, %v731_v36 }
 0x13c   : > { %v945_v57 = vpop.f32.mrf.mxu2 }
 0x13d   : > { %v880_v16 = vadd.f32 %v868_v33, %v806_v3 }
 0x13f   : > { %v954_v44 = vadd.f32 %v942_v38, %v880_v16 }
 0x140   : > { %v722_v18 = vpop.f32.mrf.mxu1 }
 0x141   : > { %962 = vst [vmem:[%s1999_s19 + $0x30] sm:$0xff] %v954_v44  ;;  %v970_v41 = vadd.f32 %v969_v34, %v954_v44  ;;  %v985_v45 = vmul.f32 %v954_v44, %v954_v44  ;;  %v732_v15 = vadd.f32 %v722_v18, %v658_v42 }
 0x143   : > { %v992_v50 = vadd.f32 %v991_v40, %v985_v45  ;;  %v807_v51 = vadd.f32 %v797_v10, %v732_v15 }
 0x145   : > { %v881_v59 = vadd.f32 %v871_v48, %v807_v51 }
 0x147   : > { %v955_v14 = vadd.f32 %v945_v57, %v881_v59 }
 0x149   : > { %963 = vst [vmem:[%s1999_s19 + $0x38] sm:$0xff] %v955_v14  ;;  %v971_v13 = vadd.f32 %v970_v41, %v955_v14  ;;  %v986_v29 = vmul.f32 %v955_v14, %v955_v14 }
 0x14b   : > { %v972_v49 = vrot.slane %v971_v13, 4  ;;  %v993_v61 = vadd.f32 %v992_v50, %v986_v29 }
 0x14d   : > { %v973_v25 = vadd.f32 %v972_v49, %v971_v13  ;;  %v994_v47 = vrot.slane %v993_v61, 4 }
 0x14f   : > { %v974_v63 = vrot.slane %v973_v25, 2  ;;  %v995_v1 = vadd.f32 %v994_v47, %v993_v61 }
 0x151   : > { %v975_v4 = vadd.f32 %v974_v63, %v973_v25  ;;  %v996_v9 = vrot.slane %v995_v1, 2 }
 0x153   : > { %v976_v12 = vrot.slane %v975_v4, 1  ;;  %v997_v17 = vadd.f32 %v996_v9, %v995_v1 }
 0x155   : > { %v977_v19 = vadd.f32 %v976_v12, %v975_v4  ;;  %v998_v46 = vrot.slane %v997_v17, 1 }
 0x157   : > { %978 = vst [vmem:[%s1961_s20] sm:$0x1] %v977_v19  ;;  %v999_v58 = vadd.f32 %v998_v46, %v997_v17 }
 0x159   : > { %1000 = vst [vmem:[%s1961_s20 + $0x1] sm:$0x1] %v999_v58 }
 0x15a PF: > { %s16_s18 = sadd.s32 1, %s1278_s18  }
 0x15b   : > { %p13_p5 = scmp.ge.s32.totalorder %s16_s18, 4  }
 0x15d   :  { %15 = sbr.rel (!%p13_p5) target bundleno = 1 (0x1), region = 88 }

// kernel: _res_sep_conv_impl.4
= control target key start
LH: loop header
LB: loop body
LE: loop exit
PB: predicated region body
PF: predicated region fallthrough
CT: control target
= control target key end

     0   :  { %s1420_s18 = smov 0   ;;  %s2192_s0 = inlined_call_operand.vmem [shape: f32[8,8,8,128], index: 0, kind: input, shape index: {}]   ;;  %s2193_s1 = inlined_call_operand.vmem [shape: f32[9,128,128], index: 1, kind: input, shape index: {}]   ;;  %s2194_s2 = inlined_call_operand.vmem [shape: f32[1,128], index: 2, kind: input, shape index: {}]   ;;  %s2195_s3 = inlined_call_operand.vmem [shape: f32[1,128], index: 3, kind: input, shape index: {}]   ;;  %s2196_s4 = inlined_call_operand.vmem [shape: f32[128,128], index: 4, kind: output, shape index: {0}]   ;;  %s2197_s5 = inlined_call_operand.vmem [shape: f32[16,128], index: 5, kind: output, shape index: {1}]  }
   0x1 LB: > { %s1426_s2 = sadd.s32 4294967295, %s1387_s18   ;;  %p1201_p0 = scmp.ge.s32.totalorder %s1387_s18, 1  ;;  %s1387_s18 = sphi %s1420_s18, %s16_s18  }
   0x2   : > { %p192_p1 = scmp.lt.s32.totalorder %s1387_s18, 3 }
   0x4   : > { %p193_p2 = pnand %p1201_p0, %p192_p1 }
   0x5   : > { %s1202_s22 = sshll.u32 (!%p193_p2), %s1426_s2, 2  ;;  %p238_p4 = scmp.lt.s32.totalorder (!%p193_p2), %s1426_s2, 1 }
   0x6   : > { %196 = sbr.rel (%p193_p2) target bundleno = 351 (0x15f), region = 36  ;;  %p226_p3 = scmp.lt.s32.totalorder (!%p193_p2), %s1202_s22, 7 }
   0x7   : > { %s1205_s26 = sshll.u32 (!%p193_p2), %s1426_s2, 3 }
   0x8   : > { %p233_p5 = scmp.lt.s32.totalorder (!%p193_p2), %s1205_s26, 15 }
   0xb   : > { %v1223_v0 = vld [vmem:[%s2193_s1 + $0xf8] sm:$0xff]  ;;  %v1222_v1 = vld [vmem:[%s2193_s1 + $0xf0] sm:$0xff]  ;;  %v1389_v2 = vmov 0.0   ;;  %v1221_v3 = vld [vmem:[%s2193_s1 + $0xe8] sm:$0xff]  ;;  %s2199_s22 = smov (!%p226_p3, %s1202_s22), 7  ;;  %s2201_s26 = smov (!%p233_p5, %s1205_s26), 15 }
   0xc   : > { %1339 = vmatpush.msra.mxu1 %v1223_v0  ;;  %462 = vmatpush.msra.mxu0 %v1223_v0  ;;  %350 = vst [vmem:[#allocation2 + $0x160] sm:$0xff] %v1389_v2  ;;  %v1239_v4 = vld [vmem:[%s2193_s1 + $0x178] sm:$0xff]  ;;  %v1238_v5 = vld [vmem:[%s2193_s1 + $0x170] sm:$0xff]  ;;  %v1220_v6 = vld [vmem:[%s2193_s1 + $0xe0] sm:$0xff]  ;;  %s1338_s8 = sshll.u32 %s2199_s22, 6  ;;  %s1206_s27 = sshll.u32 %s2201_s26, 3 }
   0xd   : > { %351 = vst [vmem:[#allocation2 + $0x168] sm:$0x1] %v1389_v2  ;;  %569 = vmatpush.msra.mxu2 %v1239_v4  ;;  %v1237_v7 = vld [vmem:[%s2193_s1 + $0x168] sm:$0xff]  ;;  %v1219_v8 = vld [vmem:[%s2193_s1 + $0xd8] sm:$0xff]  ;;  %s1461_s13 = scalar_lea.vmem %s2192_s0, %s1338_s8  ;;  %v1236_v9 = vld [vmem:[%s2193_s1 + $0x160] sm:$0xff]  ;;  %s2160_s29 = scalar_lea.vmem %s2196_s4, %s1206_s27 }
   0xe   : > { %1340 = vmatpush.msra.mxu1 %v1222_v1  ;;  %463 = vmatpush.msra.mxu0 %v1222_v1  ;;  %306 = vst [vmem:[#allocation2] sm:$0xff] %v1389_v2  ;;  %v1218_v10 = vld [vmem:[%s2193_s1 + $0xd0] sm:$0xff]  ;;  %v1255_v11 = vld [vmem:[%s2193_s1 + $0x1f8] sm:$0xff]  ;;  %v1217_v15 = vld [vmem:[%s2193_s1 + $0xc8] sm:$0xff] }
   0xf   : > { %570 = vmatpush.msra.mxu2 %v1238_v5  ;;  %v1473_v12 = vld [vmem:[%s1461_s13 + $0x98] sm:$0xff]  ;;  %644 = vmatpush.msra.mxu3 %v1255_v11  ;;  %v1234_v16 = vld [vmem:[%s2193_s1 + $0x150] sm:$0xff]  ;;  %v1216_v17 = vld [vmem:[%s2193_s1 + $0xc0] sm:$0xff]  ;;  %326 = vst [vmem:[#allocation2 + $0xa0] sm:$0xff] %v1389_v2 }
  0x10   : > { %1341 = vmatpush.msra.mxu1 %v1221_v3  ;;  %464 = vmatpush.msra.mxu0 %v1221_v3  ;;  %v1235_v13 = vld [vmem:[%s2193_s1 + $0x158] sm:$0xff]  ;;  %v293_v14 = vmax.f32 %v1473_v12, 0.0  ;;  %v1233_v18 = vld [vmem:[%s2193_s1 + $0x148] sm:$0xff]  ;;  %v1232_v20 = vld [vmem:[%s2193_s1 + $0x140] sm:$0xff]  ;;  %328 = vst [vmem:[#allocation2 + $0xb0] sm:$0xff] %v1389_v2 }
  0x11   : > { %571 = vmatpush.msra.mxu2 %v1237_v7  ;;  %v1215_v19 = vld [vmem:[%s2193_s1 + $0xb8] sm:$0xff]  ;;  %v1214_v21 = vld [vmem:[%s2193_s1 + $0xb0] sm:$0xff]  ;;  %v1213_v24 = vld [vmem:[%s2193_s1 + $0xa8] sm:$0xff]  ;;  %330 = vst [vmem:[#allocation2 + $0xc0] sm:$0xff] %v1389_v2 }
  0x12   : > { %1342 = vmatpush.msra.mxu1 %v1220_v6  ;;  %465 = vmatpush.msra.mxu0 %v1220_v6  ;;  %398 = vst [vmem:[#allocation2 + $0x161] sm:$0xff] %v293_v14  ;;  %v1231_v22 = vld [vmem:[%s2193_s1 + $0x138] sm:$0xff]  ;;  %v1254_v23 = vld [vmem:[%s2193_s1 + $0x1f0] sm:$0xff]  ;;  %v1253_v26 = vld [vmem:[%s2193_s1 + $0x1e8] sm:$0xff] }
  0x13   : > { %572 = vmatpush.msra.mxu2 %v1236_v9  ;;  %645 = vmatpush.msra.mxu3 %v1254_v23  ;;  %v1230_v25 = vld [vmem:[%s2193_s1 + $0x130] sm:$0xff]  ;;  %v1212_v27 = vld [vmem:[%s2193_s1 + $0xa0] sm:$0xff]  ;;  %v1229_v28 = vld [vmem:[%s2193_s1 + $0x128] sm:$0xff]  ;;  %332 = vst [vmem:[#allocation2 + $0xd0] sm:$0xff] %v1389_v2 }
  0x14   : > { %1343 = vmatpush.msra.mxu1 %v1219_v8  ;;  %466 = vmatpush.msra.mxu0 %v1219_v8  ;;  %v1252_v29 = vld [vmem:[%s2193_s1 + $0x1e0] sm:$0xff]  ;;  %v1211_v30 = vld [vmem:[%s2193_s1 + $0x98] sm:$0xff]  ;;  %v1210_v33 = vld [vmem:[%s2193_s1 + $0x90] sm:$0xff]  ;;  %334 = vst [vmem:[#allocation2 + $0xe0] sm:$0xff] %v1389_v2 }
  0x15   : > { %573 = vmatpush.msra.mxu2 %v1235_v13  ;;  %646 = vmatpush.msra.mxu3 %v1253_v26  ;;  %v1228_v31 = vld [vmem:[%s2193_s1 + $0x120] sm:$0xff]  ;;  %v1251_v32 = vld [vmem:[%s2193_s1 + $0x1d8] sm:$0xff]  ;;  %v1250_v35 = vld [vmem:[%s2193_s1 + $0x1d0] sm:$0xff]  ;;  %336 = vst [vmem:[#allocation2 + $0xf0] sm:$0xff] %v1389_v2 }
  0x16   : > { %1344 = vmatpush.msra.mxu1 %v1218_v10  ;;  %467 = vmatpush.msra.mxu0 %v1218_v10  ;;  %v1227_v34 = vld [vmem:[%s2193_s1 + $0x118] sm:$0xff]  ;;  %v1209_v36 = vld [vmem:[%s2193_s1 + $0x88] sm:$0xff]  ;;  %v1226_v37 = vld [vmem:[%s2193_s1 + $0x110] sm:$0xff]  ;;  %338 = vst [vmem:[#allocation2 + $0x100] sm:$0xff] %v1389_v2 }
  0x17   : > { %574 = vmatpush.msra.mxu2 %v1234_v16  ;;  %647 = vmatpush.msra.mxu3 %v1252_v29  ;;  %v1249_v38 = vld [vmem:[%s2193_s1 + $0x1c8] sm:$0xff]  ;;  %v1208_v39 = vld [vmem:[%s2193_s1 + $0x80] sm:$0xff]  ;;  %v1271_v40 = vld [vmem:[%s2193_s1 + $0x278] sm:$0xff]  ;;  %340 = vst [vmem:[#allocation2 + $0x110] sm:$0xff] %v1389_v2 }
  0x18   : > { %1345 = vmatpush.msra.mxu1 %v1217_v15  ;;  %468 = vmatpush.msra.mxu0 %v1217_v15  ;;  %v1248_v41 = vld [vmem:[%s2193_s1 + $0x1c0] sm:$0xff]  ;;  %v435_v42 = vld [vmem:[%s2193_s1 + $0x78] sm:$0xff]  ;;  %v1225_v43 = vld [vmem:[%s2193_s1 + $0x108] sm:$0xff]  ;;  %342 = vst [vmem:[#allocation2 + $0x120] sm:$0xff] %v1389_v2 }
  0x19   : > { %575 = vmatpush.msra.mxu2 %v1233_v18  ;;  %648 = vmatpush.msra.mxu3 %v1251_v32  ;;  %v1270_v44 = vld [vmem:[%s2193_s1 + $0x270] sm:$0xff]  ;;  %v1247_v45 = vld [vmem:[%s2193_s1 + $0x1b8] sm:$0xff]  ;;  %v1224_v47 = vld [vmem:[%s2193_s1 + $0x100] sm:$0xff]  ;;  %343 = vst [vmem:[#allocation2 + $0x128] sm:$0x1] %v1389_v2 }
  0x1a   : > { %1346 = vmatpush.msra.mxu1 %v1216_v17  ;;  %469 = vmatpush.msra.mxu0 %v1216_v17  ;;  %v434_v46 = vld [vmem:[%s2193_s1 + $0x70] sm:$0xff]  ;;  %v1588_v48 = vld [vmem:[%s1461_s13 + $0xa0] sm:$0xff]  ;;  %v1269_v49 = vld [vmem:[%s2193_s1 + $0x268] sm:$0xff]  ;;  %360 = vst [vmem:[#allocation2 + $0x1b0] sm:$0xff] %v1389_v2 }
  0x1b   : > { %576 = vmatpush.msra.mxu2 %v1232_v20  ;;  %649 = vmatpush.msra.mxu3 %v1250_v35  ;;  %v1246_v50 = vld [vmem:[%s2193_s1 + $0x1b0] sm:$0xff]  ;;  %v433_v51 = vld [vmem:[%s2193_s1 + $0x68] sm:$0xff]  ;;  %v1268_v52 = vld [vmem:[%s2193_s1 + $0x260] sm:$0xff]  ;;  %v294_v55 = vmax.f32 %v1588_v48, 0.0  ;;  %361 = vst [vmem:[#allocation2 + $0x1b8] sm:$0x1] %v1389_v2 }
  0x1c   : > { %1347 = vmatpush.msra.mxu1 %v1215_v19  ;;  %470 = vmatpush.msra.mxu0 %v1215_v19  ;;  %v1245_v53 = vld [vmem:[%s2193_s1 + $0x1a8] sm:$0xff]  ;;  %v432_v54 = vld [vmem:[%s2193_s1 + $0x60] sm:$0xff]  ;;  %v1267_v56 = vld [vmem:[%s2193_s1 + $0x258] sm:$0xff]  ;;  %362 = vst [vmem:[#allocation2 + $0x1c0] sm:$0xff] %v1389_v2 }
  0x1d   : > { %577 = vmatpush.msra.mxu2 %v1231_v22  ;;  %650 = vmatpush.msra.mxu3 %v1249_v38  ;;  %v431_v57 = vld [vmem:[%s2193_s1 + $0x58] sm:$0xff]  ;;  %v1244_v58 = vld [vmem:[%s2193_s1 + $0x1a0] sm:$0xff]  ;;  %v1266_v59 = vld [vmem:[%s2193_s1 + $0x250] sm:$0xff]  ;;  %364 = vst [vmem:[#allocation2 + $0x1d0] sm:$0xff] %v1389_v2 }
  0x1e   : > { %1348 = vmatpush.msra.mxu1 %v1214_v21  ;;  %471 = vmatpush.msra.mxu0 %v1214_v21  ;;  %v430_v60 = vld [vmem:[%s2193_s1 + $0x50] sm:$0xff]  ;;  %v1243_v61 = vld [vmem:[%s2193_s1 + $0x198] sm:$0xff]  ;;  %v1635_v62 = vld [vmem:[%s1461_s13 + $0xa8] sm:$0xff]  ;;  %366 = vst [vmem:[#allocation2 + $0x1e0] sm:$0xff] %v1389_v2 }
  0x1f   : > { %578 = vmatpush.msra.mxu2 %v1230_v25  ;;  %651 = vmatpush.msra.mxu3 %v1248_v41  ;;  %v1265_v63 = vld [vmem:[%s2193_s1 + $0x248] sm:$0xff]  ;;  %v1264_v1 = vld [vmem:[%s2193_s1 + $0x240] sm:$0xff]  ;;  %v1242_v3 = vld [vmem:[%s2193_s1 + $0x190] sm:$0xff]  ;;  %v295_v5 = vmax.f32 %v1635_v62, 0.0  ;;  %368 = vst [vmem:[#allocation2 + $0x1f0] sm:$0xff] %v1389_v2 }
  0x20   : > { %1349 = vmatpush.msra.mxu1 %v1213_v24  ;;  %472 = vmatpush.msra.mxu0 %v1213_v24  ;;  %v429_v0 = vld [vmem:[%s2193_s1 + $0x48] sm:$0xff]  ;;  %v428_v4 = vld [vmem:[%s2193_s1 + $0x40] sm:$0xff]  ;;  %v1303_v6 = vld [vmem:[%s2193_s1 + $0x378] sm:$0xff]  ;;  %370 = vst [vmem:[#allocation2 + $0x200] sm:$0xff] %v1389_v2 }
  0x21   : > { %579 = vmatpush.msra.mxu2 %v1229_v28  ;;  %652 = vmatpush.msra.mxu3 %v1247_v45  ;;  %v1302_v7 = vld [vmem:[%s2193_s1 + $0x370] sm:$0xff]  ;;  %v1263_v8 = vld [vmem:[%s2193_s1 + $0x238] sm:$0xff]  ;;  %v1301_v10 = vld [vmem:[%s2193_s1 + $0x368] sm:$0xff]  ;;  %372 = vst [vmem:[#allocation2 + $0x210] sm:$0xff] %v1389_v2 }
  0x22   : > { %1350 = vmatpush.msra.mxu1 %v1212_v27  ;;  %473 = vmatpush.msra.mxu0 %v1212_v27  ;;  %v427_v9 = vld [vmem:[%s2193_s1 + $0x38] sm:$0xff]  ;;  %v1262_v11 = vld [vmem:[%s2193_s1 + $0x230] sm:$0xff]  ;;  %v437_v12 = vld [vmem:[#allocation2 + $0x121] sm:$0xff]  ;;  %374 = vst [vmem:[#allocation2 + $0x220] sm:$0xff] %v1389_v2 }
  0x23   : > { %580 = vmatpush.msra.mxu2 %v1228_v31  ;;  %653 = vmatpush.msra.mxu3 %v1246_v50  ;;  %v426_v13 = vld [vmem:[%s2193_s1 + $0x30] sm:$0xff]  ;;  %v1261_v16 = vld [vmem:[%s2193_s1 + $0x228] sm:$0xff]  ;;  %v1300_v17 = vld [vmem:[%s2193_s1 + $0x360] sm:$0xff]  ;;  %376 = vst [vmem:[#allocation2 + $0x230] sm:$0xff] %v1389_v2 }
  0x24   : > { %1351 = vmatpush.msra.mxu1 %v1211_v30  ;;  %474 = vmatpush.msra.mxu0 %v1211_v30  ;;  %v1680_v15 = vld [vmem:[%s1461_s13 + $0xb0] sm:$0xff]  ;;  %v1689_v18 = vld [vmem:[%s1461_s13 + $0x80] sm:$0xff]  ;;  %v425_v19 = vld [vmem:[%s2193_s1 + $0x28] sm:$0xff] }
  0x25   : > { %581 = vmatpush.msra.mxu2 %v1227_v34  ;;  %654 = vmatpush.msra.mxu3 %v1245_v53  ;;  %v1240_v20 = vld [vmem:[%s2193_s1 + $0x180] sm:$0xff]  ;;  %v296_v23 = vmax.f32 %v1680_v15, 0.0  ;;  %v290_v24 = vmax.f32 %v1689_v18, 0.0  ;;  %v423_v25 = vld [vmem:[%s2193_s1 + $0x18] sm:$0xff]  ;;  %v1710_v26 = vld [vmem:[%s1461_s13 + $0x88] sm:$0xff] }
  0x26   : > { %1352 = vmatpush.msra.mxu1 %v1210_v33  ;;  %475 = vmatpush.msra.mxu0 %v1210_v33  ;;  %v1260_v21 = vld [vmem:[%s2193_s1 + $0x220] sm:$0xff]  ;;  %v422_v27 = vld [vmem:[%s2193_s1 + $0x10] sm:$0xff]  ;;  %v421_v28 = vld [vmem:[%s2193_s1 + $0x8] sm:$0xff] }
  0x27   : > { %582 = vmatpush.msra.mxu2 %v1226_v37  ;;  %655 = vmatpush.msra.mxu3 %v1244_v58  ;;  %v424_v22 = vld [vmem:[%s2193_s1 + $0x20] sm:$0xff]  ;;  %v1319_v29 = vld [vmem:[%s2193_s1 + $0x3f8] sm:$0xff]  ;;  %v1258_v32 = vld [vmem:[%s2193_s1 + $0x210] sm:$0xff]  ;;  %v291_v37 = vmax.f32 %v1710_v26, 0.0 }
  0x28   : > { %1353 = vmatpush.msra.mxu1 %v1209_v36  ;;  %476 = vmatpush.msra.mxu0 %v1209_v36  ;;  %v1259_v30 = vld [vmem:[%s2193_s1 + $0x218] sm:$0xff]  ;;  %v1318_v33 = vld [vmem:[%s2193_s1 + $0x3f0] sm:$0xff]  ;;  %v1257_v34 = vld [vmem:[%s2193_s1 + $0x208] sm:$0xff] }
  0x29   : > { %583 = vmatpush.msra.mxu2 %v1225_v43  ;;  %656 = vmatpush.msra.mxu3 %v1243_v61  ;;  %v1299_v31 = vld [vmem:[%s2193_s1 + $0x358] sm:$0xff]  ;;  %v1298_v35 = vld [vmem:[%s2193_s1 + $0x350] sm:$0xff]  ;;  %v420_v36 = vld [vmem:[%s2193_s1] sm:$0xff] }
  0x2a   : > { %1354 = vmatpush.msra.mxu1 %v1208_v39  ;;  %477 = vmatpush.msra.mxu0 %v1208_v39  ;;  %v1256_v38 = vld [vmem:[%s2193_s1 + $0x200] sm:$0xff]  ;;  %v1287_v39 = vld [vmem:[%s2193_s1 + $0x2f8] sm:$0xff]  ;;  %v1317_v43 = vld [vmem:[%s2193_s1 + $0x3e8] sm:$0xff] }
  0x2b   : > { %490 = vmatmul.f32.vlgmr.msra.gmra.mxu1 %v293_v14  ;;  %584 = vmatpush.msra.mxu2 %v1224_v47  ;;  %v1241_v14 = vld [vmem:[%s2193_s1 + $0x188] sm:$0xff]  ;;  %v266_v41 = vld [vmem:[%s1461_s13 + $0xc0] sm:$0xff]  ;;  %v1773_v45 = vld [vmem:[%s1461_s13 + $0x90] sm:$0xff] }
  0x2c   : > { %718 = vmatpush.msrb.mxu0 %v1271_v40  ;;  %503 = vmatpush.msrb.mxu1 %v435_v42  ;;  %v544_v40 = vld [vmem:[#allocation2 + $0x1b1] sm:$0xff]  ;;  %v1296_v47 = vld [vmem:[%s2193_s1 + $0x340] sm:$0xff]  ;;  %v1785_v50 = vmax.f32 %v266_v41, 0.0 }
  0x2d   : > { %867 = vmatpush.msrb.mxu2 %v1303_v6  ;;  %657 = vmatpush.msra.mxu3 %v1242_v3  ;;  %v1286_v42 = vld [vmem:[%s2193_s1 + $0x2f0] sm:$0xff]  ;;  %v1794_v53 = vld [vmem:[%s1461_s13 + $0x40] sm:$0xff]  ;;  %v1283_v58 = vld [vmem:[%s2193_s1 + $0x2d8] sm:$0xff] }
  0x2e   : > { %719 = vmatpush.msrb.mxu0 %v1270_v44  ;;  %504 = vmatpush.msrb.mxu1 %v434_v46  ;;  %v1297_v44 = vld [vmem:[%s2193_s1 + $0x348] sm:$0xff]  ;;  %v1316_v46 = vld [vmem:[%s2193_s1 + $0x3e0] sm:$0xff]  ;;  %v1282_v61 = vld [vmem:[%s2193_s1 + $0x2d0] sm:$0xff]  ;;  %403 = vst [vmem:[#allocation2 + $0x1c1] sm:$0xff] %v1785_v50 }
  0x2f   : > { %868 = vmatpush.msrb.mxu2 %v1302_v7  ;;  %478 = vmatmul.f32.vlgmr.msra.gmra.mxu0 %v437_v12  ;;  %v1834_v7 = vld [vmem:[%s1461_s13 + $0x50] sm:$0xff]  ;;  %v1311_v41 = vld [vmem:[%s2193_s1 + $0x3b8] sm:$0xff]  ;;  %v920_v26 = vld [vmem:[#allocation2 + $0x161] sm:$0xff] }
  0x30   : > { %720 = vmatpush.msrb.mxu0 %v1269_v49  ;;  %505 = vmatpush.msrb.mxu1 %v433_v51  ;;  %v1285_v49 = vld [vmem:[%s2193_s1 + $0x2e8] sm:$0xff]  ;;  %v292_v51 = vmax.f32 %v1773_v45, 0.0  ;;  %v1850_v12 = vld [vmem:[%s2193_s1 + $0x470] sm:$0xff]  ;;  %v265_v18 = vld [vmem:[%s1461_s13 + $0xb8] sm:$0xff] }
  0x31   : > { %869 = vmatpush.msrb.mxu2 %v1301_v10  ;;  %658 = vmatpush.msra.mxu3 %v1241_v14  ;;  %v1839_v10 = vld [vmem:[%s1461_s13 + $0x58] sm:$0xff]  ;;  %v284_v14 = vmax.f32 %v1834_v7, 0.0  ;;  %v1380_v15 = vld [vmem:[#allocation2] sm:$0xff] }
  0x32   : > { %721 = vmatpush.msrb.mxu0 %v1268_v52  ;;  %506 = vmatpush.msrb.mxu1 %v432_v54  ;;  %v1284_v52 = vld [vmem:[%s2193_s1 + $0x2e0] sm:$0xff]  ;;  %v267_v54 = vld [vmem:[%s1461_s13 + $0xc8] sm:$0xff] }
  0x33   : > { %493 = vmatmul.f32.gmra.mxu1 %v294_v55  ;;  %870 = vmatpush.msrb.mxu2 %v1300_v17  ;;  %v1829_v3 = vmax.f32 %v267_v54, 0.0  ;;  %v1312_v17 = vld [vmem:[%s2193_s1 + $0x3c0] sm:$0xff]  ;;  %389 = vst [vmem:[#allocation2 + $0xc1] sm:$0xff] %v284_v14  ;;  %v1278_v54 = vld [vmem:[%s2193_s1 + $0x2b0] sm:$0xff] }
  0x34   : > { %722 = vmatpush.msrb.mxu0 %v1267_v56  ;;  %507 = vmatpush.msrb.mxu1 %v431_v57  ;;  %v242_v56 = vld [vmem:[%s1461_s13] sm:$0xff]  ;;  %v1315_v57 = vld [vmem:[%s2193_s1 + $0x3d8] sm:$0xff] }
  0x35   : > { %659 = vmatpush.msra.mxu3 %v1240_v20  ;;  %871 = vmatpush.msrb.mxu2 %v1299_v31  ;;  %404 = vst [vmem:[#allocation2 + $0x1d1] sm:$0xff] %v1829_v3  ;;  %v1887_v31 = vld [vmem:[#allocation2 + $0x1c0] sm:$0xff] }
  0x36   : > { %723 = vmatpush.msrb.mxu0 %v1266_v59  ;;  %508 = vmatpush.msrb.mxu1 %v430_v60  ;;  %v1314_v59 = vld [vmem:[%s2193_s1 + $0x3d0] sm:$0xff]  ;;  %v1816_v60 = vld [vmem:[%s2193_s1 + $0x478] sm:$0xff] }
  0x37   : > { %481 = vmatmul.f32.gmra.mxu0 %v290_v24  ;;  %942 = vmatpush.msrb.mxu3 %v1319_v29  ;;  %v244_v29 = vld [vmem:[%s1461_s13 + $0x10] sm:$0xff] }
  0x38   : > { %724 = vmatpush.msrb.mxu0 %v1265_v63  ;;  %509 = vmatpush.msrb.mxu1 %v429_v0  ;;  %v1294_v63 = vld [vmem:[%s2193_s1 + $0x330] sm:$0xff]  ;;  %v1826_v0 = vld [vmem:[%s1461_s13 + $0x48] sm:$0xff] }
  0x39   : > { %943 = vmatpush.msrb.mxu3 %v1318_v33  ;;  %872 = vmatpush.msrb.mxu2 %v1298_v35  ;;  %v283_v6 = vmax.f32 %v1826_v0, 0.0  ;;  %v270_v33 = vld [vmem:[%s1461_s13 + $0xe0] sm:$0xff]  ;;  %v276_v35 = vmax.f32 %v244_v29, 0.0 }
  0x3a   : > { %725 = vmatpush.msrb.mxu0 %v1264_v1  ;;  %510 = vmatpush.msrb.mxu1 %v428_v4  ;;  %v282_v1 = vmax.f32 %v1794_v53, 0.0  ;;  %v274_v4 = vmax.f32 %v242_v56, 0.0 }
  0x3b   : > { %496 = vmatmul.f32.gmra.mxu1 %v295_v5  ;;  %585 = vmatmul.f32.vlgmr.msra.gmra.mxu2 %v544_v40  ;;  %388 = vst [vmem:[#allocation2 + $0xb1] sm:$0xff] %v283_v6  ;;  %v1906_v40 = vmax.f32 %v270_v33, 0.0  ;;  %v1288_v33 = vld [vmem:[%s2193_s1 + $0x300] sm:$0xff] }
  0x3c   : > { %726 = vmatpush.msrb.mxu0 %v1263_v8  ;;  %511 = vmatpush.msrb.mxu1 %v427_v9  ;;  %v268_v8 = vld [vmem:[%s1461_s13 + $0xd0] sm:$0xff]  ;;  %v243_v9 = vld [vmem:[%s1461_s13 + $0x8] sm:$0xff]  ;;  %387 = vst [vmem:[#allocation2 + $0xa1] sm:$0xff] %v282_v1 }
  0x3d   : > { %944 = vmatpush.msrb.mxu3 %v1317_v43  ;;  %873 = vmatpush.msrb.mxu2 %v1297_v44  ;;  %v1871_v20 = vmax.f32 %v268_v8, 0.0  ;;  %v271_v43 = vld [vmem:[%s1461_s13 + $0xe8] sm:$0xff]  ;;  %v1279_v44 = vld [vmem:[%s2193_s1 + $0x2b8] sm:$0xff]  ;;  %407 = vst [vmem:[#allocation2 + $0x201] sm:$0xff] %v1906_v40 }
  0x3e   : > { %727 = vmatpush.msrb.mxu0 %v1262_v11  ;;  %512 = vmatpush.msrb.mxu1 %v426_v13  ;;  %v1313_v11 = vld [vmem:[%s2193_s1 + $0x3c8] sm:$0xff] }
  0x3f   : > { %484 = vmatmul.f32.gmra.mxu0 %v291_v37  ;;  %945 = vmatpush.msrb.mxu3 %v1316_v46  ;;  %v1281_v13 = vld [vmem:[%s2193_s1 + $0x2c8] sm:$0xff]  ;;  %405 = vst [vmem:[#allocation2 + $0x1e1] sm:$0xff] %v1871_v20  ;;  %v1291_v46 = vld [vmem:[%s2193_s1 + $0x318] sm:$0xff] }
  0x40   : > { %728 = vmatpush.msrb.mxu0 %v1261_v16  ;;  %513 = vmatpush.msrb.mxu1 %v425_v19  ;;  %v1293_v16 = vld [vmem:[%s2193_s1 + $0x328] sm:$0xff] }
  0x41   : > { %874 = vmatpush.msrb.mxu2 %v1296_v47  ;;  %946 = vmatpush.msrb.mxu3 %v1315_v57  ;;  %v1867_v19 = vld [vmem:[%s2193_s1 + $0x468] sm:$0xff]  ;;  %v1938_v57 = vld [vmem:[#allocation2 + $0x1d0] sm:$0xff] }
  0x42   : > { %729 = vmatpush.msrb.mxu0 %v1260_v21  ;;  %514 = vmatpush.msrb.mxu1 %v424_v22  ;;  %v269_v21 = vld [vmem:[%s1461_s13 + $0xd8] sm:$0xff]  ;;  %v1280_v22 = vld [vmem:[%s2193_s1 + $0x2c0] sm:$0xff] }
  0x43   : > { %499 = vmatmul.f32.gmra.mxu1 %v296_v23  ;;  %588 = vmatmul.f32.gmra.mxu2 %v1785_v50 }
  0x44   : > { %515 = vmatpush.msrb.mxu1 %v423_v25  ;;  %730 = vmatpush.msrb.mxu0 %v1259_v30  ;;  %v1292_v25 = vld [vmem:[%s2193_s1 + $0x320] sm:$0xff] }
  0x45   : > { %947 = vmatpush.msrb.mxu3 %v1314_v59  ;;  %v1885_v30 = vld [vmem:[%s1461_s13 + $0x60] sm:$0xff]  ;;  %v620_v59 = vld [vmem:[#allocation2 + $0xb0] sm:$0xff] }
  0x46   : > { %516 = vmatpush.msrb.mxu1 %v422_v27  ;;  %731 = vmatpush.msrb.mxu0 %v1258_v32  ;;  %v275_v27 = vmax.f32 %v243_v9, 0.0  ;;  %v1891_v32 = vmax.f32 %v269_v21, 0.0  ;;  %v272_v9 = vld [vmem:[%s1461_s13 + $0xf0] sm:$0xff]  ;;  %v1289_v21 = vld [vmem:[%s2193_s1 + $0x308] sm:$0xff]  ;;  %v1993_v29 = vld [vmem:[#allocation2 + $0x1e0] sm:$0xff] }
  0x47   : > { %487 = vmatmul.f32.gmra.mxu0 %v292_v51  ;;  %948 = vmatpush.msrb.mxu3 %v1313_v11  ;;  %v1309_v11 = vld [vmem:[%s2193_s1 + $0x3a8] sm:$0xff] }
  0x48   : > { %517 = vmatpush.msrb.mxu1 %v421_v28  ;;  %732 = vmatpush.msrb.mxu0 %v1257_v34  ;;  %v285_v28 = vmax.f32 %v1839_v10, 0.0  ;;  %v619_v34 = vld [vmem:[#allocation2 + $0xa0] sm:$0xff]  ;;  %406 = vst [vmem:[#allocation2 + $0x1f1] sm:$0xff] %v1891_v32 }
  0x49   : > { %949 = vmatpush.msrb.mxu3 %v1312_v17  ;;  %v1277_v17 = vld [vmem:[%s2193_s1 + $0x2a8] sm:$0xff] }
  0x4a   : > { %518 = vmatpush.msrb.mxu1 %v420_v36  ;;  %733 = vmatpush.msrb.mxu0 %v1256_v38  ;;  %v286_v36 = vmax.f32 %v1885_v30, 0.0  ;;  %v1898_v38 = vld [vmem:[%s1461_s13 + $0x18] sm:$0xff]  ;;  %390 = vst [vmem:[#allocation2 + $0xd1] sm:$0xff] %v285_v28 }
  0x4b   : > { %519 = vmatmul.f32.vlgmr.msrb.gmra.mxu1 %v1389_v2  ;;  %v1295_v2 = vld [vmem:[%s2193_s1 + $0x338] sm:$0xff]  ;;  %591 = vmatmul.f32.gmra.mxu2 %v1829_v3  ;;  %v277_v47 = vmax.f32 %v1898_v38, 0.0 }
  0x4c   : > { %792 = vmatpush.msra.mxu1 %v1287_v39  ;;  %875 = vmatpush.msrb.mxu2 %v1295_v2  ;;  %v1901_v39 = vld [vmem:[%s1461_s13 + $0x68] sm:$0xff]  ;;  %391 = vst [vmem:[#allocation2 + $0xe1] sm:$0xff] %v286_v36  ;;  %v1290_v2 = vld [vmem:[%s2193_s1 + $0x310] sm:$0xff]  ;;  %v2001_v38 = vld [vmem:[%s1461_s13 + $0x78] sm:$0xff] }
  0x4d   : > { %1016 = vmatpush.msra.mxu0 %v1816_v60  ;;  %660 = vmatmul.f32.vlgmr.msra.gmra.mxu3 %v619_v34  ;;  %v287_v56 = vmax.f32 %v1901_v39, 0.0  ;;  %v621_v34 = vld [vmem:[#allocation2 + $0xc0] sm:$0xff] }
  0x4e   : > { %793 = vmatpush.msra.mxu1 %v1286_v42  ;;  %876 = vmatpush.msrb.mxu2 %v1294_v63  ;;  %v1914_v42 = vld [vmem:[%s2193_s1 + $0x460] sm:$0xff]  ;;  %v1953_v63 = vld [vmem:[%s1461_s13 + $0x70] sm:$0xff] }
  0x4f   : > { %734 = vmatmul.f32.vlgmr.msrb.gmra.mxu0 %v274_v4  ;;  %950 = vmatpush.msrb.mxu3 %v1311_v41  ;;  %392 = vst [vmem:[#allocation2 + $0xf1] sm:$0xff] %v287_v56  ;;  %v288_v8 = vmax.f32 %v1953_v63, 0.0 }
  0x50   : > { %794 = vmatpush.msra.mxu1 %v1285_v49  ;;  %1017 = vmatpush.msra.mxu0 %v1850_v12  ;;  %v1310_v49 = vld [vmem:[%s2193_s1 + $0x3b0] sm:$0xff] }
  0x51   : > { %877 = vmatpush.msrb.mxu2 %v1293_v16  ;;  %951 = vmatpush.msrb.mxu3 %v1310_v49  ;;  %v1970_v16 = vmax.f32 %v272_v9, 0.0  ;;  %393 = vst [vmem:[#allocation2 + $0x101] sm:$0xff] %v288_v8  ;;  %v1306_v49 = vld [vmem:[%s2193_s1 + $0x390] sm:$0xff] }
  0x52   : > { %795 = vmatpush.msra.mxu1 %v1284_v52  ;;  %1018 = vmatpush.msra.mxu0 %v1867_v19  ;;  %v1932_v52 = vld [vmem:[%s2193_s1 + $0x458] sm:$0xff] }
  0x53   : > { %878 = vmatpush.msrb.mxu2 %v1292_v25  ;;  %522 = vmatmul.f32.gmra.mxu1 %v1887_v31  ;;  %409 = vst [vmem:[#allocation2 + $0x221] sm:$0xff] %v1970_v16  ;;  %v1988_v25 = vld [vmem:[%s2193_s1 + $0x448] sm:$0xff] }
  0x54   : > { %796 = vmatpush.msra.mxu1 %v1283_v58  ;;  %594 = vmatmul.f32.gmra.mxu2 %v1871_v20  ;;  %v1942_v58 = vmax.f32 %v271_v43, 0.0  ;;  %v289_v43 = vmax.f32 %v2001_v38, 0.0 }
  0x55   : > { %1019 = vmatpush.msra.mxu0 %v1914_v42  ;;  %879 = vmatpush.msrb.mxu2 %v1291_v46  ;;  %v1328_v46 = vld [vmem:[%s2193_s1 + $0x440] sm:$0xff] }
  0x56   : > { %797 = vmatpush.msra.mxu1 %v1282_v61  ;;  %408 = vst [vmem:[#allocation2 + $0x211] sm:$0xff] %v1942_v58  ;;  %v1950_v61 = vld [vmem:[%s1461_s13 + $0x20] sm:$0xff]  ;;  %663 = vmatmul.f32.gmra.mxu3 %v620_v59  ;;  %v622_v59 = vld [vmem:[#allocation2 + $0xd0] sm:$0xff] }
  0x57   : > { %737 = vmatmul.f32.gmra.mxu0 %v275_v27  ;;  %880 = vmatpush.msrb.mxu2 %v1290_v2  ;;  %v278_v4 = vmax.f32 %v1950_v61, 0.0  ;;  %v1276_v27 = vld [vmem:[%s2193_s1 + $0x2a0] sm:$0xff]  ;;  %394 = vst [vmem:[#allocation2 + $0x111] sm:$0xff] %v289_v43  ;;  %v2027_v2 = vld [vmem:[#allocation2 + $0x1f0] sm:$0xff] }
  0x58   : > { %798 = vmatpush.msra.mxu1 %v1281_v13  ;;  %1020 = vmatpush.msra.mxu0 %v1932_v52  ;;  %v1968_v13 = vld [vmem:[%s2193_s1 + $0x450] sm:$0xff] }
  0x59   : > { %952 = vmatpush.msrb.mxu3 %v1309_v11  ;;  %881 = vmatpush.msrb.mxu2 %v1289_v21  ;;  %v248_v61 = vld [vmem:[%s1461_s13 + $0x30] sm:$0xff]  ;;  %v1305_v11 = vld [vmem:[%s2193_s1 + $0x388] sm:$0xff]  ;;  %v1272_v21 = vld [vmem:[%s2193_s1 + $0x280] sm:$0xff] }
  0x5a   : > { %799 = vmatpush.msra.mxu1 %v1280_v22  ;;  %v1308_v22 = vld [vmem:[%s2193_s1 + $0x3a0] sm:$0xff]  ;;  %1021 = vmatpush.msra.mxu0 %v1968_v13  ;;  %v280_v9 = vmax.f32 %v248_v61, 0.0 }
  0x5b   : > { %525 = vmatmul.f32.gmra.mxu1 %v1938_v57  ;;  %953 = vmatpush.msrb.mxu3 %v1308_v22  ;;  %v1324_v22 = vld [vmem:[%s2193_s1 + $0x420] sm:$0xff] }
  0x5c   : > { %800 = vmatpush.msra.mxu1 %v1279_v44  ;;  %597 = vmatmul.f32.gmra.mxu2 %v1891_v32  ;;  %v1307_v44 = vld [vmem:[%s2193_s1 + $0x398] sm:$0xff] }
  0x5d   : > { %1022 = vmatpush.msra.mxu0 %v1988_v25  ;;  %882 = vmatpush.msrb.mxu2 %v1288_v33 }
  0x5e   : > { %801 = vmatpush.msra.mxu1 %v1278_v54  ;;  %666 = vmatmul.f32.gmra.mxu3 %v621_v34  ;;  %v1327_v54 = vld [vmem:[%s2193_s1 + $0x438] sm:$0xff]  ;;  %v623_v34 = vld [vmem:[#allocation2 + $0xe0] sm:$0xff] }
  0x5f   : > { %740 = vmatmul.f32.gmra.mxu0 %v276_v35  ;;  %v247_v35 = vld [vmem:[%s1461_s13 + $0x28] sm:$0xff]  ;;  %1355 = vmatpush.msra.mxu2 %v1816_v60  ;;  %v1275_v60 = vld [vmem:[%s2193_s1 + $0x298] sm:$0xff] }
  0x60   : > { %802 = vmatpush.msra.mxu1 %v1277_v17  ;;  %v279_v41 = vmax.f32 %v247_v35, 0.0  ;;  %954 = vmatpush.msrb.mxu3 %v1307_v44  ;;  %v1325_v17 = vld [vmem:[%s2193_s1 + $0x428] sm:$0xff]  ;;  %v1323_v35 = vld [vmem:[%s2193_s1 + $0x418] sm:$0xff]  ;;  %v418_v44 = vld [vmem:[#allocation2 + $0x210] sm:$0xff] }
  0x61   : > { %1023 = vmatpush.msra.mxu0 %v1328_v46  ;;  %1356 = vmatpush.msra.mxu2 %v1850_v12  ;;  %v1326_v12 = vld [vmem:[%s2193_s1 + $0x430] sm:$0xff] }
  0x62   : > { %803 = vmatpush.msra.mxu1 %v1276_v27  ;;  %955 = vmatpush.msrb.mxu3 %v1306_v49  ;;  %v249_v27 = vld [vmem:[%s1461_s13 + $0x38] sm:$0xff]  ;;  %v626_v49 = vld [vmem:[#allocation2 + $0x110] sm:$0xff] }
  0x63   : > { %528 = vmatmul.f32.gmra.mxu1 %v1993_v29  ;;  %1024 = vmatpush.msra.mxu0 %v1327_v54  ;;  %v281_v33 = vmax.f32 %v249_v27, 0.0 }
  0x64   : > { %600 = vmatmul.f32.gmra.mxu2 %v1906_v40  ;;  %804 = vmatpush.msra.mxu1 %v1275_v60  ;;  %v625_v60 = vld [vmem:[#allocation2 + $0x100] sm:$0xff] }
  0x65   : > { %1357 = vmatpush.msra.mxu2 %v1867_v19  ;;  %956 = vmatpush.msrb.mxu3 %v1305_v11  ;;  %v1273_v19 = vld [vmem:[%s2193_s1 + $0x288] sm:$0xff] }
  0x66   : > { %669 = vmatmul.f32.gmra.mxu3 %v622_v59  ;;  %1025 = vmatpush.msra.mxu0 %v1326_v12 }
  0x67   : > { %743 = vmatmul.f32.gmra.mxu0 %v277_v47  ;;  %v1274_v47 = vld [vmem:[%s2193_s1 + $0x290] sm:$0xff]  ;;  %1358 = vmatpush.msra.mxu2 %v1914_v42  ;;  %v1304_v42 = vld [vmem:[%s2193_s1 + $0x380] sm:$0xff] }
  0x68   : > { %805 = vmatpush.msra.mxu1 %v1274_v47  ;;  %957 = vmatpush.msrb.mxu3 %v1304_v42 }
  0x69   : > { %1359 = vmatpush.msra.mxu2 %v1932_v52  ;;  %1026 = vmatpush.msra.mxu0 %v1325_v17  ;;  %v1322_v52 = vld [vmem:[%s2193_s1 + $0x410] sm:$0xff] }
  0x6a   : > { %806 = vmatpush.msra.mxu1 %v1273_v19 }
  0x6b   : > { %531 = vmatmul.f32.gmra.mxu1 %v2027_v2  ;;  %1360 = vmatpush.msra.mxu2 %v1968_v13  ;;  %v1321_v13 = vld [vmem:[%s2193_s1 + $0x408] sm:$0xff] }
  0x6c   : > { %603 = vmatmul.f32.gmra.mxu2 %v1942_v58  ;;  %807 = vmatpush.msra.mxu1 %v1272_v21 }
  0x6d   : > { %1027 = vmatpush.msra.mxu0 %v1324_v22  ;;  %1361 = vmatpush.msra.mxu2 %v1988_v25  ;;  %v624_v25 = vld [vmem:[#allocation2 + $0xf0] sm:$0xff] }
  0x6e   : > { %672 = vmatmul.f32.gmra.mxu3 %v623_v34 }
  0x6f   : > { %746 = vmatmul.f32.gmra.mxu0 %v278_v4  ;;  %v417_v4 = vld [vmem:[#allocation2 + $0x200] sm:$0xff]  ;;  %1362 = vmatpush.msra.mxu2 %v1328_v46 }
  0x70   : > { %1028 = vmatpush.msra.mxu0 %v1323_v35  ;;  %v419_v46 = vld [vmem:[#allocation2 + $0x220] sm:$0xff] }
  0x71   : > { %1363 = vmatpush.msra.mxu2 %v1327_v54 }
  0x72   : > { %1029 = vmatpush.msra.mxu0 %v1322_v52 }
  0x73   : > { %534 = vmatmul.f32.gmra.mxu1 %v417_v4  ;;  %1364 = vmatpush.msra.mxu2 %v1326_v12 }
  0x74   : > { %606 = vmatmul.f32.gmra.mxu2 %v1970_v16  ;;  %1030 = vmatpush.msra.mxu0 %v1321_v13 }
  0x75   : > { %1365 = vmatpush.msra.mxu2 %v1325_v17 }
  0x76   : > { %675 = vmatmul.f32.gmra.mxu3 %v624_v25 }
  0x77   : > { %749 = vmatmul.f32.gmra.mxu0 %v279_v41  ;;  %v1320_v41 = vld [vmem:[%s2193_s1 + $0x400] sm:$0xff]  ;;  %1366 = vmatpush.msra.mxu2 %v1324_v22 }
  0x78   : > { %1031 = vmatpush.msra.mxu0 %v1320_v41 }
  0x79   : > { %1367 = vmatpush.msra.mxu2 %v1323_v35 }
  0x7b   : > { %537 = vmatmul.f32.gmra.mxu1 %v418_v44  ;;  %1368 = vmatpush.msra.mxu2 %v1322_v52 }
  0x7c   : > { %883 = vmatmul.f32.vlgmr.msrb.gmra.mxu2 %v1887_v31  ;;  %v273_v31 = vld [vmem:[%s1461_s13 + $0xf8] sm:$0xff]  ;;  %s239_s13 = scalar_select %p238_p4, %s1426_s2, 1 }
  0x7d   : > { %1369 = vmatpush.msra.mxu2 %v1321_v13 }
  0x7e   : > { %678 = vmatmul.f32.gmra.mxu3 %v625_v60  ;;  %s1207_s22 = sshll.u32 %s239_s13, 3 }
  0x7f   : > { %752 = vmatmul.f32.gmra.mxu0 %v280_v9  ;;  %1370 = vmatpush.msra.mxu2 %v1320_v41  ;;  %s2127_s25 = scalar_lea.vmem %s2197_s5, %s1207_s22 }
  0x80   : > { %1073 = vst [vmem:[%s2127_s25] sm:$0xff] %v1380_v15 }
  0x83   : > { %540 = vmatmul.f32.gmra.mxu1 %v419_v46 }
  0x84   : > { %886 = vmatmul.f32.gmra.mxu2 %v1938_v57  ;;  %v305_v57 = vmax.f32 %v273_v31, 0.0 }
  0x86   : > { %681 = vmatmul.f32.gmra.mxu3 %v626_v49  ;;  %410 = vst [vmem:[#allocation2 + $0x231] sm:$0xff] %v305_v57 }
  0x87   : > { %755 = vmatmul.f32.gmra.mxu0 %v281_v33 }
  0x8b   : > { %808 = vmatmul.f32.vlgmr.msra.gmra.mxu1 %v282_v1 }
  0x8c   : > { %889 = vmatmul.f32.gmra.mxu2 %v1993_v29 }
  0x8d   : > { %v849_v45 = vld [vmem:[#allocation2 + $0x230] sm:$0xff] }
  0x8e   : > { %958 = vmatmul.f32.vlgmr.msrb.gmra.mxu3 %v290_v24  ;;  %v297_v24 = vmax.f32 %v265_v18, 0.0 }
  0x8f   : > { %1032 = vmatmul.f32.vlgmr.msra.gmra.mxu0 %v1785_v50 }
  0x93   : > { %811 = vmatmul.f32.gmra.mxu1 %v283_v6 }
  0x94   : > { %892 = vmatmul.f32.gmra.mxu2 %v2027_v2 }
  0x96   : > { %961 = vmatmul.f32.gmra.mxu3 %v291_v37 }
  0x97   : > { %1035 = vmatmul.f32.gmra.mxu0 %v1829_v3 }
  0x9b   : > { %814 = vmatmul.f32.gmra.mxu1 %v284_v14 }
  0x9c   : > { %895 = vmatmul.f32.gmra.mxu2 %v417_v4 }
  0x9e   : > { %964 = vmatmul.f32.gmra.mxu3 %v292_v51 }
  0x9f   : > { %1038 = vmatmul.f32.gmra.mxu0 %v1871_v20 }
  0xa3   : > { %817 = vmatmul.f32.gmra.mxu1 %v285_v28 }
  0xa4   : > { %898 = vmatmul.f32.gmra.mxu2 %v418_v44 }
  0xa6   : > { %967 = vmatmul.f32.gmra.mxu3 %v920_v26 }
  0xa7   : > { %1041 = vmatmul.f32.gmra.mxu0 %v1891_v32 }
  0xa8   : > { %v2086_v53 = vpop.f32.mrf.mxu1 }
  0xab   : > { %820 = vmatmul.f32.gmra.mxu1 %v286_v36 }
  0xac   : > { %v479_v37 = vpop.f32.mrf.mxu0  ;;  %901 = vmatmul.f32.gmra.mxu2 %v419_v46 }
  0xae   : > { %970 = vmatmul.f32.gmra.mxu3 %v294_v55 }
  0xaf   : > { %1044 = vmatmul.f32.gmra.mxu0 %v1906_v40 }
  0xb0   : > { %v2093_v50 = vpop.f32.mrf.mxu1 }
  0xb3   : > { %823 = vmatmul.f32.gmra.mxu1 %v287_v56 }
  0xb4   : > { %v482_v51 = vpop.f32.mrf.mxu0  ;;  %904 = vmatmul.f32.gmra.mxu2 %v849_v45 }
  0xb6   : > { %973 = vmatmul.f32.gmra.mxu3 %v295_v5 }
  0xb7   : > { %1047 = vmatmul.f32.gmra.mxu0 %v1942_v58 }
  0xb8   : > { %v2101_v0 = vpop.f32.mrf.mxu1 }
  0xbb   : > { %826 = vmatmul.f32.gmra.mxu1 %v288_v8 }
  0xbc   : > { %v485_v3 = vpop.f32.mrf.mxu0  ;;  %1050 = vmatmul.f32.vlgmr.msra.gmra.mxu2 %v1970_v16 }
  0xbe   : > { %v586_v10 = vpop.f32.mrf.mxu2  ;;  %976 = vmatmul.f32.gmra.mxu3 %v296_v23 }
  0xc0   : > { %v2106_v1 = vpop.f32.mrf.mxu1 }
  0xc3   : > { %829 = vmatmul.f32.gmra.mxu1 %v289_v43 }
  0xc4   : > { %v488_v48 = vpop.f32.mrf.mxu0  ;;  %1053 = vmatmul.f32.gmra.mxu2 %v305_v57 }
  0xc6   : > { %v589_v55 = vpop.f32.mrf.mxu2  ;;  %979 = vmatmul.f32.gmra.mxu3 %v297_v24 }
  0xc8   : > { %v520_v6 = vpop.f32.mrf.mxu1 }
  0xc9   : > { %v521_v7 = vadd.f32 %v520_v6, %v479_v37 }
  0xcb   : > { %v610_v14 = vadd.f32 %v586_v10, %v521_v7 }
  0xcc   : > { %v735_v20 = vpop.f32.mrf.mxu0 }
  0xce   : > { %v592_v62 = vpop.f32.mrf.mxu2 }
  0xd0   : > { %v523_v28 = vpop.f32.mrf.mxu1  ;;  %v661_v23 = vpop.f32.mrf.mxu3 }
  0xd1   : > { %v524_v5 = vadd.f32 %v523_v28, %v482_v51  ;;  %v685_v44 = vadd.f32 %v661_v23, %v610_v14 }
  0xd3   : > { %v611_v30 = vadd.f32 %v589_v55, %v524_v5  ;;  %v759_v25 = vadd.f32 %v735_v20, %v685_v44 }
  0xd4   : > { %v738_v32 = vpop.f32.mrf.mxu0 }
  0xd7   : > { %v595_v36 = vpop.f32.mrf.mxu2 }
  0xd8   : > { %v526_v39 = vpop.f32.mrf.mxu1 }
  0xd9   : > { %v527_v40 = vadd.f32 %v526_v39, %v485_v3  ;;  %v664_v63 = vpop.f32.mrf.mxu3 }
  0xda   : > { %v686_v31 = vadd.f32 %v664_v63, %v611_v30 }
  0xdb   : > { %v612_v58 = vadd.f32 %v592_v62, %v527_v40 }
  0xdc   : > { %v741_v56 = vpop.f32.mrf.mxu0  ;;  %v760_v18 = vadd.f32 %v738_v32, %v686_v31 }
  0xdf   : > { %v2130_v8 = vpop.f32.mrf.mxu2 }
  0xe0   : > { %v529_v16 = vpop.f32.mrf.mxu1 }
  0xe1   : > { %v530_v29 = vadd.f32 %v529_v16, %v488_v48  ;;  %v667_v54 = vpop.f32.mrf.mxu3 }
  0xe2   : > { %v687_v6 = vadd.f32 %v667_v54, %v612_v58 }
  0xe3   : > { %v613_v43 = vadd.f32 %v595_v36, %v530_v29 }
  0xe4   : > { %v744_v38 = vpop.f32.mrf.mxu0  ;;  %v761_v14 = vadd.f32 %v741_v56, %v687_v6 }
  0xe7   : > { %v2132_v47 = vpop.f32.mrf.mxu2 }
  0xe8   : > { %v532_v2 = vpop.f32.mrf.mxu1 }
  0xe9   : > { %v670_v61 = vpop.f32.mrf.mxu3  ;;  %v533_v32 = vadd.f32 %v532_v2, %v2086_v53 }
  0xea   : > { %v688_v30 = vadd.f32 %v670_v61, %v613_v43 }
  0xeb   : > { %v614_v63 = vadd.f32 %v2130_v8, %v533_v32 }
  0xec   : > { %v2134_v59 = vpop.f32.mrf.mxu0  ;;  %v762_v58 = vadd.f32 %v744_v38, %v688_v30 }
  0xef   : > { %v2136_v9 = vpop.f32.mrf.mxu2 }
  0xf0   : > { %v535_v11 = vpop.f32.mrf.mxu1 }
  0xf1   : > { %v673_v19 = vpop.f32.mrf.mxu3  ;;  %v536_v43 = vadd.f32 %v535_v11, %v2093_v50 }
  0xf3   : > { %v615_v8 = vadd.f32 %v2132_v47, %v536_v43 }
  0xf4   : > { %v2138_v12 = vpop.f32.mrf.mxu0 }
  0xf7   : > { %v2140_v42 = vpop.f32.mrf.mxu2 }
  0xf8   : > { %v2142_v17 = vpop.f32.mrf.mxu1 }
  0xf9   : > { %v2146_v4 = vpop.f32.mrf.mxu3  ;;  %v539_v50 = vadd.f32 %v2142_v17, %v2101_v0 }
  0xfc   : > { %v2144_v21 = vpop.f32.mrf.mxu0 }
  0xff   : > { %v884_v22 = vpop.f32.mrf.mxu2 }
 0x100   : > { %v2148_v27 = vpop.f32.mrf.mxu1 }
 0x101   : > { %v2152_v34 = vpop.f32.mrf.mxu3  ;;  %v542_v0 = vadd.f32 %v2148_v27, %v2106_v1 }
 0x104   : > { %v2150_v33 = vpop.f32.mrf.mxu0 }
 0x107   : > { %v887_v35 = vpop.f32.mrf.mxu2 }
 0x108   : > { %v809_v52 = vpop.f32.mrf.mxu1 }
 0x109   : > { %v2155_v41 = vpop.f32.mrf.mxu3  ;;  %v833_v60 = vadd.f32 %v809_v52, %v759_v25  ;;  %v689_v52 = vadd.f32 %v673_v19, %v614_v63  ;;  %v690_v19 = vadd.f32 %v2146_v4, %v615_v8 }
 0x10b   : > { %v908_v57 = vadd.f32 %v884_v22, %v833_v60  ;;  %v763_v38 = vadd.f32 %v2134_v59, %v689_v52  ;;  %v764_v47 = vadd.f32 %v2138_v12, %v690_v19 }
 0x10c   : > { %v1033_v13 = vpop.f32.mrf.mxu0 }
 0x10f   : > { %v890_v46 = vpop.f32.mrf.mxu2 }
 0x110   : > { %v812_v49 = vpop.f32.mrf.mxu1 }
 0x111   : > { %v959_v26 = vpop.f32.mrf.mxu3  ;;  %v834_v51 = vadd.f32 %v812_v49, %v760_v18 }
 0x112   : > { %v983_v45 = vadd.f32 %v959_v26, %v908_v57 }
 0x113   : > { %v909_v10 = vadd.f32 %v887_v35, %v834_v51 }
 0x114   : > { %v1036_v24 = vpop.f32.mrf.mxu0  ;;  %v1057_v7 = vadd.f32 %v1033_v13, %v983_v45 }
 0x116   : > { %1065 = vst [vmem:[%s2160_s29] sm:$0xff] %v1057_v7  ;;  %v1088_v23 = vmul.f32 %v1057_v7, %v1057_v7 }
 0x117   : > { %v893_v37 = vpop.f32.mrf.mxu2 }
 0x118   : > { %v815_v3 = vpop.f32.mrf.mxu1 }
 0x119   : > { %v962_v48 = vpop.f32.mrf.mxu3  ;;  %v835_v62 = vadd.f32 %v815_v3, %v761_v14 }
 0x11a   : > { %v984_v20 = vadd.f32 %v962_v48, %v909_v10 }
 0x11b   : > { %v910_v40 = vadd.f32 %v890_v46, %v835_v62 }
 0x11c   : > { %v1039_v5 = vpop.f32.mrf.mxu0  ;;  %v1058_v15 = vadd.f32 %v1036_v24, %v984_v20 }
 0x11e   : > { %1066 = vst [vmem:[%s2160_s29 + $0x8] sm:$0xff] %v1058_v15  ;;  %v1074_v36 = vadd.f32 %v1058_v15, %v1057_v7  ;;  %v1089_v39 = vmul.f32 %v1058_v15, %v1058_v15 }
 0x11f   : > { %v896_v55 = vpop.f32.mrf.mxu2 }
 0x120   : > { %v818_v28 = vpop.f32.mrf.mxu1  ;;  %v1096_v56 = vadd.f32 %v1089_v39, %v1088_v23 }
 0x121   : > { %v965_v16 = vpop.f32.mrf.mxu3  ;;  %v836_v22 = vadd.f32 %v818_v28, %v762_v58 }
 0x122   : > { %v985_v54 = vadd.f32 %v965_v16, %v910_v40 }
 0x123   : > { %v911_v13 = vadd.f32 %v893_v37, %v836_v22  ;;  %v616_v37 = vadd.f32 %v2136_v9, %v539_v50  ;;  %v617_v9 = vadd.f32 %v2140_v42, %v542_v0 }
 0x124   : > { %v1059_v53 = vadd.f32 %v1039_v5, %v985_v54  ;;  %v1042_v2 = vpop.f32.mrf.mxu0 }
 0x125   : > { %v691_v4 = vadd.f32 %v2152_v34, %v616_v37  ;;  %v692_v1 = vadd.f32 %v2155_v41, %v617_v9 }
 0x126   : > { %1067 = vst [vmem:[%s2160_s29 + $0x10] sm:$0xff] %v1059_v53  ;;  %v1075_v61 = vadd.f32 %v1074_v36, %v1059_v53  ;;  %v1090_v44 = vmul.f32 %v1059_v53, %v1059_v53 }
 0x127   : > { %v899_v29 = vpop.f32.mrf.mxu2  ;;  %v765_v12 = vadd.f32 %v2144_v21, %v691_v4  ;;  %v766_v21 = vadd.f32 %v2150_v33, %v692_v1 }
 0x128   : > { %v821_v35 = vpop.f32.mrf.mxu1  ;;  %v1097_v25 = vadd.f32 %v1096_v56, %v1090_v44 }
 0x129   : > { %v968_v46 = vpop.f32.mrf.mxu3  ;;  %v837_v49 = vadd.f32 %v821_v35, %v763_v38 }
 0x12a   : > { %v986_v60 = vadd.f32 %v968_v46, %v911_v13 }
 0x12b   : > { %v912_v26 = vadd.f32 %v896_v55, %v837_v49 }
 0x12c   : > { %v1060_v11 = vadd.f32 %v1042_v2, %v986_v60  ;;  %v1045_v59 = vpop.f32.mrf.mxu0 }
 0x12e   : > { %1068 = vst [vmem:[%s2160_s29 + $0x18] sm:$0xff] %v1060_v11  ;;  %v1076_v18 = vadd.f32 %v1075_v61, %v1060_v11  ;;  %v1091_v24 = vmul.f32 %v1060_v11, %v1060_v11 }
 0x12f   : > { %v902_v31 = vpop.f32.mrf.mxu2 }
 0x130   : > { %v824_v57 = vpop.f32.mrf.mxu1  ;;  %v1098_v45 = vadd.f32 %v1097_v25, %v1091_v24 }
 0x131   : > { %v971_v51 = vpop.f32.mrf.mxu3  ;;  %v838_v6 = vadd.f32 %v824_v57, %v764_v47 }
 0x132   : > { %v987_v3 = vadd.f32 %v971_v51, %v912_v26 }
 0x133   : > { %v913_v55 = vadd.f32 %v899_v29, %v838_v6 }
 0x134   : > { %v1061_v17 = vadd.f32 %v1045_v59, %v987_v3  ;;  %v1048_v28 = vpop.f32.mrf.mxu0 }
 0x136   : > { %1069 = vst [vmem:[%s2160_s29 + $0x20] sm:$0xff] %v1061_v17  ;;  %v1077_v14 = vadd.f32 %v1076_v18, %v1061_v17  ;;  %v1092_v48 = vmul.f32 %v1061_v17, %v1061_v17 }
 0x137   : > { %v905_v7 = vpop.f32.mrf.mxu2 }
 0x138   : > { %v827_v10 = vpop.f32.mrf.mxu1  ;;  %v1099_v20 = vadd.f32 %v1098_v45, %v1092_v48 }
 0x139   : > { %v974_v62 = vpop.f32.mrf.mxu3  ;;  %v839_v34 = vadd.f32 %v827_v10, %v765_v12 }
 0x13a   : > { %v988_v5 = vadd.f32 %v974_v62, %v913_v55 }
 0x13b   : > { %v914_v15 = vadd.f32 %v902_v31, %v839_v34 }
 0x13c   : > { %v1062_v27 = vadd.f32 %v1048_v28, %v988_v5 }
 0x13e   : > { %1070 = vst [vmem:[%s2160_s29 + $0x28] sm:$0xff] %v1062_v27  ;;  %v1078_v30 = vadd.f32 %v1077_v14, %v1062_v27  ;;  %v1093_v32 = vmul.f32 %v1062_v27, %v1062_v27 }
 0x13f   : > { %v1051_v23 = vpop.f32.mrf.mxu2 }
 0x140   : > { %v830_v36 = vpop.f32.mrf.mxu1  ;;  %v1100_v39 = vadd.f32 %v1099_v20, %v1093_v32 }
 0x141   : > { %v977_v42 = vpop.f32.mrf.mxu3  ;;  %v840_v58 = vadd.f32 %v830_v36, %v766_v21 }
 0x142   : > { %v989_v40 = vadd.f32 %v977_v42, %v914_v15 }
 0x143   : > { %v915_v29 = vadd.f32 %v905_v7, %v840_v58 }
 0x144   : > { %v1063_v63 = vadd.f32 %v1051_v23, %v989_v40 }
 0x146   : > { %1071 = vst [vmem:[%s2160_s29 + $0x30] sm:$0xff] %v1063_v63  ;;  %v1079_v56 = vadd.f32 %v1078_v30, %v1063_v63  ;;  %v1094_v16 = vmul.f32 %v1063_v63, %v1063_v63 }
 0x147   : > { %v1054_v22 = vpop.f32.mrf.mxu2 }
 0x148   : > { %v1101_v41 = vadd.f32 %v1100_v39, %v1094_v16 }
 0x149   : > { %v980_v54 = vpop.f32.mrf.mxu3 }
 0x14a   : > { %v990_v35 = vadd.f32 %v980_v54, %v915_v29 }
 0x14c   : > { %v1064_v52 = vadd.f32 %v1054_v22, %v990_v35 }
 0x14e   : > { %1072 = vst [vmem:[%s2160_s29 + $0x38] sm:$0xff] %v1064_v52  ;;  %v1080_v43 = vadd.f32 %v1079_v56, %v1064_v52  ;;  %v1095_v53 = vmul.f32 %v1064_v52, %v1064_v52 }
 0x150   : > { %v1081_v33 = vrot.slane %v1080_v43, 4  ;;  %v1102_v2 = vadd.f32 %v1101_v41, %v1095_v53 }
 0x152   : > { %v1082_v61 = vadd.f32 %v1081_v33, %v1080_v43  ;;  %v1103_v44 = vrot.slane %v1102_v2, 4 }
 0x154   : > { %v1083_v13 = vrot.slane %v1082_v61, 2  ;;  %v1104_v38 = vadd.f32 %v1103_v44, %v1102_v2 }
 0x156   : > { %v1084_v8 = vadd.f32 %v1083_v13, %v1082_v61  ;;  %v1105_v25 = vrot.slane %v1104_v38, 2 }
 0x158   : > { %v1085_v46 = vrot.slane %v1084_v8, 1  ;;  %v1106_v60 = vadd.f32 %v1105_v25, %v1104_v38 }
 0x15a   : > { %v1086_v49 = vadd.f32 %v1085_v46, %v1084_v8  ;;  %v1107_v31 = vrot.slane %v1106_v60, 1 }
 0x15c   : > { %1087 = vst [vmem:[%s2127_s25] sm:$0x1] %v1086_v49  ;;  %v1108_v57 = vadd.f32 %v1107_v31, %v1106_v60 }
 0x15e   : > { %1109 = vst [vmem:[%s2127_s25 + $0x1] sm:$0x1] %v1108_v57 }
 0x15f PF: > { %s16_s18 = sadd.s32 1, %s1387_s18  }
 0x160   : > { %p13_p6 = scmp.ge.s32.totalorder %s16_s18, 4  }
 0x162   :  { %15 = sbr.rel (!%p13_p6) target bundleno = 1 (0x1), region = 92 }

// kernel: _res_sep_conv_impl.7
= control target key start
LH: loop header
LB: loop body
LE: loop exit
PB: predicated region body
PF: predicated region fallthrough
CT: control target
= control target key end

     0   :  { %s493_s21 = smov 0   ;;  %s560_s0 = inlined_call_operand.vmem [shape: f32[128,128], index: 0, kind: input, shape index: {}]   ;;  %s561_s1 = inlined_call_operand.vmem [shape: f32[128,128], index: 1, kind: input, shape index: {}]   ;;  %s562_s2 = inlined_call_operand.vmem [shape: f32[1,128], index: 2, kind: input, shape index: {}]   ;;  %s563_s3 = inlined_call_operand.vmem [shape: f32[1,128], index: 3, kind: input, shape index: {}]   ;;  %s564_s4 = inlined_call_operand.vmem [shape: f32[1,128], index: 4, kind: input, shape index: {}]   ;;  %s565_s5 = inlined_call_operand.vmem [shape: f32[1,128], index: 5, kind: input, shape index: {}]   ;;  %s566_s6 = inlined_call_operand.vmem [shape: f32[128,128], index: 6, kind: output, shape index: {}]  }
   0x1 LB: > { %s425_s22 = sadd.s32 4294967295, %s456_s21   ;;  %p429_p0 = scmp.ge.s32.totalorder %s456_s21, 1  ;;  %s456_s21 = sphi %s493_s21, %s16_s21  }
   0x2   : > { %p224_p1 = scmp.lt.s32.totalorder %s456_s21, 3 }
   0x4   : > { %p225_p2 = pnand %p429_p0, %p224_p1 }
   0x5   : > { %s430_s23 = sshll.u32 (!%p225_p2), %s425_s22, 3 }
   0x6   : > { %228 = sbr.rel (%p225_p2) target bundleno = 32 (0x20), region = 44  ;;  %p260_p3 = scmp.lt.s32.totalorder (!%p225_p2), %s430_s23, 15 }
   0xb   : > { %s568_s23 = smov (!%p260_p3, %s430_s23), 15  ;;  %v446_v0 = vld [vmem:[%s562_s2] ss:$0 sm:$0xff] }
   0xc   : > { %v448_v1 = vld [vmem:[%s564_s4] ss:$0 sm:$0xff]  ;;  %s507_s28 = sshll.u32 %s568_s23, 3 }
   0xd   : > { %s513_s7 = scalar_lea.vmem %s560_s0, %s507_s28  ;;  %s519_s10 = scalar_lea.vmem %s561_s1, %s507_s28  ;;  %v447_v2 = vld [vmem:[%s563_s3] ss:$0 sm:$0xff] }
   0xe   : > { %v277_v3 = vld [vmem:[%s513_s7] sm:$0xff]  ;;  %v278_v5 = vld [vmem:[%s513_s7 + $0x8] sm:$0xff]  ;;  %v279_v11 = vld [vmem:[%s513_s7 + $0x10] sm:$0xff]  ;;  %s545_s17 = scalar_lea.vmem %s566_s6, %s507_s28 }
   0xf   : > { %v309_v4 = vld [vmem:[%s519_s10] sm:$0xff]  ;;  %v289_v6 = vmul.f32 %v446_v0, %v277_v3  ;;  %v290_v9 = vmul.f32 %v446_v0, %v278_v5  ;;  %v310_v10 = vld [vmem:[%s519_s10 + $0x8] sm:$0xff]  ;;  %v311_v12 = vld [vmem:[%s519_s10 + $0x10] sm:$0xff]  ;;  %v291_v14 = vmul.f32 %v446_v0, %v279_v11 }
  0x10   : > { %v321_v7 = vmul.f32 %v448_v1, %v309_v4  ;;  %v449_v8 = vld [vmem:[%s565_s5] ss:$0 sm:$0xff]  ;;  %v322_v13 = vmul.f32 %v448_v1, %v310_v10  ;;  %v323_v15 = vmul.f32 %v448_v1, %v311_v12  ;;  %v280_v16 = vld [vmem:[%s513_s7 + $0x18] sm:$0xff]  ;;  %v282_v24 = vld [vmem:[%s513_s7 + $0x28] sm:$0xff] }
  0x11   : > { %v312_v17 = vld [vmem:[%s519_s10 + $0x18] sm:$0xff]  ;;  %v281_v18 = vld [vmem:[%s513_s7 + $0x20] sm:$0xff]  ;;  %v301_v19 = vadd.f32 %v447_v2, %v289_v6  ;;  %v302_v20 = vadd.f32 %v447_v2, %v290_v9  ;;  %v292_v21 = vmul.f32 %v446_v0, %v280_v16  ;;  %v314_v25 = vld [vmem:[%s519_s10 + $0x28] sm:$0xff]  ;;  %v303_v26 = vadd.f32 %v447_v2, %v291_v14 }
  0x12   : > { %v324_v22 = vmul.f32 %v448_v1, %v312_v17  ;;  %v313_v23 = vld [vmem:[%s519_s10 + $0x20] sm:$0xff]  ;;  %v293_v27 = vmul.f32 %v446_v0, %v281_v18  ;;  %v294_v29 = vmul.f32 %v446_v0, %v282_v24  ;;  %v283_v30 = vld [vmem:[%s513_s7 + $0x30] sm:$0xff]  ;;  %v326_v35 = vmul.f32 %v448_v1, %v314_v25  ;;  %v284_v40 = vld [vmem:[%s513_s7 + $0x38] sm:$0xff] }
  0x13   : > { %v325_v28 = vmul.f32 %v448_v1, %v313_v23  ;;  %v315_v31 = vld [vmem:[%s519_s10 + $0x30] sm:$0xff]  ;;  %v329_v32 = vadd.f32 %v321_v7, %v301_v19  ;;  %v330_v33 = vadd.f32 %v322_v13, %v302_v20  ;;  %v304_v34 = vadd.f32 %v447_v2, %v292_v21  ;;  %v316_v41 = vld [vmem:[%s519_s10 + $0x38] sm:$0xff] }
  0x14   : > { %v331_v36 = vadd.f32 %v323_v15, %v303_v26  ;;  %v305_v37 = vadd.f32 %v447_v2, %v293_v27  ;;  %v306_v38 = vadd.f32 %v447_v2, %v294_v29  ;;  %v295_v39 = vmul.f32 %v446_v0, %v283_v30 }
  0x15   : > { %v341_v42 = vadd.f32 %v449_v8, %v329_v32  ;;  %v342_v43 = vadd.f32 %v449_v8, %v330_v33  ;;  %v332_v44 = vadd.f32 %v324_v22, %v304_v34  ;;  %v327_v45 = vmul.f32 %v448_v1, %v315_v31 }
  0x16   : > { %v343_v46 = vadd.f32 %v449_v8, %v331_v36  ;;  %v333_v47 = vadd.f32 %v325_v28, %v305_v37  ;;  %v334_v48 = vadd.f32 %v326_v35, %v306_v38  ;;  %v307_v49 = vadd.f32 %v447_v2, %v295_v39 }
  0x17   : > { %349 = vst [vmem:[%s545_s17] sm:$0xff] %v341_v42  ;;  %v344_v50 = vadd.f32 %v449_v8, %v332_v44  ;;  %v296_v51 = vmul.f32 %v446_v0, %v284_v40  ;;  %v328_v52 = vmul.f32 %v448_v1, %v316_v41 }
  0x18   : > { %350 = vst [vmem:[%s545_s17 + $0x8] sm:$0xff] %v342_v43  ;;  %v345_v53 = vadd.f32 %v449_v8, %v333_v47  ;;  %v346_v54 = vadd.f32 %v449_v8, %v334_v48  ;;  %v335_v55 = vadd.f32 %v327_v45, %v307_v49 }
  0x19   : > { %351 = vst [vmem:[%s545_s17 + $0x10] sm:$0xff] %v343_v46  ;;  %v308_v56 = vadd.f32 %v447_v2, %v296_v51 }
  0x1a   : > { %352 = vst [vmem:[%s545_s17 + $0x18] sm:$0xff] %v344_v50  ;;  %v347_v57 = vadd.f32 %v449_v8, %v335_v55 }
  0x1b   : > { %353 = vst [vmem:[%s545_s17 + $0x20] sm:$0xff] %v345_v53  ;;  %v336_v58 = vadd.f32 %v328_v52, %v308_v56 }
  0x1c   : > { %354 = vst [vmem:[%s545_s17 + $0x28] sm:$0xff] %v346_v54 }
  0x1d   : > { %355 = vst [vmem:[%s545_s17 + $0x30] sm:$0xff] %v347_v57  ;;  %v348_v59 = vadd.f32 %v449_v8, %v336_v58 }
  0x1f   : > { %356 = vst [vmem:[%s545_s17 + $0x38] sm:$0xff] %v348_v59 }
  0x20 PF: > { %s16_s21 = sadd.s32 1, %s456_s21  }
  0x21   : > { %p13_p4 = scmp.ge.s32.totalorder %s16_s21, 4  }
  0x23   :  { %15 = sbr.rel (!%p13_p4) target bundleno = 1 (0x1), region = 77 }

</bundles_post_ra>
